<compile_context>
chip_gen: v5e
topology: v5e:2x2
jax: 0.10.0
libtpu: 0.0.40
codegen_flags: <defaults>
</compile_context>

<pallas_src>
import functools

import jax
import jax.numpy as jnp
import numpy as np
from jax.experimental import pallas as pl
from jax.experimental.pallas import tpu as pltpu


# ----------------------- ConvWrapper3d.calc_shape ---------------------------
DEFAULTS = {'kernel_size': 1, 'stride': 1, 'padding': 0, 'dilation': 1}


def calc_shape(in_shape, params):
    """Python port of ConvWrapper3d.calc_shape.

    in_shape is (C_in, H, W); the time axis is implicit (depth kernel comes
    from 'frame_stack', depth stride/padding/dilation stay at the defaults).
    Returns ((C_out, H_out, W_out), full_conv_params).
    """
    depth_params = dict(DEFAULTS)
    params = {**DEFAULTS, **params}
    values = {}
    if 'frame_stack' in params:
        depth_params['kernel_size'] = params['frame_stack']
        del params['frame_stack']
    for k in depth_params:
        v = params[k]
        if isinstance(v, tuple) and len(v) == 2:
            params[k] = (depth_params[k], v[0], v[1])
        else:
            params[k] = (depth_params[k], v, v)
        values[k] = np.asarray(params[k][1:], dtype=np.float64)
    rest = np.floor(
        (np.asarray(in_shape[1:], dtype=np.float64) + 2 * values['padding']
         - values['dilation'] * (values['kernel_size'] - 1) - 1)
        / values['stride'] + 1).astype(np.int64)
    out_shape = tuple([params['out_channels']] + [int(r) for r in rest])
    return out_shape, params


def _round_up(x, m):
    return (x + m - 1) // m * m


# ----------------------------- Pallas kernel --------------------------------
def _conv_im2col_gemm_kernel(x_ref, w_ref, b_ref, o_ref, cols_ref, *,
                             tap_offsets, c_in, n_out):
    """In-kernel im2col + single K-deep GEMM (bf16 operands, f32 accumulate).

    x_ref:    (1, C_in, N_in)  bf16  flattened, zero-padded input (one batch)
    w_ref:    (C_out_p, K)     bf16  weights, K ordered (kt, kh, kw, ci)
    b_ref:    (C_out_p, 1)     f32   bias column
    o_ref:    (1, C_out_p, N_out) f32  full-padded-grid conv output
    cols_ref: (K, N_out)       f32   VMEM scratch for the column matrix
    """
    # Assemble the column matrix in VMEM from static lane-shifted slices of
    # the flattened padded input.  Zero-FLOP data movement, never touches HBM.
    for j, off in enumerate(tap_offsets):
        cols_ref[pl.ds(j * c_in, c_in), :] = (
            x_ref[0, :, pl.ds(off, n_out)].astype(jnp.float32))
    # Single K-deep GEMM on the MXU; bf16 inputs, f32 accumulation, fused bias.
    out = jnp.dot(w_ref[...], cols_ref[...].astype(jnp.bfloat16),
                  preferred_element_type=jnp.float32)
    o_ref[0] = (out + b_ref[...]).astype(o_ref.dtype)


# -------------------------- ConvWrapper3d.forward ---------------------------
@functools.partial(jax.jit, static_argnames=("stride", "padding", "dilation"))
def conv_wrapper3d_forward(x, weight, bias, *, stride, padding, dilation):
    """x: (batch, C, time, H, W); weight: (C_out, C_in, KD, KH, KW).

    Note: the torch module fixes depth padding at 0; pd is honored anyway
    (harmless generalisation).  stride > 1 is supported via wrapper-side
    subsampling of the stride-1 result (exact, just overcomputed).
    """
    bsz, c_in, t, h, w = x.shape
    c_out, _, kd, kh, kw = weight.shape
    sd, sh, sw = stride
    pd, ph, pw = padding
    dd, dh, dw = dilation
    t_out = (t + 2 * pd - dd * (kd - 1) - 1) // sd + 1
    h_out = (h + 2 * ph - dh * (kh - 1) - 1) // sh + 1
    w_out = (w + 2 * pw - dw * (kw - 1) - 1) // sw + 1

    t_pad, h_pad, w_pad = t + 2 * pd, h + 2 * ph, w + 2 * pw
    hw_pad = h_pad * w_pad
    n_grid = t_pad * hw_pad

    # Flat-index offset of each conv tap in the flattened padded grid.
    tap_offsets = tuple(
        a * dd * hw_pad + bb * dh * w_pad + cc * dw
        for a in range(kd) for bb in range(kh) for cc in range(kw))
    max_off = max(tap_offsets)

    c_out_p = _round_up(c_out, 8)                # fill vreg sublanes
    k_dim = kd * kh * kw * c_in                  # 72 at the demo config
    n_out_p = _round_up(n_grid, 128)             # lane-dense kernel output
    n_in_p = _round_up(n_out_p + max_off, 128)   # input window incl. tap halo

    # Cheap wrapper-side prep (single small fused XLA op over the real input):
    # zero-pad, flatten the padded grid onto the lane axis, cast to bf16.
    xp = jnp.pad(x, ((0, 0), (0, 0), (pd, pd), (ph, ph), (pw, pw)))
    xflat = xp.reshape(bsz, c_in, n_grid).astype(jnp.bfloat16)
    xflat = jnp.pad(xflat, ((0, 0), (0, 0), (0, n_in_p - n_grid)))

    # Weight as (C_out, K) with K ordered (kt, kh, kw, ci) to match the
    # in-kernel column assembly; bias as an f32 column.
    wmat = weight.transpose(0, 2, 3, 4, 1).reshape(c_out, k_dim)
    wmat = wmat.astype(jnp.bfloat16)
    bcol = bias.reshape(c_out, 1).astype(jnp.float32)
    if c_out_p != c_out:
        wmat = jnp.pad(wmat, ((0, c_out_p - c_out), (0, 0)))
        bcol = jnp.pad(bcol, ((0, c_out_p - c_out), (0, 0)))

    kernel = functools.partial(
        _conv_im2col_gemm_kernel,
        tap_offsets=tap_offsets, c_in=c_in, n_out=n_out_p)

    out_flat = pl.pallas_call(
        kernel,
        out_shape=jax.ShapeDtypeStruct((bsz, c_out_p, n_out_p), jnp.float32),
        grid=(bsz,),
        in_specs=[
            pl.BlockSpec((1, c_in, n_in_p), lambda b: (b, 0, 0)),
            pl.BlockSpec((c_out_p, k_dim), lambda b: (0, 0)),   # VMEM-resident
            pl.BlockSpec((c_out_p, 1), lambda b: (0, 0)),       # VMEM-resident
        ],
        out_specs=pl.BlockSpec((1, c_out_p, n_out_p), lambda b: (b, 0, 0)),
        scratch_shapes=[pltpu.VMEM((k_dim, n_out_p), jnp.float32)],
        compiler_params=pltpu.CompilerParams(
            dimension_semantics=("parallel",)),   # both TCs busy on v7x
    )(xflat, wmat, bcol)

    # Epilogue: drop channel/lane padding, un-flatten the padded grid and cut
    # away the conv halo (plus stride subsampling).  Single small fused XLA
    # op, no transpose — batch/channel order already matches the module.
    out = out_flat[:, :c_out, :n_grid].reshape(bsz, c_out, t_pad, h_pad, w_pad)
    out = out[:, :,
              0:(t_out - 1) * sd + 1:sd,
              0:(h_out - 1) * sh + 1:sh,
              0:(w_out - 1) * sw + 1:sw]
    return out


# ---------------------------------- main -------------------------------------
if __name__ == "__main__":
    # Module config: in_shape = (C=4, H=16, W=16); time handled at runtime.
    # TODO(synk): torch named-tensor align_to/refine_names is layout
    # bookkeeping only; inputs here are already (batch, C, time, H, W).
    in_shape = (4, 16, 16)
    conv_params = {'out_channels': 8, 'kernel_size': 3, 'padding': 1,
                   'frame_stack': 2}
    out_shape, full_params = calc_shape(in_shape, conv_params)
    kernel_size = full_params['kernel_size']   # (2, 3, 3)
    stride = full_params['stride']             # (1, 1, 1)
    padding = full_params['padding']           # (0, 1, 1)
    dilation = full_params['dilation']         # (1, 1, 1)
    c_out = full_params['out_channels']
    c_in = in_shape[0]

    batch, t_len = 2, 8
    key = jax.random.PRNGKey(0)
    kx, kwt, kb = jax.random.split(key, 3)
    x = jax.random.normal(kx, (batch, c_in, t_len) + in_shape[1:], jnp.float32)
    fan_in = c_in * int(np.prod(kernel_size))
    weight = (1.0 / np.sqrt(fan_in)) * jax.random.normal(
        kwt, (c_out, c_in) + tuple(kernel_size), jnp.float32)
    bias = 0.1 * jax.random.normal(kb, (c_out,), jnp.float32)

    out = conv_wrapper3d_forward(x, weight, bias, stride=stride,
                                 padding=padding, dilation=dilation)
    out = jax.block_until_ready(out)

    t_out = t_len - kernel_size[0] + 1        # depth: stride 1, pad 0, dil 1
    expected = (batch, out_shape[0], t_out) + tuple(out_shape[1:])
    assert out.shape == expected, (out.shape, expected)

    # Cross-check against XLA's conv (same semantics as torch.nn.Conv3d).
    ref = jax.lax.conv_general_dilated(
        x, weight, window_strides=stride,
        padding=[(padding[0], padding[0]), (padding[1], padding[1]),
                 (padding[2], padding[2])],
        rhs_dilation=dilation,
        dimension_numbers=('NCDHW', 'OIDHW', 'NCDHW'))
    ref = ref + bias.reshape(1, c_out, 1, 1, 1)
    err = float(jnp.max(jnp.abs(out - ref)))
    assert err < 5e-2, err            # loose enough for bf16 MXU inputs

    print("KERNEL_OK")
</pallas_src>

<mosaic_0001>
module attributes {stable_mosaic.version = 11 : i64} {
  func.func @_conv_im2col_gemm_kernel(%arg0: i32, %arg1: memref<1x4x3072xbf16, #tpu.memory_space<vmem>>, %arg2: memref<8x72xbf16, #tpu.memory_space<vmem>>, %arg3: memref<8x1xf32, #tpu.memory_space<vmem>>, %arg4: memref<1x8x2688xf32, #tpu.memory_space<vmem>>, %arg5: memref<72x2688xf32, #tpu.memory_space<vmem>>) attributes {dimension_semantics = [#tpu.dimension_semantics<parallel>], iteration_bounds = array<i64: 2>, scalar_prefetch = 0 : i64, scratch_operands = 1 : i64, tpu.core_type = #tpu.core_type<tc>, window_params = [{transform_indices = @transform_0, window_bounds = array<i64: 1, 4, 3072>}, {pipeline_mode = #tpu.pipeline_mode<synchronous>, transform_indices = @transform_1, window_bounds = array<i64: 8, 72>}, {pipeline_mode = #tpu.pipeline_mode<synchronous>, transform_indices = @transform_2, window_bounds = array<i64: 8, 1>}, {transform_indices = @transform_3, window_bounds = array<i64: 1, 8, 2688>}]} {
    %c0 = arith.constant 0 : index
    %c0_0 = arith.constant 0 : index
    %c0_1 = arith.constant 0 : index
    %0 = vector.load %arg1[%c0, %c0_0, %c0_1] : memref<1x4x3072xbf16, #tpu.memory_space<vmem>>, vector<1x4x2688xbf16>
    %1 = vector.shape_cast %0 : vector<1x4x2688xbf16> to vector<4x2688xbf16>
    %2 = arith.extf %1 : vector<4x2688xbf16> to vector<4x2688xf32>
    %c0_2 = arith.constant 0 : index
    %c0_3 = arith.constant 0 : index
    %3 = vector.load %arg5[%c0_2, %c0_3] : memref<72x2688xf32, #tpu.memory_space<vmem>>, vector<4x2688xf32>
    tpu.vector_store %arg5[%c0_2, %c0_3], %2 {strides = array<i32>} : memref<72x2688xf32, #tpu.memory_space<vmem>>, vector<4x2688xf32>,
    %c0_4 = arith.constant 0 : index
    %c0_5 = arith.constant 0 : index
    %c1 = arith.constant 1 : index
    %4 = vector.load %arg1[%c0_4, %c0_5, %c1] : memref<1x4x3072xbf16, #tpu.memory_space<vmem>>, vector<1x4x2688xbf16>
    %5 = vector.shape_cast %4 : vector<1x4x2688xbf16> to vector<4x2688xbf16>
    %6 = arith.extf %5 : vector<4x2688xbf16> to vector<4x2688xf32>
    %c4 = arith.constant 4 : index
    %c0_6 = arith.constant 0 : index
    %7 = vector.load %arg5[%c4, %c0_6] : memref<72x2688xf32, #tpu.memory_space<vmem>>, vector<4x2688xf32>
    tpu.vector_store %arg5[%c4, %c0_6], %6 {strides = array<i32>} : memref<72x2688xf32, #tpu.memory_space<vmem>>, vector<4x2688xf32>,
    %c0_7 = arith.constant 0 : index
    %c0_8 = arith.constant 0 : index
    %c2 = arith.constant 2 : index
    %8 = vector.load %arg1[%c0_7, %c0_8, %c2] : memref<1x4x3072xbf16, #tpu.memory_space<vmem>>, vector<1x4x2688xbf16>
    %9 = vector.shape_cast %8 : vector<1x4x2688xbf16> to vector<4x2688xbf16>
    %10 = arith.extf %9 : vector<4x2688xbf16> to vector<4x2688xf32>
    %c8 = arith.constant 8 : index
    %c0_9 = arith.constant 0 : index
    %11 = vector.load %arg5[%c8, %c0_9] : memref<72x2688xf32, #tpu.memory_space<vmem>>, vector<4x2688xf32>
    tpu.vector_store %arg5[%c8, %c0_9], %10 {strides = array<i32>} : memref<72x2688xf32, #tpu.memory_space<vmem>>, vector<4x2688xf32>,
    %c0_10 = arith.constant 0 : index
    %c0_11 = arith.constant 0 : index
    %c18 = arith.constant 18 : index
    %12 = vector.load %arg1[%c0_10, %c0_11, %c18] : memref<1x4x3072xbf16, #tpu.memory_space<vmem>>, vector<1x4x2688xbf16>
    %13 = vector.shape_cast %12 : vector<1x4x2688xbf16> to vector<4x2688xbf16>
    %14 = arith.extf %13 : vector<4x2688xbf16> to vector<4x2688xf32>
    %c12 = arith.constant 12 : index
    %c0_12 = arith.constant 0 : index
    %15 = vector.load %arg5[%c12, %c0_12] : memref<72x2688xf32, #tpu.memory_space<vmem>>, vector<4x2688xf32>
    tpu.vector_store %arg5[%c12, %c0_12], %14 {strides = array<i32>} : memref<72x2688xf32, #tpu.memory_space<vmem>>, vector<4x2688xf32>,
    %c0_13 = arith.constant 0 : index
    %c0_14 = arith.constant 0 : index
    %c19 = arith.constant 19 : index
    %16 = vector.load %arg1[%c0_13, %c0_14, %c19] : memref<1x4x3072xbf16, #tpu.memory_space<vmem>>, vector<1x4x2688xbf16>
    %17 = vector.shape_cast %16 : vector<1x4x2688xbf16> to vector<4x2688xbf16>
    %18 = arith.extf %17 : vector<4x2688xbf16> to vector<4x2688xf32>
    %c16 = arith.constant 16 : index
    %c0_15 = arith.constant 0 : index
    %19 = vector.load %arg5[%c16, %c0_15] : memref<72x2688xf32, #tpu.memory_space<vmem>>, vector<4x2688xf32>
    tpu.vector_store %arg5[%c16, %c0_15], %18 {strides = array<i32>} : memref<72x2688xf32, #tpu.memory_space<vmem>>, vector<4x2688xf32>,
    %c0_16 = arith.constant 0 : index
    %c0_17 = arith.constant 0 : index
    %c20 = arith.constant 20 : index
    %20 = vector.load %arg1[%c0_16, %c0_17, %c20] : memref<1x4x3072xbf16, #tpu.memory_space<vmem>>, vector<1x4x2688xbf16>
    %21 = vector.shape_cast %20 : vector<1x4x2688xbf16> to vector<4x2688xbf16>
    %22 = arith.extf %21 : vector<4x2688xbf16> to vector<4x2688xf32>
    %c20_18 = arith.constant 20 : index
    %c0_19 = arith.constant 0 : index
    %23 = vector.load %arg5[%c20_18, %c0_19] : memref<72x2688xf32, #tpu.memory_space<vmem>>, vector<4x2688xf32>
    tpu.vector_store %arg5[%c20_18, %c0_19], %22 {strides = array<i32>} : memref<72x2688xf32, #tpu.memory_space<vmem>>, vector<4x2688xf32>,
    %c0_20 = arith.constant 0 : index
    %c0_21 = arith.constant 0 : index
    %c36 = arith.constant 36 : index
    %24 = vector.load %arg1[%c0_20, %c0_21, %c36] : memref<1x4x3072xbf16, #tpu.memory_space<vmem>>, vector<1x4x2688xbf16>
    %25 = vector.shape_cast %24 : vector<1x4x2688xbf16> to vector<4x2688xbf16>
    %26 = arith.extf %25 : vector<4x2688xbf16> to vector<4x2688xf32>
    %c24 = arith.constant 24 : index
    %c0_22 = arith.constant 0 : index
    %27 = vector.load %arg5[%c24, %c0_22] : memref<72x2688xf32, #tpu.memory_space<vmem>>, vector<4x2688xf32>
    tpu.vector_store %arg5[%c24, %c0_22], %26 {strides = array<i32>} : memref<72x2688xf32, #tpu.memory_space<vmem>>, vector<4x2688xf32>,
    %c0_23 = arith.constant 0 : index
    %c0_24 = arith.constant 0 : index
    %c37 = arith.constant 37 : index
    %28 = vector.load %arg1[%c0_23, %c0_24, %c37] : memref<1x4x3072xbf16, #tpu.memory_space<vmem>>, vector<1x4x2688xbf16>
    %29 = vector.shape_cast %28 : vector<1x4x2688xbf16> to vector<4x2688xbf16>
    %30 = arith.extf %29 : vector<4x2688xbf16> to vector<4x2688xf32>
    %c28 = arith.constant 28 : index
    %c0_25 = arith.constant 0 : index
    %31 = vector.load %arg5[%c28, %c0_25] : memref<72x2688xf32, #tpu.memory_space<vmem>>, vector<4x2688xf32>
    tpu.vector_store %arg5[%c28, %c0_25], %30 {strides = array<i32>} : memref<72x2688xf32, #tpu.memory_space<vmem>>, vector<4x2688xf32>,
    %c0_26 = arith.constant 0 : index
    %c0_27 = arith.constant 0 : index
    %c38 = arith.constant 38 : index
    %32 = vector.load %arg1[%c0_26, %c0_27, %c38] : memref<1x4x3072xbf16, #tpu.memory_space<vmem>>, vector<1x4x2688xbf16>
    %33 = vector.shape_cast %32 : vector<1x4x2688xbf16> to vector<4x2688xbf16>
    %34 = arith.extf %33 : vector<4x2688xbf16> to vector<4x2688xf32>
    %c32 = arith.constant 32 : index
    %c0_28 = arith.constant 0 : index
    %35 = vector.load %arg5[%c32, %c0_28] : memref<72x2688xf32, #tpu.memory_space<vmem>>, vector<4x2688xf32>
    tpu.vector_store %arg5[%c32, %c0_28], %34 {strides = array<i32>} : memref<72x2688xf32, #tpu.memory_space<vmem>>, vector<4x2688xf32>,
    %c0_29 = arith.constant 0 : index
    %c0_30 = arith.constant 0 : index
    %c324 = arith.constant 324 : index
    %36 = vector.load %arg1[%c0_29, %c0_30, %c324] : memref<1x4x3072xbf16, #tpu.memory_space<vmem>>, vector<1x4x2688xbf16>
    %37 = vector.shape_cast %36 : vector<1x4x2688xbf16> to vector<4x2688xbf16>
    %38 = arith.extf %37 : vector<4x2688xbf16> to vector<4x2688xf32>
    %c36_31 = arith.constant 36 : index
    %c0_32 = arith.constant 0 : index
    %39 = vector.load %arg5[%c36_31, %c0_32] : memref<72x2688xf32, #tpu.memory_space<vmem>>, vector<4x2688xf32>
    tpu.vector_store %arg5[%c36_31, %c0_32], %38 {strides = array<i32>} : memref<72x2688xf32, #tpu.memory_space<vmem>>, vector<4x2688xf32>,
    %c0_33 = arith.constant 0 : index
    %c0_34 = arith.constant 0 : index
    %c325 = arith.constant 325 : index
    %40 = vector.load %arg1[%c0_33, %c0_34, %c325] : memref<1x4x3072xbf16, #tpu.memory_space<vmem>>, vector<1x4x2688xbf16>
    %41 = vector.shape_cast %40 : vector<1x4x2688xbf16> to vector<4x2688xbf16>
    %42 = arith.extf %41 : vector<4x2688xbf16> to vector<4x2688xf32>
    %c40 = arith.constant 40 : index
    %c0_35 = arith.constant 0 : index
    %43 = vector.load %arg5[%c40, %c0_35] : memref<72x2688xf32, #tpu.memory_space<vmem>>, vector<4x2688xf32>
    tpu.vector_store %arg5[%c40, %c0_35], %42 {strides = array<i32>} : memref<72x2688xf32, #tpu.memory_space<vmem>>, vector<4x2688xf32>,
    %c0_36 = arith.constant 0 : index
    %c0_37 = arith.constant 0 : index
    %c326 = arith.constant 326 : index
    %44 = vector.load %arg1[%c0_36, %c0_37, %c326] : memref<1x4x3072xbf16, #tpu.memory_space<vmem>>, vector<1x4x2688xbf16>
    %45 = vector.shape_cast %44 : vector<1x4x2688xbf16> to vector<4x2688xbf16>
    %46 = arith.extf %45 : vector<4x2688xbf16> to vector<4x2688xf32>
    %c44 = arith.constant 44 : index
    %c0_38 = arith.constant 0 : index
    %47 = vector.load %arg5[%c44, %c0_38] : memref<72x2688xf32, #tpu.memory_space<vmem>>, vector<4x2688xf32>
    tpu.vector_store %arg5[%c44, %c0_38], %46 {strides = array<i32>} : memref<72x2688xf32, #tpu.memory_space<vmem>>, vector<4x2688xf32>,
    %c0_39 = arith.constant 0 : index
    %c0_40 = arith.constant 0 : index
    %c342 = arith.constant 342 : index
    %48 = vector.load %arg1[%c0_39, %c0_40, %c342] : memref<1x4x3072xbf16, #tpu.memory_space<vmem>>, vector<1x4x2688xbf16>
    %49 = vector.shape_cast %48 : vector<1x4x2688xbf16> to vector<4x2688xbf16>
    %50 = arith.extf %49 : vector<4x2688xbf16> to vector<4x2688xf32>
    %c48 = arith.constant 48 : index
    %c0_41 = arith.constant 0 : index
    %51 = vector.load %arg5[%c48, %c0_41] : memref<72x2688xf32, #tpu.memory_space<vmem>>, vector<4x2688xf32>
    tpu.vector_store %arg5[%c48, %c0_41], %50 {strides = array<i32>} : memref<72x2688xf32, #tpu.memory_space<vmem>>, vector<4x2688xf32>,
    %c0_42 = arith.constant 0 : index
    %c0_43 = arith.constant 0 : index
    %c343 = arith.constant 343 : index
    %52 = vector.load %arg1[%c0_42, %c0_43, %c343] : memref<1x4x3072xbf16, #tpu.memory_space<vmem>>, vector<1x4x2688xbf16>
    %53 = vector.shape_cast %52 : vector<1x4x2688xbf16> to vector<4x2688xbf16>
    %54 = arith.extf %53 : vector<4x2688xbf16> to vector<4x2688xf32>
    %c52 = arith.constant 52 : index
    %c0_44 = arith.constant 0 : index
    %55 = vector.load %arg5[%c52, %c0_44] : memref<72x2688xf32, #tpu.memory_space<vmem>>, vector<4x2688xf32>
    tpu.vector_store %arg5[%c52, %c0_44], %54 {strides = array<i32>} : memref<72x2688xf32, #tpu.memory_space<vmem>>, vector<4x2688xf32>,
    %c0_45 = arith.constant 0 : index
    %c0_46 = arith.constant 0 : index
    %c344 = arith.constant 344 : index
    %56 = vector.load %arg1[%c0_45, %c0_46, %c344] : memref<1x4x3072xbf16, #tpu.memory_space<vmem>>, vector<1x4x2688xbf16>
    %57 = vector.shape_cast %56 : vector<1x4x2688xbf16> to vector<4x2688xbf16>
    %58 = arith.extf %57 : vector<4x2688xbf16> to vector<4x2688xf32>
    %c56 = arith.constant 56 : index
    %c0_47 = arith.constant 0 : index
    %59 = vector.load %arg5[%c56, %c0_47] : memref<72x2688xf32, #tpu.memory_space<vmem>>, vector<4x2688xf32>
    tpu.vector_store %arg5[%c56, %c0_47], %58 {strides = array<i32>} : memref<72x2688xf32, #tpu.memory_space<vmem>>, vector<4x2688xf32>,
    %c0_48 = arith.constant 0 : index
    %c0_49 = arith.constant 0 : index
    %c360 = arith.constant 360 : index
    %60 = vector.load %arg1[%c0_48, %c0_49, %c360] : memref<1x4x3072xbf16, #tpu.memory_space<vmem>>, vector<1x4x2688xbf16>
    %61 = vector.shape_cast %60 : vector<1x4x2688xbf16> to vector<4x2688xbf16>
    %62 = arith.extf %61 : vector<4x2688xbf16> to vector<4x2688xf32>
    %c60 = arith.constant 60 : index
    %c0_50 = arith.constant 0 : index
    %63 = vector.load %arg5[%c60, %c0_50] : memref<72x2688xf32, #tpu.memory_space<vmem>>, vector<4x2688xf32>
    tpu.vector_store %arg5[%c60, %c0_50], %62 {strides = array<i32>} : memref<72x2688xf32, #tpu.memory_space<vmem>>, vector<4x2688xf32>,
    %c0_51 = arith.constant 0 : index
    %c0_52 = arith.constant 0 : index
    %c361 = arith.constant 361 : index
    %64 = vector.load %arg1[%c0_51, %c0_52, %c361] : memref<1x4x3072xbf16, #tpu.memory_space<vmem>>, vector<1x4x2688xbf16>
    %65 = vector.shape_cast %64 : vector<1x4x2688xbf16> to vector<4x2688xbf16>
    %66 = arith.extf %65 : vector<4x2688xbf16> to vector<4x2688xf32>
    %c64 = arith.constant 64 : index
    %c0_53 = arith.constant 0 : index
    %67 = vector.load %arg5[%c64, %c0_53] : memref<72x2688xf32, #tpu.memory_space<vmem>>, vector<4x2688xf32>
    tpu.vector_store %arg5[%c64, %c0_53], %66 {strides = array<i32>} : memref<72x2688xf32, #tpu.memory_space<vmem>>, vector<4x2688xf32>,
    %c0_54 = arith.constant 0 : index
    %c0_55 = arith.constant 0 : index
    %c362 = arith.constant 362 : index
    %68 = vector.load %arg1[%c0_54, %c0_55, %c362] : memref<1x4x3072xbf16, #tpu.memory_space<vmem>>, vector<1x4x2688xbf16>
    %69 = vector.shape_cast %68 : vector<1x4x2688xbf16> to vector<4x2688xbf16>
    %70 = arith.extf %69 : vector<4x2688xbf16> to vector<4x2688xf32>
    %c68 = arith.constant 68 : index
    %c0_56 = arith.constant 0 : index
    %71 = vector.load %arg5[%c68, %c0_56] : memref<72x2688xf32, #tpu.memory_space<vmem>>, vector<4x2688xf32>
    tpu.vector_store %arg5[%c68, %c0_56], %70 {strides = array<i32>} : memref<72x2688xf32, #tpu.memory_space<vmem>>, vector<4x2688xf32>,
    %c0_57 = arith.constant 0 : index
    %c0_58 = arith.constant 0 : index
    %72 = vector.load %arg2[%c0_57, %c0_58] : memref<8x72xbf16, #tpu.memory_space<vmem>>, vector<8x72xbf16>
    %c0_59 = arith.constant 0 : index
    %c0_60 = arith.constant 0 : index
    %73 = vector.load %arg5[%c0_59, %c0_60] : memref<72x2688xf32, #tpu.memory_space<vmem>>, vector<72x2688xf32>
    %74 = arith.truncf %73 : vector<72x2688xf32> to vector<72x2688xbf16>
    %cst = arith.constant dense<0.000000e+00> : vector<8x2688xf32>
    %75 = tpu.matmul %72, %74, %cst {dimension_numbers = #tpu.dot_dimension_numbers<[1], [0], [0], [1], [0, 0, 1, 1], [], []>} : vector<8x72xbf16>, vector<72x2688xbf16>, vector<8x2688xf32> -> vector<8x2688xf32>
    %c0_61 = arith.constant 0 : index
    %c0_62 = arith.constant 0 : index
    %76 = vector.load %arg3[%c0_61, %c0_62] : memref<8x1xf32, #tpu.memory_space<vmem>>, vector<8x1xf32>
    %77 = vector.broadcast %76 : vector<8x1xf32> to vector<8x2688xf32>
    %78 = arith.addf %75, %77 : vector<8x2688xf32>
    %c0_63 = arith.constant 0 : index
    %c0_64 = arith.constant 0 : index
    %c0_65 = arith.constant 0 : index
    %79 = vector.load %arg4[%c0_63, %c0_64, %c0_65] : memref<1x8x2688xf32, #tpu.memory_space<vmem>>, vector<1x8x2688xf32>
    %80 = vector.shape_cast %79 : vector<1x8x2688xf32> to vector<8x2688xf32>
    %81 = vector.shape_cast %78 : vector<8x2688xf32> to vector<1x8x2688xf32>
    tpu.vector_store %arg4[%c0_63, %c0_64, %c0_65], %81 {strides = array<i32>} : memref<1x8x2688xf32, #tpu.memory_space<vmem>>, vector<1x8x2688xf32>,
    return
  }
  func.func @transform_0(%arg0: i32) -> (i32, i32, i32) {
    %c0_i32 = arith.constant 0 : i32
    %c0_i32_0 = arith.constant 0 : i32
    %c0_i32_1 = arith.constant 0 : i32
    return %arg0, %c0_i32, %c0_i32_0 : i32, i32, i32
  }
  func.func @transform_1(%arg0: i32) -> (i32, i32) {
    %c0_i32 = arith.constant 0 : i32
    %c0_i32_0 = arith.constant 0 : i32
    %c0_i32_1 = arith.constant 0 : i32
    return %c0_i32, %c0_i32_0 : i32, i32
  }
  func.func @transform_2(%arg0: i32) -> (i32, i32) {
    %c0_i32 = arith.constant 0 : i32
    %c0_i32_0 = arith.constant 0 : i32
    %c0_i32_1 = arith.constant 0 : i32
    return %c0_i32, %c0_i32_0 : i32, i32
  }
  func.func @transform_3(%arg0: i32) -> (i32, i32, i32) {
    %c0_i32 = arith.constant 0 : i32
    %c0_i32_0 = arith.constant 0 : i32
    %c0_i32_1 = arith.constant 0 : i32
    return %arg0, %c0_i32, %c0_i32_0 : i32, i32, i32
  }
}

</mosaic_0001>

<bundles_post_ra>
// kernel: conv_wrapper3d_forward.1
= control target key start
LH: loop header
LB: loop body
LE: loop exit
PB: predicated region body
PF: predicated region fallthrough
CT: control target
= control target key end

     0   :  { %s4959_s12 = smov 0   ;;  %s7035_s0 = inlined_call_operand.vmem [shape: bf16[2,4,3072], index: 0, kind: input, shape index: {}]   ;;  %s7036_s1 = inlined_call_operand.vmem [shape: bf16[8,72], index: 1, kind: input, shape index: {}]   ;;  %s7037_s2 = inlined_call_operand.vmem [shape: f32[8,1], index: 2, kind: input, shape index: {}]   ;;  %s7038_s3 = inlined_call_operand.vmem [shape: f32[2,8,2688], index: 3, kind: output, shape index: {}]  }
   0x1 LB: > { %s3928_s13 = sadd.s32 4294967295, %s4919_s12   ;;  %p3932_p0 = scmp.ge.s32.totalorder %s4919_s12, 1  ;;  %s4919_s12 = sphi %s4959_s12, %s13_s12  }
   0x2   : > { %p137_p1 = scmp.lt.s32.totalorder %s4919_s12, 3 }
   0x4   : > { %p138_p2 = pnand %p3932_p0, %p137_p1 }
   0x6   : > { %141 = sbr.rel (%p138_p2) target bundleno = 1014 (0x3f6), region = 32 }
   0xb   : > { %p161_p3 = scmp.lt.s32.totalorder %s3928_s13, 1  ;;  %s4921_s18 = smov 127   ;;  %vm386_vm0 = vcmask 1039360   ;;  %vm558_vm1 = vcmask 1031168   ;;  %vm731_vm2 = vcmask 900096   ;;  %vm903_vm3 = vcmask 891904  }
   0xc   : > { %s4922_s19 = smov 126   ;;  %s4923_s20 = smov 110   ;;  %vm1076_vm4 = vcmask 883712   ;;  %vm1248_vm5 = vcmask 752640   ;;  %vm1421_vm6 = vcmask 744448   ;;  %vm1593_vm7 = vcmask 736256  }
   0xd   : > { %s7068_s13 = smov (!%p161_p3, %s3928_s13), 1  ;;  %s4924_s21 = smov 109   ;;  %vm1766_vm8 = vcmask 490496   ;;  %vm1938_vm9 = vcmask 482304   ;;  %vm2111_vm10 = vcmask 474112   ;;  %vm2283_vm11 = vcmask 343040  }
   0xe   : > { %s3958_s14 = smul.u32 48, %s7068_s13  ;;  %s4925_s22 = smov 108   ;;  %vm2456_vm12 = vcmask 334848   ;;  %vm2628_vm13 = vcmask 326656   ;;  %vm2801_vm14 = vcmask 195584   ;;  %vm2973_vm15 = vcmask 187392  }
   0xf   : > { %s4926_s23 = smov 92   ;;  %s4927_s24 = smov 91  }
  0x10   : > { %s4973_s17 = scalar_lea.vmem %s7035_s0, %s3958_s14  ;;  %s4928_s25 = smov 90  }
  0x11   : > { %v173_v0 = vld [vmem:[%s4973_s17 + $0x8] sm:$0xff]  ;;  %v172_v2 = vld [vmem:[%s4973_s17] sm:$0xff]  ;;  %v175_v6 = vld [vmem:[%s4973_s17 + $0x18] sm:$0xff]  ;;  %s4929_s26 = smov 60   ;;  %s4930_s27 = smov 59  }
  0x12   : > { %v4976_v1 = vunpack.c.h.bf16 %v173_v0  ;;  %v4979_v3 = vunpack.c.l.bf16 %v173_v0  ;;  %v4981_v4 = vunpack.c.l.bf16 %v172_v2  ;;  %v4983_v5 = vunpack.c.h.bf16 %v172_v2  ;;  %v174_v9 = vld [vmem:[%s4973_s17 + $0x10] sm:$0xff]  ;;  %v177_v13 = vld [vmem:[%s4973_s17 + $0x28] sm:$0x3]  ;;  %v176_v21 = vld [vmem:[%s4973_s17 + $0x20] sm:$0xff]  ;;  %s4931_s28 = smov 58   ;;  %s4932_s29 = smov 42  }
  0x13   : > { %v4990_v7 = vunpack.c.h.bf16 %v175_v6  ;;  %v4992_v8 = vunpack.c.l.bf16 %v175_v6  ;;  %v4998_v15 = vunpack.c.l.bf16 %v174_v9  ;;  %v188_v18 = vunpack.c.l.bf16 %v177_v13  ;;  %v282_v33 = vld [vmem:[%s4973_s17 + $0x28] sm:$0xf]  ;;  %s4933_s30 = smov 41   ;;  %s4934_s4 = smov 24  }
  0x14   : > { %206 = vst [vmem:[#allocation1 + $0x30] ss:$2 sm:$0xff] %v4976_v1  ;;  %v5003_v24 = vunpack.c.l.bf16 %v176_v21  ;;  %v5011_v37 = vunpack.c.h.bf16 %v174_v9  ;;  %v293_v40 = vunpack.c.l.bf16 %v282_v33  ;;  %v5016_v46 = vunpack.c.h.bf16 %v176_v21  ;;  %s4935_s5 = smov 40   ;;  %s4936_s6 = smov 23  }
  0x15   : > { %204 = vst [vmem:[#allocation1 + $0x20] ss:$2 sm:$0xff] %v4979_v3  ;;  %s4937_s7 = smov 22   ;;  %s3959_s16 = smul.u32 168, %s7068_s13 }
  0x16   : > { %200 = vst [vmem:[#allocation1] ss:$2 sm:$0xff] %v4981_v4 }
  0x17   : > { %202 = vst [vmem:[#allocation1 + $0x10] ss:$2 sm:$0xff] %v4983_v5 }
  0x1b   : > { %v213_v10 = vld.sshfl [vmem:[#allocation1 + $0x30] sm:$0xff pattern:$0x75316420]  ;;  %v214_v11 = vld.sshfl [vmem:[#allocation1 + $0x38] sm:$0xff pattern:$0x75316420] }
  0x1c   : > { %218 = vst [vmem:[#allocation1 + $0x30] ss:$2 sm:$0xff] %v4990_v7  ;;  %v211_v12 = vld.sshfl [vmem:[#allocation1 + $0x20] sm:$0xff pattern:$0x75316420] }
  0x1d   : > { %v212_v14 = vld.sshfl [vmem:[#allocation1 + $0x28] sm:$0xff pattern:$0x75316420]  ;;  %260 = vst [vmem:[#allocation2 + $0x450] sm:$0xf] %v211_v12 }
  0x1e   : > { %217 = vst [vmem:[#allocation1 + $0x20] ss:$2 sm:$0xff] %v4992_v8  ;;  %v207_v16 = vld.sshfl [vmem:[#allocation1] sm:$0xff pattern:$0x75316420] }
  0x1f   : > { %261 = vst [vmem:[#allocation2 + $0x328] sm:$0xf] %v212_v14  ;;  %v208_v17 = vld.sshfl [vmem:[#allocation1 + $0x8] sm:$0xff pattern:$0x75316420] }
  0x20   : > { %262 = vst [vmem:[#allocation2 + $0x440] sm:$0xf] %v213_v10  ;;  %v209_v38 = vld.sshfl [vmem:[#allocation1 + $0x10] sm:$0xff pattern:$0x75316420] }
  0x21   : > { %263 = vst [vmem:[#allocation2 + $0x378] sm:$0xf] %v214_v11  ;;  %v210_v39 = vld.sshfl [vmem:[#allocation1 + $0x18] sm:$0xff pattern:$0x75316420] }
  0x22   : > { %215 = vst [vmem:[#allocation1] ss:$2 sm:$0xff] %v4998_v15  ;;  %v455_v10 = vld [vmem:[%s4973_s17 + $0x28] sm:$0xf] }
  0x23   : > { %v225_v19 = vld.sshfl [vmem:[#allocation1 + $0x30] sm:$0xff pattern:$0x75316420]  ;;  %v226_v20 = vld.sshfl [vmem:[#allocation1 + $0x38] sm:$0xff pattern:$0x75316420]  ;;  %v466_v14 = vunpack.c.l.bf16 %v455_v10 }
  0x24   : > { %312 = vst [vmem:[#allocation1 + $0x31] ss:$2 sm:$0xff] %v4976_v1 }
  0x25   : > { %v223_v22 = vld.sshfl [vmem:[#allocation1 + $0x20] sm:$0xff pattern:$0x75316420]  ;;  %v224_v23 = vld.sshfl [vmem:[#allocation1 + $0x28] sm:$0xff pattern:$0x75316420] }
  0x26   : > { %229 = vst [vmem:[#allocation1 + $0x20] ss:$2 sm:$0xff] %v188_v18 }
  0x27   : > { %268 = vst [vmem:[#allocation2 + $0x548] sm:$0xf] %v223_v22 }
  0x28   : > { %269 = vst [vmem:[#allocation2 + $0x500] sm:$0xf] %v224_v23 }
  0x29   : > { %270 = vst [vmem:[#allocation2 + $0x58] sm:$0xf] %v225_v19  ;;  %v219_v25 = vld.sshfl [vmem:[#allocation1] sm:$0xff pattern:$0x75316420] }
  0x2a   : > { %271 = vst [vmem:[#allocation2 + $0x2b8] sm:$0xf] %v226_v20  ;;  %v220_v26 = vld.sshfl [vmem:[#allocation1 + $0x8] sm:$0xff pattern:$0x75316420] }
  0x2b   : > { %v319_v27 = vld.sshfl [vmem:[#allocation1 + $0x30] sm:$0xff pattern:$0x75316420]  ;;  %v320_v28 = vld.sshfl [vmem:[#allocation1 + $0x38] sm:$0xff pattern:$0x75316420] }
  0x2c   : > { %v3986_v29 = vpack.i.bf16 %v320_v28, %v319_v27  ;;  %227 = vst [vmem:[#allocation1] ss:$2 sm:$0xff] %v5003_v24 }
  0x2d   : > { %v234_v30 = vld.sshfl [vmem:[#allocation1 + $0x20] sm:$0xff pattern:$0x75316420]  ;;  %256 = vst [vmem:[#allocation2 + $0x2b0] sm:$0xf] %v207_v16 }
  0x2e   : > { %3987 = vrot.lane.b32.xlu1 %v3986_v29, %s4921_s18  ;;  %310 = vst [vmem:[#allocation1 + $0x21] ss:$2 sm:$0xff] %v4979_v3 }
  0x2f   : > { %276 = vst [vmem:[#allocation2 + $0x330] sm:$0xf] %v234_v30 }
  0x30   : > { %257 = vst [vmem:[#allocation2 + $0x3b0] sm:$0xf] %v208_v17 }
  0x31   : > { %264 = vst [vmem:[#allocation2 + $0x108] sm:$0xf] %v219_v25 }
  0x32   : > { %265 = vst [vmem:[#allocation2 + $0x510] sm:$0xf] %v220_v26 }
  0x33   : > { %v230_v31 = vld.sshfl [vmem:[#allocation1] sm:$0xff pattern:$0x75316420]  ;;  %v231_v32 = vld.sshfl [vmem:[#allocation1 + $0x8] sm:$0xff pattern:$0x75316420] }
  0x34   : > { %306 = vst [vmem:[#allocation1 + $0x1] ss:$2 sm:$0xff] %v4981_v4 }
  0x35   : > { %v317_v34 = vld.sshfl [vmem:[#allocation1 + $0x20] sm:$0xff pattern:$0x75316420]  ;;  %v318_v35 = vld.sshfl [vmem:[#allocation1 + $0x28] sm:$0xff pattern:$0x75316420] }
  0x36   : > { %323 = vst [vmem:[#allocation1 + $0x21] ss:$2 sm:$0xff] %v4992_v8  ;;  %v4001_v36 = vpack.i.bf16 %v318_v35, %v317_v34 }
  0x37   : > { %272 = vst [vmem:[#allocation2 + $0x580] sm:$0xf] %v230_v31 }
  0x38   : > { %4002 = vrot.lane.b32.xlu1 %v4001_v36, %s4921_s18  ;;  %273 = vst [vmem:[#allocation2 + $0x590] sm:$0xf] %v231_v32 }
  0x39   : > { %324 = vst [vmem:[#allocation1 + $0x31] ss:$2 sm:$0xff] %v4990_v7 }
  0x3a   : > { %216 = vst [vmem:[#allocation1 + $0x10] ss:$2 sm:$0xff] %v5011_v37 }
  0x3b   : > { %v313_v41 = vld.sshfl [vmem:[#allocation1] sm:$0xff pattern:$0x75316420]  ;;  %v314_v42 = vld.sshfl [vmem:[#allocation1 + $0x8] sm:$0xff pattern:$0x75316420] }
  0x3c   : > { %v3991_v43 = vpack.i.bf16 %v314_v42, %v313_v41  ;;  %258 = vst [vmem:[#allocation2 + $0x4d8] sm:$0xf] %v209_v38 }
  0x3d   : > { %v329_v44 = vld.sshfl [vmem:[#allocation1 + $0x20] sm:$0xff pattern:$0x75316420]  ;;  %v330_v45 = vld.sshfl [vmem:[#allocation1 + $0x28] sm:$0xff pattern:$0x75316420] }
  0x3e   : > { %335 = vst [vmem:[#allocation1 + $0x21] ss:$2 sm:$0xff] %v293_v40  ;;  %3992 = vrot.lane.b32.xlu0 %v3991_v43, %s4921_s18  ;;  %v4021_v13 = vpack.i.bf16 %v330_v45, %v329_v44 }
  0x3f   : > { %259 = vst [vmem:[#allocation2 + $0x18] sm:$0xf] %v210_v39 }
  0x40   : > { %v331_v47 = vld.sshfl [vmem:[#allocation1 + $0x30] sm:$0xff pattern:$0x75316420]  ;;  %v332_v48 = vld.sshfl [vmem:[#allocation1 + $0x38] sm:$0xff pattern:$0x75316420] }
  0x41   : > { %v4006_v49 = vpack.i.bf16 %v332_v48, %v331_v47  ;;  %v221_v50 = vld.sshfl [vmem:[#allocation1 + $0x10] sm:$0xff pattern:$0x75316420]  ;;  %v222_v51 = vld.sshfl [vmem:[#allocation1 + $0x18] sm:$0xff pattern:$0x75316420] }
  0x42   : > { %228 = vst [vmem:[#allocation1 + $0x10] ss:$2 sm:$0xff] %v5016_v46 }
  0x43   : > { %4007 = vrot.lane.b32.xlu1 %v4006_v49, %s4921_s18  ;;  %266 = vst [vmem:[#allocation2 + $0x490] sm:$0xf] %v221_v50 }
  0x44   : > { %267 = vst [vmem:[#allocation2 + $0x318] sm:$0xf] %v222_v51 }
  0x45   : > { %v340_v52 = vld.sshfl [vmem:[#allocation1 + $0x20] sm:$0xff pattern:$0x75316420]  ;;  %v341_v53 = vld.sshfl [vmem:[#allocation1 + $0x28] sm:$0xff pattern:$0x75316420] }
  0x46   : > { %482 = vst [vmem:[#allocation1 + $0x20] ss:$2 sm:$0xff] %v4979_v3  ;;  %v4041_v54 = vpack.i.bf16 %v341_v53, %v340_v52 }
  0x47   : > { %321 = vst [vmem:[#allocation1 + $0x1] ss:$2 sm:$0xff] %v4998_v15 }
  0x48   : > { %484 = vst [vmem:[#allocation1 + $0x30] ss:$2 sm:$0xff] %v4976_v1 }
  0x49   : > { %v232_v55 = vld.sshfl [vmem:[#allocation1 + $0x10] sm:$0xff pattern:$0x75316420]  ;;  %v233_v56 = vld.sshfl [vmem:[#allocation1 + $0x18] sm:$0xff pattern:$0x75316420] }
  0x4a   : > { %308 = vst [vmem:[#allocation1 + $0x11] ss:$2 sm:$0xff] %v4983_v5 }
  0x4b   : > { %274 = vst [vmem:[#allocation2 + $0x540] sm:$0xf] %v232_v55  ;;  %4042 = vrot.lane.b32.xlu1 %v4041_v54, %s4921_s18 }
  0x4c   : > { %275 = vst [vmem:[#allocation2 + $0x3c0] sm:$0xf] %v233_v56 }
  0x4d   : > { %v489_v57 = vld.sshfl [vmem:[#allocation1 + $0x20] sm:$0xff pattern:$0x75316420]  ;;  %v490_v58 = vld.sshfl [vmem:[#allocation1 + $0x28] sm:$0xff pattern:$0x75316420] }
  0x4e   : > { %v325_v59 = vld.sshfl [vmem:[#allocation1] sm:$0xff pattern:$0x75316420]  ;;  %v326_v60 = vld.sshfl [vmem:[#allocation1 + $0x8] sm:$0xff pattern:$0x75316420]  ;;  %v4061_v62 = vpack.i.bf16 %v490_v58, %v489_v57 }
  0x4f   : > { %v4011_v61 = vpack.i.bf16 %v326_v60, %v325_v59  ;;  %v491_v63 = vld.sshfl [vmem:[#allocation1 + $0x30] sm:$0xff pattern:$0x75316420]  ;;  %v492_v0 = vld.sshfl [vmem:[#allocation1 + $0x38] sm:$0xff pattern:$0x75316420] }
  0x50   : > { %496 = vst [vmem:[#allocation1 + $0x30] ss:$2 sm:$0xff] %v4990_v7  ;;  %v4026_v26 = vpack.i.bf16 %v492_v0, %v491_v63 }
  0x51   : > { %v315_v2 = vld.sshfl [vmem:[#allocation1 + $0x10] sm:$0xff pattern:$0x75316420]  ;;  %v316_v6 = vld.sshfl [vmem:[#allocation1 + $0x18] sm:$0xff pattern:$0x75316420]  ;;  %4012 = vrot.lane.b32.xlu2 %v4011_v61, %s4921_s18 }
  0x52   : > { %v3996_v9 = vpack.i.bf16 %v316_v6, %v315_v2  ;;  %322 = vst [vmem:[#allocation1 + $0x11] ss:$2 sm:$0xff] %v5011_v37  ;;  %v627_v61 = vld [vmem:[%s4973_s17 + $0x28] sm:$0xf] }
  0x53   : > { %4062 = vrot.lane.b32.xlu1 %v4061_v62, %s4922_s19  ;;  %495 = vst [vmem:[#allocation1 + $0x20] ss:$2 sm:$0xff] %v4992_v8  ;;  %v638_v2 = vunpack.c.l.bf16 %v627_v61 }
  0x54   : > { %3997 = vrot.lane.b32.xlu0 %v3996_v9, %s4921_s18  ;;  %333 = vst [vmem:[#allocation1 + $0x1] ss:$2 sm:$0xff] %v5003_v24 }
  0x57   : > { %v503_v11 = vld.sshfl [vmem:[#allocation1 + $0x30] sm:$0xff pattern:$0x75316420]  ;;  %v504_v12 = vld.sshfl [vmem:[#allocation1 + $0x38] sm:$0xff pattern:$0x75316420] }
  0x58   : > { %657 = vst [vmem:[#allocation1 + $0x31] ss:$2 sm:$0xff] %v4976_v1  ;;  %v4046_v38 = vpack.i.bf16 %v504_v12, %v503_v11 }
  0x59   : > { %v327_v16 = vld.sshfl [vmem:[#allocation1 + $0x10] sm:$0xff pattern:$0x75316420]  ;;  %v328_v17 = vld.sshfl [vmem:[#allocation1 + $0x18] sm:$0xff pattern:$0x75316420] }
  0x5a   : > { %v4016_v18 = vpack.i.bf16 %v328_v17, %v327_v16  ;;  %334 = vst [vmem:[#allocation1 + $0x11] ss:$2 sm:$0xff] %v5016_v46  ;;  %v5036_v19 = vld.sshfl [vmem:[#allocation1 + $0x20] sm:$0xff pattern:$0x75316420] }
  0x5b   : > { %v5038_v20 = vld.sshfl [vmem:[#allocation1 + $0x28] sm:$0xff pattern:$0x75316420]  ;;  %v336_v21 = vld.sshfl [vmem:[#allocation1] sm:$0xff pattern:$0x75316420] }
  0x5c   : > { %4022 = vrot.lane.b32.xlu0 %v4021_v13, %s4921_s18  ;;  %4017 = vrot.lane.b32.xlu2 %v4016_v18, %s4921_s18  ;;  %507 = vst [vmem:[#allocation1 + $0x20] ss:$2 sm:$0xff] %v466_v14  ;;  %v337_v22 = vld.sshfl [vmem:[#allocation1 + $0x8] sm:$0xff pattern:$0x75316420]  ;;  %v4081_v62 = vpack.i.bf16 %v5038_v20, %v5036_v19 }
  0x5d   : > { %478 = vst [vmem:[#allocation1] ss:$2 sm:$0xff] %v4981_v4  ;;  %v4031_v39 = vpack.i.bf16 %v337_v22, %v336_v21 }
  0x5f   : > { %v664_v23 = vld.sshfl [vmem:[#allocation1 + $0x30] sm:$0xff pattern:$0x75316420]  ;;  %v665_v25 = vld.sshfl [vmem:[#allocation1 + $0x38] sm:$0xff pattern:$0x75316420] }
  0x60   : > { %v4066_v27 = vpack.i.bf16 %v665_v25, %v664_v23  ;;  %669 = vst [vmem:[#allocation1 + $0x31] ss:$2 sm:$0xff] %v4990_v7 }
  0x61   : > { %v338_v28 = vld.sshfl [vmem:[#allocation1 + $0x10] sm:$0xff pattern:$0x75316420]  ;;  %v339_v29 = vld.sshfl [vmem:[#allocation1 + $0x18] sm:$0xff pattern:$0x75316420] }
  0x62   : > { %v4036_v30 = vpack.i.bf16 %v339_v29, %v338_v28  ;;  %4067 = vrot.lane.b32.xlu1 %v4066_v27, %s4923_s20  ;;  %480 = vst [vmem:[#allocation1 + $0x10] ss:$2 sm:$0xff] %v4983_v5 }
  0x63   : > { %v5046_v31 = vld.sshfl [vmem:[#allocation1 + $0x20] sm:$0xff pattern:$0x75316420]  ;;  %v5048_v32 = vld.sshfl [vmem:[#allocation1 + $0x28] sm:$0xff pattern:$0x75316420] }
  0x64   : > { %4037 = vrot.lane.b32.xlu0 %v4036_v30, %s4921_s18  ;;  %4027 = vrot.lane.b32.xlu2 %v4026_v26, %s4922_s19  ;;  %655 = vst [vmem:[#allocation1 + $0x21] ss:$2 sm:$0xff] %v4979_v3  ;;  %v485_v33 = vld.sshfl [vmem:[#allocation1] sm:$0xff pattern:$0x75316420]  ;;  %v4101_v13 = vpack.i.bf16 %v5048_v32, %v5046_v31 }
  0x65   : > { %v486_v34 = vld.sshfl [vmem:[#allocation1 + $0x8] sm:$0xff pattern:$0x75316420] }
  0x66   : > { %493 = vst [vmem:[#allocation1] ss:$2 sm:$0xff] %v4998_v15  ;;  %v4051_v52 = vpack.i.bf16 %v486_v34, %v485_v33 }
  0x67   : > { %v5054_v35 = vld.sshfl [vmem:[#allocation1 + $0x30] sm:$0xff pattern:$0x75316420]  ;;  %v5056_v36 = vld.sshfl [vmem:[#allocation1 + $0x38] sm:$0xff pattern:$0x75316420] }
  0x68   : > { %829 = vst [vmem:[#allocation1 + $0x30] ss:$2 sm:$0xff] %v4976_v1  ;;  %v4086_v16 = vpack.i.bf16 %v5056_v36, %v5054_v35 }
  0x69   : > { %v487_v40 = vld.sshfl [vmem:[#allocation1 + $0x10] sm:$0xff pattern:$0x75316420]  ;;  %v488_v41 = vld.sshfl [vmem:[#allocation1 + $0x18] sm:$0xff pattern:$0x75316420] }
  0x6a   : > { %494 = vst [vmem:[#allocation1 + $0x10] ss:$2 sm:$0xff] %v5011_v37  ;;  %v4056_v49 = vpack.i.bf16 %v488_v41, %v487_v40  ;;  %v800_v40 = vld [vmem:[%s4973_s17 + $0x28] sm:$0xf] }
  0x6b   : > { %v5060_v42 = vld.sshfl [vmem:[#allocation1 + $0x20] sm:$0xff pattern:$0x75316420]  ;;  %v5062_v43 = vld.sshfl [vmem:[#allocation1 + $0x28] sm:$0xff pattern:$0x75316420] }
  0x6c   : > { %4047 = vrot.lane.b32.xlu0 %v4046_v38, %s4922_s19  ;;  %4032 = vrot.lane.b32.xlu2 %v4031_v39, %s4921_s18  ;;  %668 = vst [vmem:[#allocation1 + $0x21] ss:$2 sm:$0xff] %v4992_v8  ;;  %v4121_v38 = vpack.i.bf16 %v5062_v43, %v5060_v42 }
  0x6d   : > { %v497_v44 = vld.sshfl [vmem:[#allocation1] sm:$0xff pattern:$0x75316420]  ;;  %v498_v45 = vld.sshfl [vmem:[#allocation1 + $0x8] sm:$0xff pattern:$0x75316420] }
  0x6e   : > { %505 = vst [vmem:[#allocation1] ss:$2 sm:$0xff] %v5003_v24  ;;  %v4071_v58 = vpack.i.bf16 %v498_v45, %v497_v44 }
  0x6f   : > { %v5068_v47 = vld.sshfl [vmem:[#allocation1 + $0x30] sm:$0xff pattern:$0x75316420]  ;;  %v5070_v48 = vld.sshfl [vmem:[#allocation1 + $0x38] sm:$0xff pattern:$0x75316420] }
  0x70   : > { %841 = vst [vmem:[#allocation1 + $0x30] ss:$2 sm:$0xff] %v4990_v7  ;;  %v4106_v26 = vpack.i.bf16 %v5070_v48, %v5068_v47  ;;  %v811_v47 = vunpack.c.l.bf16 %v800_v40 }
  0x71   : > { %v499_v50 = vld.sshfl [vmem:[#allocation1 + $0x10] sm:$0xff pattern:$0x75316420]  ;;  %v500_v51 = vld.sshfl [vmem:[#allocation1 + $0x18] sm:$0xff pattern:$0x75316420] }
  0x72   : > { %v4076_v53 = vpack.i.bf16 %v500_v51, %v499_v50  ;;  %506 = vst [vmem:[#allocation1 + $0x10] ss:$2 sm:$0xff] %v5016_v46 }
  0x73   : > { %v5078_v60 = vld.sshfl [vmem:[#allocation1 + $0x20] sm:$0xff pattern:$0x75316420]  ;;  %v675_v6 = vld.sshfl [vmem:[#allocation1 + $0x28] sm:$0xff pattern:$0x75316420] }
  0x74   : > { %4077 = vrot.lane.b32.xlu1 %v4076_v53, %s4922_s19  ;;  %4057 = vrot.lane.b32.xlu0 %v4056_v49, %s4922_s19  ;;  %680 = vst [vmem:[#allocation1 + $0x21] ss:$2 sm:$0xff] %v638_v2  ;;  %v4141_v39 = vpack.i.bf16 %v675_v6, %v5078_v60 }
  0x75   : > { %4052 = vrot.lane.b32.xlu2 %v4051_v52, %s4922_s19  ;;  %v508_v54 = vld.sshfl [vmem:[#allocation1] sm:$0xff pattern:$0x75316420]  ;;  %v509_v55 = vld.sshfl [vmem:[#allocation1 + $0x8] sm:$0xff pattern:$0x75316420] }
  0x76   : > { %651 = vst [vmem:[#allocation1 + $0x1] ss:$2 sm:$0xff] %v4981_v4  ;;  %v4091_v59 = vpack.i.bf16 %v509_v55, %v508_v54 }
  0x77   : > { %v848_v56 = vld.sshfl [vmem:[#allocation1 + $0x30] sm:$0xff pattern:$0x75316420]  ;;  %v849_v57 = vld.sshfl [vmem:[#allocation1 + $0x38] sm:$0xff pattern:$0x75316420] }
  0x78   : > { %1002 = vst [vmem:[#allocation1 + $0x31] ss:$2 sm:$0xff] %v4976_v1  ;;  %v4126_v27 = vpack.i.bf16 %v849_v57, %v848_v56 }
  0x79   : > { %v510_v63 = vld.sshfl [vmem:[#allocation1 + $0x10] sm:$0xff pattern:$0x75316420]  ;;  %v511_v0 = vld.sshfl [vmem:[#allocation1 + $0x18] sm:$0xff pattern:$0x75316420] }
  0x7a   : > { %653 = vst [vmem:[#allocation1 + $0x11] ss:$2 sm:$0xff] %v4983_v5  ;;  %v4096_v28 = vpack.i.bf16 %v511_v0, %v510_v63 }
  0x7b   : > { %v5099_v19 = vld.sshfl [vmem:[#allocation1 + $0x20] sm:$0xff pattern:$0x75316420]  ;;  %v5101_v20 = vld.sshfl [vmem:[#allocation1 + $0x28] sm:$0xff pattern:$0x75316420] }
  0x7c   : > { %4072 = vrot.lane.b32.xlu0 %v4071_v58, %s4922_s19  ;;  %4092 = vrot.lane.b32.xlu1 %v4091_v59, %s4922_s19  ;;  %827 = vst [vmem:[#allocation1 + $0x20] ss:$2 sm:$0xff] %v4979_v3 }
  0x7d   : > { %4082 = vrot.lane.b32.xlu2 %v4081_v62, %s4922_s19  ;;  %v658_v9 = vld.sshfl [vmem:[#allocation1] sm:$0xff pattern:$0x75316420]  ;;  %v659_v10 = vld.sshfl [vmem:[#allocation1 + $0x8] sm:$0xff pattern:$0x75316420] }
  0x7e   : > { %666 = vst [vmem:[#allocation1 + $0x1] ss:$2 sm:$0xff] %v4998_v15  ;;  %v4111_v14 = vpack.i.bf16 %v659_v10, %v658_v9 }
  0x7f   : > { %v5089_v11 = vld.sshfl [vmem:[#allocation1 + $0x30] sm:$0xff pattern:$0x75316420]  ;;  %v5091_v12 = vld.sshfl [vmem:[#allocation1 + $0x38] sm:$0xff pattern:$0x75316420] }
  0x80   : > { %1014 = vst [vmem:[#allocation1 + $0x31] ss:$2 sm:$0xff] %v4990_v7  ;;  %v4146_v0 = vpack.i.bf16 %v5091_v12, %v5089_v11 }
  0x81   : > { %v660_v17 = vld.sshfl [vmem:[#allocation1 + $0x10] sm:$0xff pattern:$0x75316420]  ;;  %v661_v18 = vld.sshfl [vmem:[#allocation1 + $0x18] sm:$0xff pattern:$0x75316420] }
  0x82   : > { %667 = vst [vmem:[#allocation1 + $0x11] ss:$2 sm:$0xff] %v5011_v37  ;;  %v4116_v41 = vpack.i.bf16 %v661_v18, %v660_v17 }
  0x83   : > { %v5116_v31 = vld.sshfl [vmem:[#allocation1 + $0x20] sm:$0xff pattern:$0x75316420]  ;;  %v5118_v32 = vld.sshfl [vmem:[#allocation1 + $0x28] sm:$0xff pattern:$0x75316420] }
  0x84   : > { %4102 = vrot.lane.b32.xlu0 %v4101_v13, %s4922_s19  ;;  %4112 = vrot.lane.b32.xlu1 %v4111_v14, %s4923_s20  ;;  %840 = vst [vmem:[#allocation1 + $0x20] ss:$2 sm:$0xff] %v4992_v8 }
  0x85   : > { %4087 = vrot.lane.b32.xlu2 %v4086_v16, %s4923_s20  ;;  %v670_v21 = vld.sshfl [vmem:[#allocation1] sm:$0xff pattern:$0x75316420]  ;;  %v671_v22 = vld.sshfl [vmem:[#allocation1 + $0x8] sm:$0xff pattern:$0x75316420] }
  0x86   : > { %678 = vst [vmem:[#allocation1 + $0x1] ss:$2 sm:$0xff] %v5003_v24  ;;  %v4131_v52 = vpack.i.bf16 %v671_v22, %v670_v21  ;;  %v4161_v22 = vpack.i.bf16 %v5101_v20, %v5099_v19 }
  0x87   : > { %v5108_v23 = vld.sshfl [vmem:[#allocation1 + $0x30] sm:$0xff pattern:$0x75316420]  ;;  %v5110_v25 = vld.sshfl [vmem:[#allocation1 + $0x38] sm:$0xff pattern:$0x75316420] }
  0x88   : > { %1174 = vst [vmem:[#allocation1 + $0x30] ss:$2 sm:$0xff] %v4976_v1  ;;  %v4166_v21 = vpack.i.bf16 %v5110_v25, %v5108_v23 }
  0x89   : > { %v672_v29 = vld.sshfl [vmem:[#allocation1 + $0x10] sm:$0xff pattern:$0x75316420]  ;;  %v673_v30 = vld.sshfl [vmem:[#allocation1 + $0x18] sm:$0xff pattern:$0x75316420] }
  0x8a   : > { %679 = vst [vmem:[#allocation1 + $0x11] ss:$2 sm:$0xff] %v5016_v46  ;;  %v4136_v50 = vpack.i.bf16 %v673_v30, %v672_v29 }
  0x8b   : > { %v5135_v48 = vld.sshfl [vmem:[#allocation1 + $0x20] sm:$0xff pattern:$0x75316420]  ;;  %v5137_v49 = vld.sshfl [vmem:[#allocation1 + $0x28] sm:$0xff pattern:$0x75316420] }
  0x8c   : > { %4107 = vrot.lane.b32.xlu0 %v4106_v26, %s4924_s21  ;;  %4127 = vrot.lane.b32.xlu1 %v4126_v27, %s4924_s21  ;;  %852 = vst [vmem:[#allocation1 + $0x20] ss:$2 sm:$0xff] %v811_v47 }
  0x8d   : > { %4097 = vrot.lane.b32.xlu2 %v4096_v28, %s4922_s19  ;;  %v681_v33 = vld.sshfl [vmem:[#allocation1] sm:$0xff pattern:$0x75316420]  ;;  %v682_v34 = vld.sshfl [vmem:[#allocation1 + $0x8] sm:$0xff pattern:$0x75316420]  ;;  %s6986_s19 = scalar_lea.vmem %s7038_s3, %s3959_s16 }
  0x8e   : > { %823 = vst [vmem:[#allocation1] ss:$2 sm:$0xff] %v4981_v4  ;;  %v4151_v62 = vpack.i.bf16 %v682_v34, %v681_v33 }
  0x8f   : > { %v5125_v35 = vld.sshfl [vmem:[#allocation1 + $0x30] sm:$0xff pattern:$0x75316420]  ;;  %v5127_v36 = vld.sshfl [vmem:[#allocation1 + $0x38] sm:$0xff pattern:$0x75316420] }
  0x90   : > { %1186 = vst [vmem:[#allocation1 + $0x30] ss:$2 sm:$0xff] %v4990_v7  ;;  %v4186_v18 = vpack.i.bf16 %v5127_v36, %v5125_v35 }
  0x91   : > { %v683_v44 = vld.sshfl [vmem:[#allocation1 + $0x10] sm:$0xff pattern:$0x75316420]  ;;  %v684_v45 = vld.sshfl [vmem:[#allocation1 + $0x18] sm:$0xff pattern:$0x75316420] }
  0x92   : > { %825 = vst [vmem:[#allocation1 + $0x10] ss:$2 sm:$0xff] %v4983_v5  ;;  %v4156_v51 = vpack.i.bf16 %v684_v45, %v683_v44  ;;  %v4181_v44 = vpack.i.bf16 %v5118_v32, %v5116_v31 }
  0x93   : > { %v5150_v56 = vld.sshfl [vmem:[#allocation1 + $0x20] sm:$0xff pattern:$0x75316420]  ;;  %v5152_v57 = vld.sshfl [vmem:[#allocation1 + $0x28] sm:$0xff pattern:$0x75316420] }
  0x94   : > { %4122 = vrot.lane.b32.xlu0 %v4121_v38, %s4923_s20  ;;  %4142 = vrot.lane.b32.xlu1 %v4141_v39, %s4923_s20  ;;  %1000 = vst [vmem:[#allocation1 + $0x21] ss:$2 sm:$0xff] %v4979_v3 }
  0x95   : > { %4117 = vrot.lane.b32.xlu2 %v4116_v41, %s4923_s20  ;;  %v5142_v42 = vld.sshfl [vmem:[#allocation1] sm:$0xff pattern:$0x75316420]  ;;  %v5144_v43 = vld.sshfl [vmem:[#allocation1 + $0x8] sm:$0xff pattern:$0x75316420] }
  0x96   : > { %838 = vst [vmem:[#allocation1] ss:$2 sm:$0xff] %v4998_v15  ;;  %v4171_v38 = vpack.i.bf16 %v5144_v43, %v5142_v42 }
  0x97   : > { %v5148_v55 = vld.sshfl [vmem:[#allocation1 + $0x30] sm:$0xff pattern:$0x75316420]  ;;  %v5157_v58 = vld.sshfl [vmem:[#allocation1 + $0x38] sm:$0xff pattern:$0x75316420] }
  0x98   : > { %1347 = vst [vmem:[#allocation1 + $0x31] ss:$2 sm:$0xff] %v4976_v1 }
  0x99   : > { %v832_v53 = vld.sshfl [vmem:[#allocation1 + $0x10] sm:$0xff pattern:$0x75316420]  ;;  %v833_v54 = vld.sshfl [vmem:[#allocation1 + $0x18] sm:$0xff pattern:$0x75316420] }
  0x9a   : > { %839 = vst [vmem:[#allocation1 + $0x10] ss:$2 sm:$0xff] %v5011_v37  ;;  %v4176_v61 = vpack.i.bf16 %v833_v54, %v832_v53 }
  0x9b   : > { %v5174_v1 = vld.sshfl [vmem:[#allocation1 + $0x20] sm:$0xff pattern:$0x75316420]  ;;  %v5176_v14 = vld.sshfl [vmem:[#allocation1 + $0x28] sm:$0xff pattern:$0x75316420] }
  0x9c   : > { %4137 = vrot.lane.b32.xlu0 %v4136_v50, %s4923_s20  ;;  %4157 = vrot.lane.b32.xlu1 %v4156_v51, %s4923_s20  ;;  %1013 = vst [vmem:[#allocation1 + $0x21] ss:$2 sm:$0xff] %v4992_v8 }
  0x9d   : > { %4132 = vrot.lane.b32.xlu2 %v4131_v52, %s4923_s20  ;;  %v5160_v59 = vld.sshfl [vmem:[#allocation1] sm:$0xff pattern:$0x75316420]  ;;  %v5162_v60 = vld.sshfl [vmem:[#allocation1 + $0x8] sm:$0xff pattern:$0x75316420] }
  0x9e   : > { %850 = vst [vmem:[#allocation1] ss:$2 sm:$0xff] %v5003_v24  ;;  %v4191_v39 = vpack.i.bf16 %v5162_v60, %v5160_v59 }
  0x9f   : > { %v5182_v11 = vld.sshfl [vmem:[#allocation1 + $0x30] sm:$0xff pattern:$0x75316420]  ;;  %v5184_v12 = vld.sshfl [vmem:[#allocation1 + $0x38] sm:$0xff pattern:$0x75316420] }
  0xa0   : > { %v3988_v63 = vpop.permute.xlu1 %3987  ;;  %1359 = vst [vmem:[#allocation1 + $0x31] ss:$2 sm:$0xff] %v4990_v7  ;;  %v972_v7 = vld [vmem:[%s4973_s17 + $0x28] sm:$0xf] }
  0xa1   : > { %v3990_v2 = vunpack.i.h.bf16 %v3988_v63  ;;  %v3989_v6 = vunpack.i.l.bf16 %v3988_v63  ;;  %v5168_v9 = vld.sshfl [vmem:[#allocation1 + $0x10] sm:$0xff pattern:$0x75316420]  ;;  %v5170_v10 = vld.sshfl [vmem:[#allocation1 + $0x18] sm:$0xff pattern:$0x75316420]  ;;  %v983_v33 = vunpack.c.l.bf16 %v972_v7 }
  0xa2   : > { %851 = vst [vmem:[#allocation1 + $0x10] ss:$2 sm:$0xff] %v5016_v46 }
  0xa3   : > { %v393_v13 = vsel %vm386_vm0, %v3989_v6, %v3990_v2  ;;  %v5210_v23 = vld.sshfl [vmem:[#allocation1 + $0x20] sm:$0xff pattern:$0x75316420]  ;;  %v5212_v25 = vld.sshfl [vmem:[#allocation1 + $0x28] sm:$0xff pattern:$0x75316420] }
  0xa4   : > { %4177 = vrot.lane.b32.xlu1 %v4176_v61, %s4924_s21  ;;  %4152 = vrot.lane.b32.xlu0 %v4151_v62, %s4923_s20  ;;  %435 = vst [vmem:[#allocation2 + $0x440] sm:$0xf0] %v393_v13  ;;  %v4201_v61 = vpack.i.bf16 %v5137_v49, %v5135_v48  ;;  %v5276_v48 = vld [vmem:[%s4973_s17 + $0x8] sm:$0xff] }
  0xa5   : > { %4147 = vrot.lane.b32.xlu2 %v4146_v0, %s4925_s22  ;;  %v5186_v16 = vld.sshfl [vmem:[#allocation1] sm:$0xff pattern:$0x75316420]  ;;  %v5189_v17 = vld.sshfl [vmem:[#allocation1 + $0x8] sm:$0xff pattern:$0x75316420] }
  0xa6   : > { %996 = vst [vmem:[#allocation1 + $0x1] ss:$2 sm:$0xff] %v4981_v4 }
  0xa7   : > { %1025 = vst [vmem:[#allocation1 + $0x21] ss:$2 sm:$0xff] %v983_v33 }
  0xa9   : > { %v5198_v26 = vld.sshfl [vmem:[#allocation1 + $0x10] sm:$0xff pattern:$0x75316420]  ;;  %v5200_v27 = vld.sshfl [vmem:[#allocation1 + $0x18] sm:$0xff pattern:$0x75316420] }
  0xaa   : > { %v5202_v28 = vpop.permute.xlu1 %4002  ;;  %998 = vst [vmem:[#allocation1 + $0x11] ss:$2 sm:$0xff] %v4983_v5 }
  0xab   : > { %v4013_v29 = vpop.permute.xlu2 %4012  ;;  %v4005_v30 = vunpack.i.h.bf16 %v5202_v28  ;;  %v4004_v20 = vunpack.i.l.bf16 %v5202_v28 }
  0xac   : > { %4187 = vrot.lane.b32.xlu1 %v4186_v18, %s4926_s23  ;;  %4167 = vrot.lane.b32.xlu0 %v4166_v21, %s4925_s22  ;;  %v4015_v4 = vunpack.i.h.bf16 %v4013_v29  ;;  %v4014_v19 = vunpack.i.l.bf16 %v4013_v29 }
  0xad   : > { %4162 = vrot.lane.b32.xlu2 %v4161_v22, %s4923_s20  ;;  %v392_v5 = vsel %vm386_vm0, %v4005_v30, %v3989_v6  ;;  %v391_v36 = vsel %vm386_vm0, %v4004_v20, %v4005_v30  ;;  %v5227_v41 = vld.sshfl [vmem:[#allocation1] sm:$0xff pattern:$0x75316420]  ;;  %v5237_v42 = vld.sshfl [vmem:[#allocation1 + $0x8] sm:$0xff pattern:$0x75316420] }
  0xae   : > { %v395_v34 = vsel %vm386_vm0, %v4014_v19, %v4015_v4  ;;  %v394_v35 = vsel %vm386_vm0, %v3990_v2, %v4014_v19  ;;  %434 = vst [vmem:[#allocation2 + $0x328] sm:$0xf0] %v392_v5  ;;  %v5245_v31 = vld.sshfl [vmem:[#allocation1 + $0x20] sm:$0xff pattern:$0x75316420]  ;;  %v4196_v2 = vpack.i.bf16 %v5170_v10, %v5168_v9  ;;  %v4241_v5 = vpack.i.bf16 %v5176_v14, %v5174_v1 }
  0xaf   : > { %437 = vst [vmem:[#allocation2 + $0x108] sm:$0xf0] %v395_v34  ;;  %v5251_v52 = vld.sshfl [vmem:[#allocation1 + $0x28] sm:$0xff pattern:$0x75316420]  ;;  %v1140_v19 = vld [vmem:[%s4973_s17] sm:$0xff] }
  0xb0   : > { %436 = vst [vmem:[#allocation2 + $0x378] sm:$0xf0] %v394_v35  ;;  %v5225_v40 = vpop.permute.xlu0 %3992  ;;  %v5283_v6 = vld.sshfl [vmem:[#allocation1 + $0x38] sm:$0xff pattern:$0x75316420] }
  0xb1   : > { %433 = vst [vmem:[#allocation2 + $0x450] sm:$0xf0] %v391_v36  ;;  %v3995_v45 = vunpack.i.h.bf16 %v5225_v40  ;;  %v3994_v47 = vunpack.i.l.bf16 %v5225_v40  ;;  %v5233_v50 = vld.sshfl [vmem:[#allocation1 + $0x10] sm:$0xff pattern:$0x75316420]  ;;  %v4206_v36 = vpack.i.bf16 %v5157_v58, %v5148_v55 }
  0xb2   : > { %v5235_v51 = vld.sshfl [vmem:[#allocation1 + $0x18] sm:$0xff pattern:$0x75316420]  ;;  %1011 = vst [vmem:[#allocation1 + $0x1] ss:$2 sm:$0xff] %v4998_v15  ;;  %v4221_v15 = vpack.i.bf16 %v5152_v57, %v5150_v56  ;;  %v1494_v56 = vunpack.c.h.bf16 %v5276_v48 }
  0xb3   : > { %v387_v43 = vsel %vm386_vm0, %v3994_v47, %v3995_v45  ;;  %1012 = vst [vmem:[#allocation1 + $0x11] ss:$2 sm:$0xff] %v5011_v37  ;;  %v5281_v57 = vld.sshfl [vmem:[#allocation1 + $0x30] sm:$0xff pattern:$0x75316420] }
  0xb4   : > { %4172 = vrot.lane.b32.xlu0 %v4171_v38, %s4924_s21  ;;  %4192 = vrot.lane.b32.xlu1 %v4191_v39, %s4924_s21  ;;  %429 = vst [vmem:[#allocation2 + $0x2b0] sm:$0xf0] %v387_v43 }
  0xb5   : > { %4182 = vrot.lane.b32.xlu2 %v4181_v44, %s4924_s21  ;;  %v5248_v32 = vpop.permute.xlu1 %4007  ;;  %1172 = vst [vmem:[#allocation1 + $0x20] ss:$2 sm:$0xff] %v4979_v3 }
  0xb6   : > { %v5253_v53 = vpop.permute.xlu2 %4017  ;;  %v4010_v37 = vunpack.i.h.bf16 %v5248_v32  ;;  %v4009_v54 = vunpack.i.l.bf16 %v5248_v32  ;;  %1519 = vst [vmem:[#allocation1 + $0x30] ss:$2 sm:$0xff] %v1494_v56  ;;  %v1144_v32 = vld [vmem:[%s4973_s17 + $0x20] sm:$0xff] }
  0xb7   : > { %v4020_v59 = vunpack.i.h.bf16 %v5253_v53  ;;  %v4019_v60 = vunpack.i.l.bf16 %v5253_v53 }
  0xb8   : > { %v401_v62 = vsel %vm386_vm0, %v4009_v54, %v4010_v37 }
  0xb9   : > { %v396_v63 = vsel %vm386_vm0, %v4015_v4, %v4019_v60  ;;  %v397_v0 = vsel %vm386_vm0, %v4019_v60, %v4020_v59  ;;  %443 = vst [vmem:[#allocation2 + $0x58] sm:$0xf0] %v401_v62  ;;  %v5289_v9 = vld.sshfl [vmem:[#allocation1] sm:$0xff pattern:$0x75316420]  ;;  %v4246_v62 = vpack.i.bf16 %v5283_v6, %v5281_v57 }
  0xba   : > { %438 = vst [vmem:[#allocation2 + $0x510] sm:$0xf0] %v396_v63  ;;  %v5278_v49 = vld.sshfl [vmem:[#allocation1 + $0x10] sm:$0xff pattern:$0x75316420]  ;;  %v4211_v63 = vpack.i.bf16 %v5189_v17, %v5186_v16 }
  0xbb   : > { %439 = vst [vmem:[#allocation2 + $0x490] sm:$0xf0] %v397_v0  ;;  %v5285_v13 = vld.sshfl [vmem:[#allocation1 + $0x18] sm:$0xff pattern:$0x75316420]  ;;  %v1142_v16 = vld [vmem:[%s4973_s17 + $0x10] sm:$0xff] }
  0xbc   : > { %4202 = vrot.lane.b32.xlu0 %v4201_v61, %s4924_s21  ;;  %4222 = vrot.lane.b32.xlu1 %v4221_v15, %s4924_s21  ;;  %v5291_v10 = vld.sshfl [vmem:[#allocation1 + $0x8] sm:$0xff pattern:$0x75316420]  ;;  %v5297_v21 = vld.sshfl [vmem:[#allocation1 + $0x20] sm:$0xff pattern:$0x75316420]  ;;  %v4226_v15 = vpack.i.bf16 %v5184_v12, %v5182_v11  ;;  %v5373_v40 = vunpack.c.l.bf16 %v1142_v16 }
  0xbd   : > { %4197 = vrot.lane.b32.xlu2 %v4196_v2, %s4924_s21  ;;  %v5294_v18 = vpop.permute.xlu1 %4042  ;;  %1023 = vst [vmem:[#allocation1 + $0x1] ss:$2 sm:$0xff] %v5003_v24  ;;  %v5303_v30 = vld.sshfl [vmem:[#allocation1 + $0x28] sm:$0xff pattern:$0x75316420]  ;;  %v4216_v24 = vpack.i.bf16 %v5200_v27, %v5198_v26  ;;  %v5330_v26 = vunpack.c.h.bf16 %v1140_v19 }
  0xbe   : > { %v5299_v22 = vpop.permute.xlu2 %4027  ;;  %v4045_v7 = vunpack.i.h.bf16 %v5294_v18  ;;  %v4044_v29 = vunpack.i.l.bf16 %v5294_v18  ;;  %1024 = vst [vmem:[#allocation1 + $0x11] ss:$2 sm:$0xff] %v5016_v46  ;;  %v5322_v46 = vunpack.c.l.bf16 %v1140_v19  ;;  %v1145_v57 = vld [vmem:[%s4973_s17 + $0x28] sm:$0xf]  ;;  %v5455_v18 = vunpack.c.h.bf16 %v1144_v32 }
  0xbf   : > { %v4030_v33 = vunpack.i.h.bf16 %v5299_v22  ;;  %v4029_v4 = vunpack.i.l.bf16 %v5299_v22  ;;  %1185 = vst [vmem:[#allocation1 + $0x20] ss:$2 sm:$0xff] %v4992_v8 }
  0xc0   : > { %v407_v34 = vsel %vm386_vm0, %v4044_v29, %v4045_v7 }
  0xc1   : > { %v565_v35 = vsel %vm558_vm1, %v4029_v4, %v4030_v33  ;;  %449 = vst [vmem:[#allocation2 + $0x330] sm:$0xf0] %v407_v34 }
  0xc2   : > { %607 = vst [vmem:[#allocation2 + $0x520] sm:$0xf] %v565_v35 }
  0xc4   : > { %4217 = vrot.lane.b32.xlu0 %v4216_v24, %s4924_s21  ;;  %4242 = vrot.lane.b32.xlu1 %v4241_v5, %s4925_s22  ;;  %v5326_v1 = vld.sshfl [vmem:[#allocation1] sm:$0xff pattern:$0x75316420]  ;;  %v5328_v14 = vld.sshfl [vmem:[#allocation1 + $0x8] sm:$0xff pattern:$0x75316420] }
  0xc5   : > { %4207 = vrot.lane.b32.xlu2 %v4206_v36, %s4926_s23  ;;  %v5333_v27 = vpop.permute.xlu1 %4062  ;;  %1168 = vst [vmem:[#allocation1] ss:$2 sm:$0xff] %v5322_v46  ;;  %v5340_v44 = vld.sshfl [vmem:[#allocation1 + $0x10] sm:$0xff pattern:$0x75316420]  ;;  %v4236_v36 = vpack.i.bf16 %v5235_v51, %v5233_v50  ;;  %v4231_v50 = vpack.i.bf16 %v5237_v42, %v5227_v41 }
  0xc6   : > { %v3998_v38 = vpop.permute.xlu0 %3997  ;;  %v5335_v55 = vpop.permute.xlu2 %4032  ;;  %v4065_v58 = vunpack.i.h.bf16 %v5333_v27  ;;  %v4064_v39 = vunpack.i.l.bf16 %v5333_v27  ;;  %v5343_v61 = vld.sshfl [vmem:[#allocation1 + $0x18] sm:$0xff pattern:$0x75316420]  ;;  %v5412_v53 = vld.sshfl [vmem:[#allocation1 + $0x28] sm:$0xff pattern:$0x75316420] }
  0xc7   : > { %v4000_v47 = vunpack.i.h.bf16 %v3998_v38  ;;  %v3999_v43 = vunpack.i.l.bf16 %v3998_v38  ;;  %v4034_v60 = vunpack.i.l.bf16 %v5335_v55  ;;  %1170 = vst [vmem:[#allocation1 + $0x10] ss:$2 sm:$0xff] %v5330_v26  ;;  %v4035_v56 = vunpack.i.h.bf16 %v5335_v55 }
  0xc8   : > { %v563_v0 = vsel %vm558_vm1, %v4064_v39, %v4065_v58  ;;  %v4256_v38 = vpack.i.bf16 %v5285_v13, %v5278_v49  ;;  %v5409_v49 = vld.sshfl [vmem:[#allocation1 + $0x20] sm:$0xff pattern:$0x75316420]  ;;  %v5421_v13 = vunpack.c.l.bf16 %v1144_v32 }
  0xc9   : > { %v390_v2 = vsel %vm386_vm0, %v4000_v47, %v4004_v20  ;;  %v388_v11 = vsel %vm386_vm0, %v3995_v45, %v3999_v43  ;;  %v389_v12 = vsel %vm386_vm0, %v3999_v43, %v4000_v47  ;;  %605 = vst [vmem:[#allocation2 + $0xc8] sm:$0xf] %v563_v0  ;;  %v402_v17 = vsel %vm386_vm0, %v4010_v37, %v4034_v60 }
  0xca   : > { %432 = vst [vmem:[#allocation2 + $0x18] sm:$0xf0] %v390_v2  ;;  %v403_v28 = vsel %vm386_vm0, %v4034_v60, %v4035_v56  ;;  %v564_v20 = vsel %vm558_vm1, %v4065_v58, %v4029_v4  ;;  %v5378_v37 = vunpack.c.h.bf16 %v1142_v16 }
  0xcb   : > { %430 = vst [vmem:[#allocation2 + $0x3b0] sm:$0xf0] %v388_v11 }
  0xcc   : > { %431 = vst [vmem:[#allocation2 + $0x4d8] sm:$0xf0] %v389_v12  ;;  %4227 = vrot.lane.b32.xlu0 %v4226_v15, %s4927_s24  ;;  %4247 = vrot.lane.b32.xlu1 %v4246_v62, %s4927_s24  ;;  %v5376_v45 = vld.sshfl [vmem:[#allocation1] sm:$0xff pattern:$0x75316420] }
  0xcd   : > { %444 = vst [vmem:[#allocation2 + $0x2b8] sm:$0xf0] %v402_v17  ;;  %4212 = vrot.lane.b32.xlu2 %v4211_v63, %s4924_s21  ;;  %v5381_v7 = vld.sshfl [vmem:[#allocation1 + $0x8] sm:$0xff pattern:$0x75316420] }
  0xce   : > { %445 = vst [vmem:[#allocation2 + $0x580] sm:$0xf0] %v403_v28  ;;  %v4023_v6 = vpop.permute.xlu0 %4022  ;;  %v5385_v4 = vld.sshfl [vmem:[#allocation1 + $0x10] sm:$0xff pattern:$0x75316420]  ;;  %v4251_v28 = vpack.i.bf16 %v5291_v10, %v5289_v9 }
  0xcf   : > { %v4025_v19 = vunpack.i.h.bf16 %v4023_v6  ;;  %v4024_v24 = vunpack.i.l.bf16 %v4023_v6  ;;  %v5383_v5 = vpop.permute.xlu2 %4052  ;;  %606 = vst [vmem:[#allocation2 + $0x388] sm:$0xf] %v564_v20  ;;  %v5393_v58 = vld.sshfl [vmem:[#allocation1 + $0x18] sm:$0xff pattern:$0x75316420]  ;;  %v4271_v20 = vpack.i.bf16 %v5328_v14, %v5326_v1 }
  0xd0   : > { %v4055_v34 = vunpack.i.h.bf16 %v5383_v5  ;;  %v4054_v35 = vunpack.i.l.bf16 %v5383_v5  ;;  %1183 = vst [vmem:[#allocation1] ss:$2 sm:$0xff] %v5373_v40 }
  0xd1   : > { %v400_v47 = vsel %vm386_vm0, %v4025_v19, %v4009_v54  ;;  %v398_v43 = vsel %vm386_vm0, %v4020_v59, %v4024_v24  ;;  %v399_v60 = vsel %vm386_vm0, %v4024_v24, %v4025_v19  ;;  %1184 = vst [vmem:[#allocation1 + $0x10] ss:$2 sm:$0xff] %v5378_v37  ;;  %v1156_v54 = vunpack.c.l.bf16 %v1145_v57 }
  0xd2   : > { %442 = vst [vmem:[#allocation2 + $0x500] sm:$0xf0] %v400_v47  ;;  %v559_v51 = vsel %vm558_vm1, %v4054_v35, %v4055_v34  ;;  %v4261_v24 = vpack.i.bf16 %v5212_v25, %v5210_v23  ;;  %v1526_v23 = vld.sshfl [vmem:[#allocation1 + $0x30] sm:$0xff pattern:$0x75316420] }
  0xd3   : > { %440 = vst [vmem:[#allocation2 + $0x318] sm:$0xf0] %v398_v43  ;;  %v1527_v25 = vld.sshfl [vmem:[#allocation1 + $0x38] sm:$0xff pattern:$0x75316420]  ;;  %v4281_v43 = vpack.i.bf16 %v5251_v52, %v5245_v31 }
  0xd4   : > { %441 = vst [vmem:[#allocation2 + $0x548] sm:$0xf0] %v399_v60  ;;  %4237 = vrot.lane.b32.xlu0 %v4236_v36, %s4925_s22  ;;  %4257 = vrot.lane.b32.xlu1 %v4256_v38, %s4925_s22  ;;  %v5416_v41 = vpop.permute.xlu1 %4067  ;;  %v4286_v60 = vpack.i.bf16 %v5381_v7, %v5376_v45 }
  0xd5   : > { %601 = vst [vmem:[#allocation2 + $0x100] sm:$0xf] %v559_v51  ;;  %4232 = vrot.lane.b32.xlu2 %v4231_v50, %s4925_s22  ;;  %v4070_v42 = vunpack.i.h.bf16 %v5416_v41  ;;  %v4069_v59 = vunpack.i.l.bf16 %v5416_v41 }
  0xd6   : > { %v4038_v15 = vpop.permute.xlu0 %4037  ;;  %1197 = vst [vmem:[#allocation1 + $0x20] ss:$2 sm:$0xff] %v1156_v54  ;;  %v4266_v54 = vpack.i.bf16 %v1527_v25, %v1526_v23 }
  0xd7   : > { %v4040_v62 = vunpack.i.h.bf16 %v4038_v15  ;;  %v4039_v63 = vunpack.i.l.bf16 %v4038_v15  ;;  %v5423_v0 = vpop.permute.xlu2 %4082  ;;  %v738_v2 = vsel %vm731_vm2, %v4069_v59, %v4070_v42  ;;  %v5430_v11 = vld.sshfl [vmem:[#allocation1] sm:$0xff pattern:$0x75316420]  ;;  %v5432_v12 = vld.sshfl [vmem:[#allocation1 + $0x8] sm:$0xff pattern:$0x75316420] }
  0xd8   : > { %v4085_v16 = vunpack.i.h.bf16 %v5423_v0  ;;  %v4084_v17 = vunpack.i.l.bf16 %v5423_v0  ;;  %780 = vst [vmem:[#allocation2 + $0x520] sm:$0xf0] %v738_v2  ;;  %v5453_v10 = vld.sshfl [vmem:[#allocation1 + $0x10] sm:$0xff pattern:$0x75316420] }
  0xd9   : > { %v406_v57 = vsel %vm386_vm0, %v4040_v62, %v4044_v29  ;;  %v404_v6 = vsel %vm386_vm0, %v4035_v56, %v4039_v63  ;;  %v405_v19 = vsel %vm386_vm0, %v4039_v63, %v4040_v62  ;;  %1195 = vst [vmem:[#allocation1] ss:$2 sm:$0xff] %v5421_v13  ;;  %v5457_v29 = vld.sshfl [vmem:[#allocation1 + $0x18] sm:$0xff pattern:$0x75316420]  ;;  %vm3146_vm0 = vcmask 179200  }
  0xda   : > { %448 = vst [vmem:[#allocation2 + $0x3c0] sm:$0xf0] %v406_v57  ;;  %v571_v9 = vsel %vm558_vm1, %v4084_v17, %v4085_v16  ;;  %v4311_v57 = vpack.i.bf16 %v5412_v53, %v5409_v49 }
  0xdb   : > { %446 = vst [vmem:[#allocation2 + $0x590] sm:$0xf0] %v404_v6 }
  0xdc   : > { %447 = vst [vmem:[#allocation2 + $0x540] sm:$0xf0] %v405_v19  ;;  %4252 = vrot.lane.b32.xlu0 %v4251_v28, %s4925_s22  ;;  %4272 = vrot.lane.b32.xlu1 %v4271_v20, %s4925_s22  ;;  %v4296_v20 = vpack.i.bf16 %v5303_v30, %v5297_v21  ;;  %v4276_v21 = vpack.i.bf16 %v5343_v61, %v5340_v44 }
  0xdd   : > { %613 = vst [vmem:[#allocation2 + $0xb0] sm:$0xf] %v571_v9  ;;  %4262 = vrot.lane.b32.xlu2 %v4261_v24, %s4925_s22  ;;  %v5462_v1 = vld.sshfl [vmem:[#allocation1 + $0x20] sm:$0xff pattern:$0x75316420] }
  0xde   : > { %v5464_v14 = vpop.permute.xlu0 %4047  ;;  %1196 = vst [vmem:[#allocation1 + $0x10] ss:$2 sm:$0xff] %v5455_v18  ;;  %v5467_v55 = vld.sshfl [vmem:[#allocation1 + $0x28] sm:$0xff pattern:$0x75316420] }
  0xdf   : > { %v4050_v56 = vunpack.i.h.bf16 %v5464_v14  ;;  %v4049_v35 = vunpack.i.l.bf16 %v5464_v14  ;;  %v5471_v36 = vpop.permute.xlu2 %4087  ;;  %1345 = vst [vmem:[#allocation1 + $0x21] ss:$2 sm:$0xff] %v4979_v3 }
  0xe0   : > { %v4090_v38 = vunpack.i.h.bf16 %v5471_v36  ;;  %v4089_v47 = vunpack.i.l.bf16 %v5471_v36  ;;  %v5480_v50 = vld.sshfl [vmem:[#allocation1] sm:$0xff pattern:$0x75316420]  ;;  %v5482_v51 = vld.sshfl [vmem:[#allocation1 + $0x8] sm:$0xff pattern:$0x75316420] }
  0xe1   : > { %v572_v32 = vsel %vm558_vm1, %v4085_v16, %v4049_v35  ;;  %v573_v3 = vsel %vm558_vm1, %v4049_v35, %v4050_v56  ;;  %1341 = vst [vmem:[#allocation1 + $0x1] ss:$2 sm:$0xff] %v5322_v46 }
  0xe2   : > { %614 = vst [vmem:[#allocation2 + $0x2a0] sm:$0xf] %v572_v32  ;;  %v746_v31 = vsel %vm731_vm2, %v4089_v47, %v4090_v38 }
  0xe3   : > { %615 = vst [vmem:[#allocation2 + $0x570] sm:$0xf] %v573_v3 }
  0xe4   : > { %788 = vst [vmem:[#allocation2 + $0x570] sm:$0xf0] %v746_v31  ;;  %4282 = vrot.lane.b32.xlu0 %v4281_v43, %s4925_s22  ;;  %4287 = vrot.lane.b32.xlu1 %v4286_v60, %s4926_s23  ;;  %v4306_v43 = vpack.i.bf16 %v5457_v29, %v5453_v10 }
  0xe5   : > { %4267 = vrot.lane.b32.xlu2 %v4266_v54, %s4928_s25  ;;  %v1200_v52 = vld.sshfl [vmem:[#allocation1 + $0x10] sm:$0xff pattern:$0x75316420]  ;;  %v1201_v45 = vld.sshfl [vmem:[#allocation1 + $0x18] sm:$0xff pattern:$0x75316420] }
  0xe6   : > { %v4078_v7 = vpop.permute.xlu1 %4077  ;;  %v4058_v15 = vpop.permute.xlu0 %4057  ;;  %1343 = vst [vmem:[#allocation1 + $0x11] ss:$2 sm:$0xff] %v5330_v26  ;;  %v5530_v5 = vld.sshfl [vmem:[#allocation1 + $0x28] sm:$0xff pattern:$0x75316420]  ;;  %v4321_v54 = vpack.i.bf16 %v1201_v45, %v1200_v52 }
  0xe7   : > { %v4080_v62 = vunpack.i.h.bf16 %v4078_v7  ;;  %v4079_v63 = vunpack.i.l.bf16 %v4078_v7  ;;  %v4060_v2 = vunpack.i.h.bf16 %v4058_v15  ;;  %v4059_v16 = vunpack.i.l.bf16 %v4058_v15  ;;  %v5498_v28 = vpop.permute.xlu2 %4097 }
  0xe8   : > { %v5504_v6 = vld.sshfl [vmem:[#allocation1] sm:$0xff pattern:$0x75316420]  ;;  %v5506_v19 = vld.sshfl [vmem:[#allocation1 + $0x8] sm:$0xff pattern:$0x75316420]  ;;  %v4100_v49 = vunpack.i.h.bf16 %v5498_v28  ;;  %v4099_v53 = vunpack.i.l.bf16 %v5498_v28  ;;  %v4291_v15 = vpack.i.bf16 %v5393_v58, %v5385_v4 }
  0xe9   : > { %v569_v24 = vsel %vm558_vm1, %v4079_v63, %v4080_v62  ;;  %v570_v9 = vsel %vm558_vm1, %v4080_v62, %v4084_v17  ;;  %v562_v23 = vsel %vm558_vm1, %v4060_v2, %v4064_v39  ;;  %1356 = vst [vmem:[#allocation1 + $0x1] ss:$2 sm:$0xff] %v5373_v40  ;;  %v560_v30 = vsel %vm558_vm1, %v4055_v34, %v4059_v16  ;;  %v5528_v39 = vld.sshfl [vmem:[#allocation1 + $0x20] sm:$0xff pattern:$0x75316420] }
  0xea   : > { %611 = vst [vmem:[#allocation2 + $0x4d0] sm:$0xf] %v569_v24  ;;  %v561_v0 = vsel %vm558_vm1, %v4059_v16, %v4060_v2  ;;  %v577_v27 = vsel %vm558_vm1, %v4099_v53, %v4100_v49 }
  0xeb   : > { %612 = vst [vmem:[#allocation2 + $0x98] sm:$0xf] %v570_v9 }
  0xec   : > { %604 = vst [vmem:[#allocation2 + $0x248] sm:$0xf] %v562_v23  ;;  %4297 = vrot.lane.b32.xlu0 %v4296_v20, %s4926_s23  ;;  %4312 = vrot.lane.b32.xlu1 %v4311_v57, %s4926_s23  ;;  %v4316_v57 = vpack.i.bf16 %v5482_v51, %v5480_v50 }
  0xed   : > { %602 = vst [vmem:[#allocation2 + $0x8] sm:$0xf] %v560_v30  ;;  %4277 = vrot.lane.b32.xlu2 %v4276_v21, %s4925_s22  ;;  %v1351_v45 = vld.sshfl [vmem:[#allocation1 + $0x18] sm:$0xff pattern:$0x75316420]  ;;  %v4301_v21 = vpack.i.bf16 %v5432_v12, %v5430_v11 }
  0xee   : > { %603 = vst [vmem:[#allocation2 + $0x188] sm:$0xf] %v561_v0  ;;  %v4073_v44 = vpop.permute.xlu0 %4072  ;;  %v4093_v61 = vpop.permute.xlu1 %4092  ;;  %v1317_v30 = vld [vmem:[%s4973_s17 + $0x28] sm:$0xf] }
  0xef   : > { %619 = vst [vmem:[#allocation2 + $0x1f0] sm:$0xf] %v577_v27  ;;  %v5532_v34 = vpop.permute.xlu2 %4117  ;;  %v4075_v17 = vunpack.i.h.bf16 %v4073_v44  ;;  %v4074_v25 = vunpack.i.l.bf16 %v4073_v44  ;;  %v4095_v35 = vunpack.i.h.bf16 %v4093_v61  ;;  %v4094_v3 = vunpack.i.l.bf16 %v4093_v61 }
  0xf0   : > { %v4120_v60 = vunpack.i.h.bf16 %v5532_v34  ;;  %v4119_v32 = vunpack.i.l.bf16 %v5532_v34  ;;  %1358 = vst [vmem:[#allocation1 + $0x21] ss:$2 sm:$0xff] %v4992_v8  ;;  %v1360_v11 = vld.sshfl [vmem:[#allocation1] sm:$0xff pattern:$0x75316420] }
  0xf1   : > { %v568_v31 = vsel %vm558_vm1, %v4075_v17, %v4079_v63  ;;  %v566_v7 = vsel %vm558_vm1, %v4030_v33, %v4074_v25  ;;  %v567_v29 = vsel %vm558_vm1, %v4074_v25, %v4075_v17  ;;  %v576_v52 = vsel %vm558_vm1, %v4095_v35, %v4099_v53  ;;  %v1350_v33 = vld.sshfl [vmem:[#allocation1 + $0x10] sm:$0xff pattern:$0x75316420]  ;;  %v1361_v44 = vld.sshfl [vmem:[#allocation1 + $0x8] sm:$0xff pattern:$0x75316420] }
  0xf2   : > { %v734_v10 = vsel %vm731_vm2, %v4119_v32, %v4120_v60  ;;  %610 = vst [vmem:[#allocation2 + $0x488] sm:$0xf] %v568_v31  ;;  %v574_v22 = vsel %vm558_vm1, %v4050_v56, %v4094_v3  ;;  %v575_v8 = vsel %vm558_vm1, %v4094_v3, %v4095_v35  ;;  %v4336_v20 = vpack.i.bf16 %v1351_v45, %v1350_v33 }
  0xf3   : > { %776 = vst [vmem:[#allocation2 + $0x188] sm:$0xf0] %v734_v10  ;;  %v4346_v31 = vpack.i.bf16 %v1361_v44, %v1360_v11  ;;  %v4326_v10 = vpack.i.bf16 %v5467_v55, %v5462_v1 }
  0xf4   : > { %608 = vst [vmem:[#allocation2 + $0x3a8] sm:$0xf] %v566_v7  ;;  %4307 = vrot.lane.b32.xlu0 %v4306_v43, %s4926_s23  ;;  %4322 = vrot.lane.b32.xlu1 %v4321_v54, %s4926_s23  ;;  %v4331_v54 = vpack.i.bf16 %v5506_v19, %v5504_v6 }
  0xf5   : > { %609 = vst [vmem:[#allocation2 + $0x5e0] sm:$0xf] %v567_v29  ;;  %4292 = vrot.lane.b32.xlu2 %v4291_v15, %s4926_s23 }
  0xf6   : > { %618 = vst [vmem:[#allocation2 + $0x4c8] sm:$0xf] %v576_v52  ;;  %v4103_v4 = vpop.permute.xlu0 %4102  ;;  %v4113_v58 = vpop.permute.xlu1 %4112  ;;  %v1493_v52 = vunpack.c.l.bf16 %v5276_v48 }
  0xf7   : > { %616 = vst [vmem:[#allocation2 + $0x598] sm:$0xf] %v574_v22  ;;  %v4105_v62 = vunpack.i.h.bf16 %v4103_v4  ;;  %v4104_v14 = vunpack.i.l.bf16 %v4103_v4  ;;  %v4115_v63 = vunpack.i.h.bf16 %v4113_v58  ;;  %v4114_v56 = vunpack.i.l.bf16 %v4113_v58  ;;  %v5557_v2 = vpop.permute.xlu2 %4132  ;;  %v1364_v12 = vld.sshfl [vmem:[#allocation1 + $0x20] sm:$0xff pattern:$0x75316420] }
  0xf8   : > { %617 = vst [vmem:[#allocation2 + $0x5a8] sm:$0xf] %v575_v8  ;;  %v4135_v16 = vunpack.i.h.bf16 %v5557_v2  ;;  %v4134_v28 = vunpack.i.l.bf16 %v5557_v2  ;;  %v1365_v0 = vld.sshfl [vmem:[#allocation1 + $0x28] sm:$0xff pattern:$0x75316420] }
  0xf9   : > { %v578_v24 = vsel %vm558_vm1, %v4100_v49, %v4104_v14  ;;  %v579_v9 = vsel %vm558_vm1, %v4104_v14, %v4105_v62  ;;  %v733_v23 = vsel %vm731_vm2, %v4115_v63, %v4119_v32  ;;  %1357 = vst [vmem:[#allocation1 + $0x11] ss:$2 sm:$0xff] %v5378_v37  ;;  %v732_v53 = vsel %vm731_vm2, %v4114_v56, %v4115_v63 }
  0xfa   : > { %620 = vst [vmem:[#allocation2 + $0x2e8] sm:$0xf] %v578_v24  ;;  %v739_v50 = vsel %vm731_vm2, %v4070_v42, %v4134_v28  ;;  %v740_v51 = vsel %vm731_vm2, %v4134_v28, %v4135_v16  ;;  %v1328_v49 = vunpack.c.l.bf16 %v1317_v30  ;;  %v4356_v63 = vpack.i.bf16 %v1365_v0, %v1364_v12 }
  0xfb   : > { %621 = vst [vmem:[#allocation2 + $0xa8] sm:$0xf] %v579_v9  ;;  %v4341_v24 = vpack.i.bf16 %v5530_v5, %v5528_v39  ;;  %vm3515_vm1 = vcmask 1043456  }
  0xfc   : > { %775 = vst [vmem:[#allocation2 + $0x8] sm:$0xf0] %v733_v23  ;;  %4337 = vrot.lane.b32.xlu1 %v4336_v20, %s4927_s24  ;;  %4317 = vrot.lane.b32.xlu0 %v4316_v57, %s4926_s23 }
  0xfd   : > { %774 = vst [vmem:[#allocation2 + $0x100] sm:$0xf0] %v732_v53  ;;  %4302 = vrot.lane.b32.xlu2 %v4301_v21, %s4926_s23 }
  0xfe   : > { %781 = vst [vmem:[#allocation2 + $0x3a8] sm:$0xf0] %v739_v50  ;;  %v5580_v27 = vpop.permute.xlu0 %4107  ;;  %v5582_v42 = vpop.permute.xlu1 %4127 }
  0xff   : > { %782 = vst [vmem:[#allocation2 + $0x5e0] sm:$0xf0] %v740_v51  ;;  %v4110_v61 = vunpack.i.h.bf16 %v5580_v27  ;;  %v4109_v17 = vunpack.i.l.bf16 %v5580_v27  ;;  %v4130_v25 = vunpack.i.h.bf16 %v5582_v42  ;;  %v4129_v35 = vunpack.i.l.bf16 %v5582_v42  ;;  %v5588_v43 = vpop.permute.xlu2 %4147 }
 0x100   : > { %v4150_v32 = vunpack.i.h.bf16 %v5588_v43  ;;  %v4149_v3 = vunpack.i.l.bf16 %v5588_v43  ;;  %1370 = vst [vmem:[#allocation1 + $0x21] ss:$2 sm:$0xff] %v1328_v49  ;;  %v5606_v29 = vld.sshfl [vmem:[#allocation1 + $0x10] sm:$0xff pattern:$0x75316420] }
 0x101   : > { %v910_v7 = vsel %vm903_vm3, %v4109_v17, %v4110_v61  ;;  %v918_v15 = vsel %vm903_vm3, %v4129_v35, %v4130_v25  ;;  %1368 = vst [vmem:[#allocation1 + $0x1] ss:$2 sm:$0xff] %v5421_v13  ;;  %v5614_v19 = vld.sshfl [vmem:[#allocation1 + $0x18] sm:$0xff pattern:$0x75316420] }
 0x102   : > { %952 = vst [vmem:[#allocation2 + $0x4a8] sm:$0xf] %v910_v7  ;;  %v1083_v6 = vsel %vm1076_vm4, %v4149_v3, %v4150_v32 }
 0x103   : > { %960 = vst [vmem:[#allocation2 + $0x4f0] sm:$0xf] %v918_v15 }
 0x104   : > { %1125 = vst [vmem:[#allocation2 + $0x4a8] sm:$0xf0] %v1083_v6  ;;  %4332 = vrot.lane.b32.xlu0 %v4331_v54, %s4927_s24  ;;  %4347 = vrot.lane.b32.xlu1 %v4346_v31, %s4927_s24  ;;  %v4351_v31 = vpack.i.bf16 %v5614_v19, %v5606_v29 }
 0x105   : > { %4327 = vrot.lane.b32.xlu2 %v4326_v10, %s4926_s23  ;;  %1369 = vst [vmem:[#allocation1 + $0x11] ss:$2 sm:$0xff] %v5455_v18 }
 0x106   : > { %v4123_v1 = vpop.permute.xlu0 %4122  ;;  %v4143_v55 = vpop.permute.xlu1 %4142 }
 0x107   : > { %v4125_v22 = vunpack.i.h.bf16 %v4123_v1  ;;  %v4124_v8 = vunpack.i.l.bf16 %v4123_v1  ;;  %v4145_v33 = vunpack.i.h.bf16 %v4143_v55  ;;  %v4144_v4 = vunpack.i.l.bf16 %v4143_v55  ;;  %v4163_v58 = vpop.permute.xlu2 %4162  ;;  %v1375_v45 = vld.sshfl [vmem:[#allocation1 + $0x20] sm:$0xff pattern:$0x75316420]  ;;  %v1376_v62 = vld.sshfl [vmem:[#allocation1 + $0x28] sm:$0xff pattern:$0x75316420] }
 0x108   : > { %v4165_v14 = vunpack.i.h.bf16 %v4163_v58  ;;  %v4164_v48 = vunpack.i.l.bf16 %v4163_v58  ;;  %v4371_v56 = vpack.i.bf16 %v1376_v62, %v1375_v45  ;;  %1517 = vst [vmem:[#allocation1 + $0x20] ss:$2 sm:$0xff] %v1493_v52  ;;  %v5637_v34 = vld.sshfl [vmem:[#allocation1] sm:$0xff pattern:$0x75316420] }
 0x109   : > { %v737_v28 = vsel %vm731_vm2, %v4125_v22, %v4069_v59  ;;  %v735_v20 = vsel %vm731_vm2, %v4120_v60, %v4124_v8  ;;  %v736_v57 = vsel %vm731_vm2, %v4124_v8, %v4125_v22  ;;  %v745_v9 = vsel %vm731_vm2, %v4145_v33, %v4089_v47  ;;  %v1372_v60 = vld.sshfl [vmem:[#allocation1 + $0x8] sm:$0xff pattern:$0x75316420] }
 0x10a   : > { %779 = vst [vmem:[#allocation2 + $0x388] sm:$0xf0] %v737_v28  ;;  %v744_v23 = vsel %vm731_vm2, %v4144_v4, %v4145_v33  ;;  %v752_v41 = vsel %vm731_vm2, %v4164_v48, %v4165_v14  ;;  %v4361_v62 = vpack.i.bf16 %v1372_v60, %v5637_v34 }
 0x10b   : > { %777 = vst [vmem:[#allocation2 + $0x248] sm:$0xf0] %v735_v20  ;;  %v1488_v20 = vld [vmem:[%s4973_s17 + $0x18] sm:$0xff] }
 0x10c   : > { %778 = vst [vmem:[#allocation2 + $0xc8] sm:$0xf0] %v736_v57  ;;  %4357 = vrot.lane.b32.xlu0 %v4356_v63, %s4927_s24  ;;  %4372 = vrot.lane.b32.xlu1 %v4371_v56, %s4927_s24  ;;  %v1373_v59 = vld.sshfl [vmem:[#allocation1 + $0x10] sm:$0xff pattern:$0x75316420]  ;;  %v1497_v60 = vunpack.c.l.bf16 %v1488_v20 }
 0x10d   : > { %787 = vst [vmem:[#allocation2 + $0x2a0] sm:$0xf0] %v745_v9  ;;  %4342 = vrot.lane.b32.xlu2 %v4341_v24, %s4927_s24  ;;  %v1374_v39 = vld.sshfl [vmem:[#allocation1 + $0x18] sm:$0xff pattern:$0x75316420] }
 0x10e   : > { %786 = vst [vmem:[#allocation2 + $0xb0] sm:$0xf0] %v744_v23  ;;  %v4138_v5 = vpop.permute.xlu0 %4137  ;;  %v4158_v47 = vpop.permute.xlu1 %4157  ;;  %v4366_v12 = vpack.i.bf16 %v1374_v39, %v1373_v59 }
 0x10f   : > { %794 = vst [vmem:[#allocation2 + $0xa8] sm:$0xf0] %v752_v41  ;;  %v4140_v21 = vunpack.i.h.bf16 %v4138_v5  ;;  %v4139_v30 = vunpack.i.l.bf16 %v4138_v5  ;;  %v4160_v53 = vunpack.i.h.bf16 %v4158_v47  ;;  %v4159_v50 = vunpack.i.l.bf16 %v4158_v47  ;;  %v4183_v51 = vpop.permute.xlu2 %4182  ;;  %v1524_v49 = vld.sshfl [vmem:[#allocation1 + $0x20] sm:$0xff pattern:$0x75316420] }
 0x110   : > { %v4185_v11 = vunpack.i.h.bf16 %v4183_v51  ;;  %1515 = vst [vmem:[#allocation1 + $0x10] ss:$2 sm:$0xff] %v5330_v26  ;;  %v1525_v7 = vld.sshfl [vmem:[#allocation1 + $0x28] sm:$0xff pattern:$0x75316420]  ;;  %v4184_v2 = vunpack.i.l.bf16 %v4183_v51 }
 0x111   : > { %v741_v0 = vsel %vm731_vm2, %v4135_v16, %v4139_v30  ;;  %v742_v44 = vsel %vm731_vm2, %v4139_v30, %v4140_v21  ;;  %v743_v54 = vsel %vm731_vm2, %v4140_v21, %v4144_v4  ;;  %1513 = vst [vmem:[#allocation1] ss:$2 sm:$0xff] %v5322_v46  ;;  %v750_v15 = vsel %vm731_vm2, %v4159_v50, %v4160_v53 }
 0x112   : > { %783 = vst [vmem:[#allocation2 + $0x488] sm:$0xf0] %v741_v0  ;;  %v4386_v10 = vpack.i.bf16 %v1525_v7, %v1524_v49  ;;  %v751_v26 = vsel %vm731_vm2, %v4160_v53, %v4164_v48  ;;  %v909_v16 = vsel %vm903_vm3, %v4185_v11, %v4109_v17  ;;  %v908_v46 = vsel %vm903_vm3, %v4184_v2, %v4185_v11 }
 0x113   : > { %784 = vst [vmem:[#allocation2 + $0x4d0] sm:$0xf0] %v742_v44  ;;  %v1498_v11 = vunpack.c.h.bf16 %v1488_v20 }
 0x114   : > { %785 = vst [vmem:[#allocation2 + $0x98] sm:$0xf0] %v743_v54  ;;  %4367 = vrot.lane.b32.xlu0 %v4366_v12, %s4927_s24  ;;  %4387 = vrot.lane.b32.xlu1 %v4386_v10, %s4928_s25 }
 0x115   : > { %792 = vst [vmem:[#allocation2 + $0x1f0] sm:$0xf0] %v750_v15  ;;  %4352 = vrot.lane.b32.xlu2 %v4351_v31, %s4927_s24 }
 0x116   : > { %793 = vst [vmem:[#allocation2 + $0x2e8] sm:$0xf0] %v751_v26  ;;  %v5658_v29 = vpop.permute.xlu1 %4177  ;;  %v4153_v6 = vpop.permute.xlu0 %4152 }
 0x117   : > { %951 = vst [vmem:[#allocation2 + $0x3d0] sm:$0xf] %v909_v16  ;;  %v4180_v19 = vunpack.i.h.bf16 %v5658_v29  ;;  %v4179_v52 = vunpack.i.l.bf16 %v5658_v29  ;;  %v5662_v1 = vpop.permute.xlu2 %4197  ;;  %v4155_v17 = vunpack.i.h.bf16 %v4153_v6  ;;  %v4154_v55 = vunpack.i.l.bf16 %v4153_v6  ;;  %v1522_v22 = vld.sshfl [vmem:[#allocation1 + $0x10] sm:$0xff pattern:$0x75316420]  ;;  %v5733_v6 = vld [vmem:[%s4973_s17 + $0x4] sm:$0xff] }
 0x118   : > { %950 = vst [vmem:[#allocation2 + $0x3d8] sm:$0xf] %v908_v46  ;;  %v4200_v8 = vunpack.i.h.bf16 %v5662_v1  ;;  %v4199_v33 = vunpack.i.l.bf16 %v5662_v1  ;;  %v1523_v4 = vld.sshfl [vmem:[#allocation1 + $0x18] sm:$0xff pattern:$0x75316420] }
 0x119   : > { %v906_v58 = vsel %vm903_vm3, %v4179_v52, %v4180_v19  ;;  %v907_v45 = vsel %vm903_vm3, %v4180_v19, %v4184_v2  ;;  %1529 = vst [vmem:[#allocation1 + $0x10] ss:$2 sm:$0xff] %v5378_v37  ;;  %v749_v48 = vsel %vm731_vm2, %v4155_v17, %v4159_v50  ;;  %v4381_v63 = vpack.i.bf16 %v1523_v4, %v1522_v22  ;;  %v1520_v28 = vld.sshfl [vmem:[#allocation1] sm:$0xff pattern:$0x75316420] }
 0x11a   : > { %948 = vst [vmem:[#allocation2 + $0x478] sm:$0xf] %v906_v58  ;;  %v914_v14 = vsel %vm903_vm3, %v4199_v33, %v4200_v8  ;;  %v747_v56 = vsel %vm731_vm2, %v4090_v38, %v4154_v55  ;;  %v748_v37 = vsel %vm731_vm2, %v4154_v55, %v4155_v17  ;;  %v1521_v9 = vld.sshfl [vmem:[#allocation1 + $0x8] sm:$0xff pattern:$0x75316420]  ;;  %v5741_v22 = vunpack.c.l.bf16 %v5733_v6 }
 0x11b   : > { %949 = vst [vmem:[#allocation2 + $0x110] sm:$0xf] %v907_v45  ;;  %v4376_v50 = vpack.i.bf16 %v1521_v9, %v1520_v28  ;;  %vm3511_vm2 = vcmask 588800  }
 0x11c   : > { %956 = vst [vmem:[#allocation2 + $0x88] sm:$0xf] %v914_v14  ;;  %4382 = vrot.lane.b32.xlu0 %v4381_v63, %s4928_s25 }
 0x11d   : > { %791 = vst [vmem:[#allocation2 + $0x4c8] sm:$0xf0] %v749_v48  ;;  %4362 = vrot.lane.b32.xlu2 %v4361_v62, %s4927_s24 }
 0x11e   : > { %789 = vst [vmem:[#allocation2 + $0x598] sm:$0xf0] %v747_v56  ;;  %v5685_v57 = vpop.permute.xlu1 %4187  ;;  %v5687_v24 = vpop.permute.xlu0 %4167 }
 0x11f   : > { %790 = vst [vmem:[#allocation2 + $0x5a8] sm:$0xf0] %v748_v37  ;;  %v4190_v36 = vunpack.i.h.bf16 %v5685_v57  ;;  %v4189_v38 = vunpack.i.l.bf16 %v5685_v57  ;;  %v5691_v23 = vpop.permute.xlu2 %4207  ;;  %v4170_v41 = vunpack.i.h.bf16 %v5687_v24  ;;  %v4169_v59 = vunpack.i.l.bf16 %v5687_v24 }
 0x120   : > { %v1534_v34 = vld.sshfl [vmem:[#allocation1 + $0x10] sm:$0xff pattern:$0x75316420]  ;;  %v1535_v39 = vld.sshfl [vmem:[#allocation1 + $0x18] sm:$0xff pattern:$0x75316420]  ;;  %v4210_v5 = vunpack.i.h.bf16 %v5691_v23  ;;  %v4209_v47 = vunpack.i.l.bf16 %v5691_v23 }
 0x121   : > { %v4401_v21 = vpack.i.bf16 %v1535_v39, %v1534_v34  ;;  %v1255_v30 = vsel %vm1248_vm5, %v4189_v38, %v4190_v36  ;;  %v1091_v53 = vsel %vm1076_vm4, %v4169_v59, %v4170_v41  ;;  %1528 = vst [vmem:[#allocation1] ss:$2 sm:$0xff] %v5373_v40 }
 0x122   : > { %1297 = vst [vmem:[#allocation2 + $0x578] sm:$0xf] %v1255_v30  ;;  %v1263_v51 = vsel %vm1248_vm5, %v4209_v47, %v4210_v5 }
 0x123   : > { %4402 = vrot.lane.b32.xlu1 %v4401_v21, %s4928_s25  ;;  %1305 = vst [vmem:[#allocation2 + $0x190] sm:$0xf] %v1263_v51 }
 0x124   : > { %1133 = vst [vmem:[#allocation2 + $0x4f0] sm:$0xf0] %v1091_v53 }
 0x125   : > { %4377 = vrot.lane.b32.xlu2 %v4376_v50, %s4928_s25  ;;  %1530 = vst [vmem:[#allocation1 + $0x20] ss:$2 sm:$0xff] %v1497_v60  ;;  %v5755_v60 = vld [vmem:[%s4973_s17 + $0x28] sm:$0xff]  }
 0x126   : > { %v4173_v12 = vpop.permute.xlu0 %4172  ;;  %v4193_v49 = vpop.permute.xlu1 %4192  ;;  %1531 = vst [vmem:[#allocation1 + $0x30] ss:$2 sm:$0xff] %v1498_v11  ;;  %v1501_v53 = vunpack.c.l.bf16 %v5755_v60  ;;  %v1658_v50 = vld [vmem:[%s4973_s17 + $0xc] sm:$0xff] }
 0x127   : > { %v4175_v0 = vunpack.i.h.bf16 %v4173_v12  ;;  %v4174_v40 = vunpack.i.l.bf16 %v4173_v12  ;;  %v4195_v44 = vunpack.i.h.bf16 %v4193_v49  ;;  %v4194_v54 = vunpack.i.l.bf16 %v4193_v49  ;;  %v5715_v31 = vpop.permute.xlu2 %4212  ;;  %1541 = vst [vmem:[#allocation1 + $0x10] ss:$2 sm:$0xff] %v5455_v18 }
 0x128   : > { %v1532_v7 = vld.sshfl [vmem:[#allocation1] sm:$0xff pattern:$0x75316420]  ;;  %v1533_v15 = vld.sshfl [vmem:[#allocation1 + $0x8] sm:$0xff pattern:$0x75316420]  ;;  %v4214_v10 = vunpack.i.l.bf16 %v5715_v31  ;;  %v4215_v29 = vunpack.i.h.bf16 %v5715_v31  ;;  %v5767_v51 = vunpack.c.h.bf16 %v1658_v50 }
 0x129   : > { %v4391_v26 = vpack.i.bf16 %v1533_v15, %v1532_v7  ;;  %1540 = vst [vmem:[#allocation1] ss:$2 sm:$0xff] %v5421_v13  ;;  %v905_v2 = vsel %vm903_vm3, %v4175_v0, %v4179_v52  ;;  %v904_v16 = vsel %vm903_vm3, %v4174_v40, %v4175_v0  ;;  %v913_v46 = vsel %vm903_vm3, %v4195_v44, %v4199_v33 }
 0x12a   : > { %947 = vst [vmem:[#allocation2 + $0xa0] sm:$0xf] %v905_v2  ;;  %v911_v18 = vsel %vm903_vm3, %v4110_v61, %v4194_v54  ;;  %v912_v13 = vsel %vm903_vm3, %v4194_v54, %v4195_v44  ;;  %v919_v19 = vsel %vm903_vm3, %v4130_v25, %v4214_v10  ;;  %v920_v27 = vsel %vm903_vm3, %v4214_v10, %v4215_v29 }
 0x12b   : > { %4392 = vrot.lane.b32.xlu0 %v4391_v26, %s4928_s25  ;;  %946 = vst [vmem:[#allocation2 + $0x5b8] sm:$0xf] %v904_v16 }
 0x12c   : > { %955 = vst [vmem:[#allocation2 + $0x4e0] sm:$0xf] %v913_v46  ;;  %v1536_v52 = vld.sshfl [vmem:[#allocation1 + $0x20] sm:$0xff pattern:$0x75316420]  ;;  %v5784_v46 = vunpack.c.l.bf16 %v1658_v50 }
 0x12d   : > { %953 = vst [vmem:[#allocation2 + $0x320] sm:$0xf] %v911_v18  ;;  %v1537_v17 = vld.sshfl [vmem:[#allocation1 + $0x28] sm:$0xff pattern:$0x75316420] }
 0x12e   : > { %954 = vst [vmem:[#allocation2 + $0x130] sm:$0xf] %v912_v13  ;;  %v4406_v61 = vpack.i.bf16 %v1537_v17, %v1536_v52  ;;  %v1538_v55 = vld.sshfl [vmem:[#allocation1 + $0x30] sm:$0xff pattern:$0x75316420]  ;;  %v4203_v33 = vpop.permute.xlu0 %4202  ;;  %v4223_v4 = vpop.permute.xlu1 %4222 }
 0x12f   : > { %961 = vst [vmem:[#allocation2 + $0x2e0] sm:$0xf] %v919_v19  ;;  %v1539_v58 = vld.sshfl [vmem:[#allocation1 + $0x38] sm:$0xff pattern:$0x75316420]  ;;  %v4205_v45 = vunpack.i.h.bf16 %v4203_v33  ;;  %v4204_v62 = vunpack.i.l.bf16 %v4203_v33  ;;  %v4225_v14 = vunpack.i.h.bf16 %v4223_v4  ;;  %v5743_v25 = vpop.permute.xlu2 %4232  ;;  %v4224_v39 = vunpack.i.l.bf16 %v4223_v4 }
 0x130   : > { %v1543_v48 = vld.sshfl [vmem:[#allocation1] sm:$0xff pattern:$0x75316420]  ;;  %v1544_v63 = vld.sshfl [vmem:[#allocation1 + $0x8] sm:$0xff pattern:$0x75316420]  ;;  %4407 = vrot.lane.b32.xlu2 %v4406_v61, %s4928_s25  ;;  %v4396_v56 = vpack.i.bf16 %v1539_v58, %v1538_v55  ;;  %v4235_v37 = vunpack.i.h.bf16 %v5743_v25  ;;  %v4234_v28 = vunpack.i.l.bf16 %v5743_v25 }
 0x131   : > { %v4411_v20 = vpack.i.bf16 %v1544_v63, %v1543_v48  ;;  %962 = vst [vmem:[#allocation2 + $0x368] sm:$0xf] %v920_v27  ;;  %v917_v9 = vsel %vm903_vm3, %v4205_v45, %v4129_v35  ;;  %v915_v34 = vsel %vm903_vm3, %v4200_v8, %v4204_v62  ;;  %v916_v21 = vsel %vm903_vm3, %v4204_v62, %v4205_v45  ;;  %v1545_v30 = vld.sshfl [vmem:[#allocation1 + $0x10] sm:$0xff pattern:$0x75316420]  ;;  %v5802_v4 = vld [vmem:[%s4973_s17 + $0x1c] sm:$0xff] }
 0x132   : > { %1686 = vst [vmem:[#allocation1 + $0x1] ss:$2 sm:$0xff] %v5741_v22  ;;  %v924_v42 = vsel %vm903_vm3, %v4224_v39, %v4225_v14  ;;  %v1546_v35 = vld.sshfl [vmem:[#allocation1 + $0x18] sm:$0xff pattern:$0x75316420]  ;;  %v1077_v1 = vsel %vm1076_vm4, %v4234_v28, %v4235_v37  ;;  %v5810_v48 = vunpack.c.h.bf16 %v5733_v6 }
 0x133   : > { %4412 = vrot.lane.b32.xlu1 %v4411_v20, %s4928_s25  ;;  %4397 = vrot.lane.b32.xlu0 %v4396_v56, %s4928_s25  ;;  %959 = vst [vmem:[#allocation2 + $0x558] sm:$0xf] %v917_v9  ;;  %v4416_v8 = vpack.i.bf16 %v1546_v35, %v1545_v30  ;;  %v5824_v9 = vunpack.c.l.bf16 %v5802_v4 }
 0x134   : > { %957 = vst [vmem:[#allocation2 + $0x2f0] sm:$0xf] %v915_v34  ;;  %v1659_v34 = vld [vmem:[%s4973_s17 + $0x14] sm:$0xff] }
 0x135   : > { %958 = vst [vmem:[#allocation2 + $0x260] sm:$0xf] %v916_v21  ;;  %v5841_v50 = vunpack.c.h.bf16 %v1659_v34 }
 0x136   : > { %966 = vst [vmem:[#allocation2 + $0x1b8] sm:$0xf] %v924_v42  ;;  %v4218_v11 = vpop.permute.xlu0 %4217  ;;  %v5769_v12 = vpop.permute.xlu1 %4242 }
 0x137   : > { %1119 = vst [vmem:[#allocation2 + $0x5b8] sm:$0xf0] %v1077_v1  ;;  %v4220_v49 = vunpack.i.h.bf16 %v4218_v11  ;;  %v4219_v0 = vunpack.i.l.bf16 %v4218_v11  ;;  %v4245_v40 = vunpack.i.h.bf16 %v5769_v12  ;;  %v5772_v44 = vpop.permute.xlu2 %4262  ;;  %v4244_v16 = vunpack.i.l.bf16 %v5769_v12 }
 0x138   : > { %4417 = vrot.lane.b32.xlu2 %v4416_v8, %s4928_s25  ;;  %1542 = vst [vmem:[#allocation1 + $0x20] ss:$2 sm:$0xff] %v1501_v53  ;;  %v4265_v18 = vunpack.i.h.bf16 %v5772_v44  ;;  %v4264_v13 = vunpack.i.l.bf16 %v5772_v44  ;;  %v5838_v1 = vunpack.c.l.bf16 %v1659_v34 }
 0x139   : > { %v1693_v54 = vld.sshfl [vmem:[#allocation1] sm:$0xff pattern:$0x75316420]  ;;  %v1694_v31 = vld.sshfl [vmem:[#allocation1 + $0x8] sm:$0xff pattern:$0x75316420]  ;;  %v921_v7 = vsel %vm903_vm3, %v4215_v29, %v4219_v0  ;;  %v922_v15 = vsel %vm903_vm3, %v4219_v0, %v4220_v49  ;;  %v923_v26 = vsel %vm903_vm3, %v4220_v49, %v4224_v39  ;;  %v1082_v2 = vsel %vm1076_vm4, %v4245_v40, %v4149_v3 }
 0x13a   : > { %v4426_v10 = vpack.i.bf16 %v1694_v31, %v1693_v54  ;;  %1692 = vst [vmem:[#allocation1 + $0x31] ss:$2 sm:$0xff] %v5767_v51  ;;  %v1081_v3 = vsel %vm1076_vm4, %v4244_v16, %v4245_v40  ;;  %v1090_v33 = vsel %vm1076_vm4, %v4265_v18, %v4169_v59  ;;  %v1089_v14 = vsel %vm1076_vm4, %v4264_v13, %v4265_v18 }
 0x13b   : > { %963 = vst [vmem:[#allocation2 + $0xe8] sm:$0xf] %v921_v7 }
 0x13c   : > { %4427 = vrot.lane.b32.xlu1 %v4426_v10, %s4929_s26  ;;  %964 = vst [vmem:[#allocation2 + $0x300] sm:$0xf] %v922_v15 }
 0x13d   : > { %965 = vst [vmem:[#allocation2 + $0xd8] sm:$0xf] %v923_v26 }
 0x13e   : > { %1124 = vst [vmem:[#allocation2 + $0x3d0] sm:$0xf0] %v1082_v2  ;;  %v5788_v29 = vpop.permute.xlu0 %4227  ;;  %v5795_v61 = vpop.permute.xlu1 %4247  ;;  %v1661_v2 = vld [vmem:[%s4973_s17 + $0x24] sm:$0xff] }
 0x13f   : > { %v1547_v19 = vld.sshfl [vmem:[#allocation1 + $0x20] sm:$0xff pattern:$0x75316420]  ;;  %v1548_v52 = vld.sshfl [vmem:[#allocation1 + $0x28] sm:$0xff pattern:$0x75316420]  ;;  %v4230_v17 = vunpack.i.h.bf16 %v5788_v29  ;;  %v4229_v27 = vunpack.i.l.bf16 %v5788_v29  ;;  %v5804_v58 = vpop.permute.xlu2 %4267  ;;  %v4250_v59 = vunpack.i.h.bf16 %v5795_v61  ;;  %v4249_v56 = vunpack.i.l.bf16 %v5795_v61 }
 0x140   : > { %v4421_v55 = vpack.i.bf16 %v1548_v52, %v1547_v19  ;;  %1690 = vst [vmem:[#allocation1 + $0x21] ss:$2 sm:$0xff] %v5784_v46  ;;  %v4270_v20 = vunpack.i.h.bf16 %v5804_v58  ;;  %v4269_v6 = vunpack.i.l.bf16 %v5804_v58 }
 0x141   : > { %v1699_v45 = vld.sshfl [vmem:[#allocation1 + $0x30] sm:$0xff pattern:$0x75316420]  ;;  %v1700_v62 = vld.sshfl [vmem:[#allocation1 + $0x38] sm:$0xff pattern:$0x75316420]  ;;  %v1428_v28 = vsel %vm1421_vm6, %v4229_v27, %v4230_v17  ;;  %v1436_v39 = vsel %vm1421_vm6, %v4249_v56, %v4250_v59 }
 0x142   : > { %4422 = vrot.lane.b32.xlu0 %v4421_v55, %s4928_s25  ;;  %v4441_v63 = vpack.i.bf16 %v1700_v62, %v1699_v45  ;;  %1123 = vst [vmem:[#allocation2 + $0x3d8] sm:$0xf0] %v1081_v3  ;;  %v1600_v35 = vsel %vm1593_vm7, %v4269_v6, %v4270_v20 }
 0x143   : > { %1132 = vst [vmem:[#allocation2 + $0x558] sm:$0xf0] %v1090_v33  ;;  %v5860_v33 = vunpack.c.h.bf16 %v1661_v2 }
 0x144   : > { %4442 = vrot.lane.b32.xlu1 %v4441_v63, %s4929_s26  ;;  %1131 = vst [vmem:[#allocation2 + $0x260] sm:$0xf0] %v1089_v14 }
 0x145   : > { %1688 = vst [vmem:[#allocation1 + $0x11] ss:$2 sm:$0xff] %v5810_v48 }
 0x146   : > { %1470 = vst [vmem:[#allocation2 + $0x578] sm:$0xf0] %v1428_v28  ;;  %v4238_v21 = vpop.permute.xlu0 %4237  ;;  %v4258_v49 = vpop.permute.xlu1 %4257 }
 0x147   : > { %v1697_v30 = vld.sshfl [vmem:[#allocation1 + $0x20] sm:$0xff pattern:$0x75316420]  ;;  %v1698_v42 = vld.sshfl [vmem:[#allocation1 + $0x28] sm:$0xff pattern:$0x75316420]  ;;  %v4239_v8 = vunpack.i.l.bf16 %v4238_v21  ;;  %v4240_v11 = vunpack.i.h.bf16 %v4238_v21  ;;  %v5844_v0 = vpop.permute.xlu2 %4277  ;;  %v4260_v7 = vunpack.i.h.bf16 %v4258_v49  ;;  %v4259_v15 = vunpack.i.l.bf16 %v4258_v49 }
 0x148   : > { %v4436_v53 = vpack.i.bf16 %v1698_v42, %v1697_v30  ;;  %1703 = vst [vmem:[#allocation1 + $0x21] ss:$2 sm:$0xff] %v5824_v9  ;;  %v4280_v3 = vunpack.i.h.bf16 %v5844_v0  ;;  %v4279_v55 = vunpack.i.l.bf16 %v5844_v0 }
 0x149   : > { %1478 = vst [vmem:[#allocation2 + $0x190] sm:$0xf0] %v1436_v39  ;;  %v1078_v40 = vsel %vm1076_vm4, %v4235_v37, %v4239_v8  ;;  %v1079_v26 = vsel %vm1076_vm4, %v4239_v8, %v4240_v11  ;;  %v1080_v18 = vsel %vm1076_vm4, %v4240_v11, %v4244_v16  ;;  %v1087_v52 = vsel %vm1076_vm4, %v4259_v15, %v4260_v7 }
 0x14a   : > { %4437 = vrot.lane.b32.xlu0 %v4436_v53, %s4929_s26  ;;  %1642 = vst [vmem:[#allocation2 + $0x4e8] sm:$0xf] %v1600_v35  ;;  %v1088_v14 = vsel %vm1076_vm4, %v4260_v7, %v4264_v13  ;;  %v1095_v34 = vsel %vm1076_vm4, %v4279_v55, %v4280_v3  ;;  %v5870_v39 = vunpack.c.h.bf16 %v5802_v4  ;;  %v5875_v35 = vunpack.c.l.bf16 %v1661_v2 }
 0x14b   : > { %1701 = vst [vmem:[#allocation1 + $0x1] ss:$2 sm:$0xff] %v5838_v1 }
 0x14c   : > { %v1695_v54 = vld.sshfl [vmem:[#allocation1 + $0x10] sm:$0xff pattern:$0x75316420]  ;;  %v1696_v31 = vld.sshfl [vmem:[#allocation1 + $0x18] sm:$0xff pattern:$0x75316420] }
 0x14d   : > { %v4431_v10 = vpack.i.bf16 %v1696_v31, %v1695_v54  ;;  %1702 = vst [vmem:[#allocation1 + $0x11] ss:$2 sm:$0xff] %v5841_v50 }
 0x14e   : > { %1120 = vst [vmem:[#allocation2 + $0xa0] sm:$0xf0] %v1078_v40  ;;  %v4253_v45 = vpop.permute.xlu0 %4252  ;;  %v4273_v11 = vpop.permute.xlu1 %4272 }
 0x14f   : > { %4432 = vrot.lane.b32.xlu2 %v4431_v10, %s4929_s26  ;;  %v1709_v25 = vld.sshfl [vmem:[#allocation1 + $0x20] sm:$0xff pattern:$0x75316420]  ;;  %v1710_v19 = vld.sshfl [vmem:[#allocation1 + $0x28] sm:$0xff pattern:$0x75316420]  ;;  %v5872_v21 = vpop.permute.xlu2 %4292  ;;  %v4255_v30 = vunpack.i.h.bf16 %v4253_v45  ;;  %v4254_v8 = vunpack.i.l.bf16 %v4253_v45  ;;  %v4275_v40 = vunpack.i.h.bf16 %v4273_v11  ;;  %v4274_v7 = vunpack.i.l.bf16 %v4273_v11 }
 0x150   : > { %v4456_v37 = vpack.i.bf16 %v1710_v19, %v1709_v25  ;;  %1121 = vst [vmem:[#allocation2 + $0x478] sm:$0xf0] %v1079_v26  ;;  %v4295_v44 = vunpack.i.h.bf16 %v5872_v21  ;;  %v4294_v13 = vunpack.i.l.bf16 %v5872_v21 }
 0x151   : > { %1122 = vst [vmem:[#allocation2 + $0x110] sm:$0xf0] %v1080_v18  ;;  %v1086_v53 = vsel %vm1076_vm4, %v4255_v30, %v4259_v15  ;;  %v1084_v49 = vsel %vm1076_vm4, %v4150_v32, %v4254_v8  ;;  %v1085_v26 = vsel %vm1076_vm4, %v4254_v8, %v4255_v30  ;;  %v1094_v25 = vsel %vm1076_vm4, %v4275_v40, %v4279_v55 }
 0x152   : > { %4457 = vrot.lane.b32.xlu1 %v4456_v37, %s4929_s26  ;;  %v1705_v12 = vld.sshfl [vmem:[#allocation1] sm:$0xff pattern:$0x75316420]  ;;  %v1706_v16 = vld.sshfl [vmem:[#allocation1 + $0x8] sm:$0xff pattern:$0x75316420]  ;;  %v1251_v4 = vsel %vm1248_vm5, %v4294_v13, %v4295_v44  ;;  %v1092_v37 = vsel %vm1076_vm4, %v4170_v41, %v4274_v7 }
 0x153   : > { %v4446_v62 = vpack.i.bf16 %v1706_v16, %v1705_v12  ;;  %1129 = vst [vmem:[#allocation2 + $0x88] sm:$0xf0] %v1087_v52  ;;  %v1093_v12 = vsel %vm1076_vm4, %v4274_v7, %v4275_v40  ;;  %v1673_v16 = vunpack.c.h.bf16 %v5755_v60 }
 0x154   : > { %v1707_v63 = vld.sshfl [vmem:[#allocation1 + $0x10] sm:$0xff pattern:$0x75316420]  ;;  %v1708_v28 = vld.sshfl [vmem:[#allocation1 + $0x18] sm:$0xff pattern:$0x75316420] }
 0x155   : > { %v4451_v42 = vpack.i.bf16 %v1708_v28, %v1707_v63  ;;  %1714 = vst [vmem:[#allocation1 + $0x11] ss:$2 sm:$0xff] %v5860_v33 }
 0x156   : > { %1130 = vst [vmem:[#allocation2 + $0x2f0] sm:$0xf0] %v1088_v14  ;;  %v4283_v15 = vpop.permute.xlu0 %4282  ;;  %v4288_v14 = vpop.permute.xlu1 %4287 }
 0x157   : > { %4452 = vrot.lane.b32.xlu0 %v4451_v42, %s4929_s26  ;;  %4447 = vrot.lane.b32.xlu2 %v4446_v62, %s4929_s26  ;;  %1137 = vst [vmem:[#allocation2 + $0x300] sm:$0xf0] %v1095_v34  ;;  %v4284_v45 = vunpack.i.l.bf16 %v4283_v15  ;;  %v4285_v62 = vunpack.i.h.bf16 %v4283_v15  ;;  %v5900_v55 = vpop.permute.xlu2 %4302  ;;  %v4290_v24 = vunpack.i.h.bf16 %v4288_v14  ;;  %v4289_v28 = vunpack.i.l.bf16 %v4288_v14 }
 0x158   : > { %1704 = vst [vmem:[#allocation1 + $0x31] ss:$2 sm:$0xff] %v5870_v39  ;;  %v4304_v42 = vunpack.i.l.bf16 %v5900_v55 }
 0x159   : > { %1713 = vst [vmem:[#allocation1 + $0x1] ss:$2 sm:$0xff] %v5875_v35  ;;  %v1096_v30 = vsel %vm1076_vm4, %v4280_v3, %v4284_v45  ;;  %v1097_v60 = vsel %vm1076_vm4, %v4284_v45, %v4285_v62  ;;  %v1249_v8 = vsel %vm1248_vm5, %v4289_v28, %v4290_v24 }
 0x15a   : > { %1293 = vst [vmem:[#allocation2 + $0x430] sm:$0xf] %v1251_v4  ;;  %v1250_v4 = vsel %vm1248_vm5, %v4290_v24, %v4294_v13  ;;  %v1256_v0 = vsel %vm1248_vm5, %v4190_v36, %v4304_v42 }
 0x15b   : > { %1128 = vst [vmem:[#allocation2 + $0x4e0] sm:$0xf0] %v1086_v53  ;;  %v4305_v53 = vunpack.i.h.bf16 %v5900_v55 }
 0x15c   : > { %v1718_v54 = vld.sshfl [vmem:[#allocation1 + $0x10] sm:$0xff pattern:$0x75316420]  ;;  %v1719_v31 = vld.sshfl [vmem:[#allocation1 + $0x18] sm:$0xff pattern:$0x75316420] }
 0x15d   : > { %v4471_v10 = vpack.i.bf16 %v1719_v31, %v1718_v54  ;;  %1860 = vst [vmem:[#allocation1 + $0x10] ss:$2 sm:$0xff] %v5810_v48  ;;  %v1257_v54 = vsel %vm1248_vm5, %v4304_v42, %v4305_v53 }
 0x15e   : > { %1126 = vst [vmem:[#allocation2 + $0x320] sm:$0xf0] %v1084_v49  ;;  %v4298_v3 = vpop.permute.xlu0 %4297  ;;  %v4313_v31 = vpop.permute.xlu1 %4312 }
 0x15f   : > { %4472 = vrot.lane.b32.xlu1 %v4471_v10, %s4929_s26  ;;  %v1711_v2 = vld.sshfl [vmem:[#allocation1 + $0x30] sm:$0xff pattern:$0x75316420]  ;;  %v1712_v18 = vld.sshfl [vmem:[#allocation1 + $0x38] sm:$0xff pattern:$0x75316420]  ;;  %v4300_v11 = vunpack.i.h.bf16 %v4298_v3  ;;  %v4299_v13 = vunpack.i.l.bf16 %v4298_v3  ;;  %v4314_v21 = vunpack.i.l.bf16 %v4313_v31 }
 0x160   : > { %v4461_v43 = vpack.i.bf16 %v1712_v18, %v1711_v2  ;;  %v1716_v19 = vld.sshfl [vmem:[#allocation1] sm:$0xff pattern:$0x75316420]  ;;  %v1717_v32 = vld.sshfl [vmem:[#allocation1 + $0x8] sm:$0xff pattern:$0x75316420]  ;;  %v4315_v2 = vunpack.i.h.bf16 %v4313_v31 }
 0x161   : > { %v4466_v52 = vpack.i.bf16 %v1717_v32, %v1716_v19  ;;  %1127 = vst [vmem:[#allocation2 + $0x130] sm:$0xf0] %v1085_v26  ;;  %v1254_v36 = vsel %vm1248_vm5, %v4300_v11, %v4189_v38  ;;  %v1252_v18 = vsel %vm1248_vm5, %v4295_v44, %v4299_v13 }
 0x162   : > { %4462 = vrot.lane.b32.xlu2 %v4461_v43, %s4929_s26  ;;  %1136 = vst [vmem:[#allocation2 + $0xe8] sm:$0xf0] %v1094_v25  ;;  %v1253_v25 = vsel %vm1248_vm5, %v4299_v13, %v4300_v11  ;;  %v4328_v43 = vpop.permute.xlu2 %4327  ;;  %v1262_v57 = vsel %vm1248_vm5, %v4315_v2, %v4209_v47  ;;  %v1261_v47 = vsel %vm1248_vm5, %v4314_v21, %v4315_v2 }
 0x163   : > { %4467 = vrot.lane.b32.xlu0 %v4466_v52, %s4929_s26  ;;  %1134 = vst [vmem:[#allocation2 + $0x2e0] sm:$0xf0] %v1092_v37  ;;  %v4330_v37 = vunpack.i.h.bf16 %v4328_v43 }
 0x164   : > { %v1867_v63 = vld.sshfl [vmem:[#allocation1 + $0x10] sm:$0xff pattern:$0x75316420]  ;;  %v1868_v41 = vld.sshfl [vmem:[#allocation1 + $0x18] sm:$0xff pattern:$0x75316420] }
 0x165   : > { %v4486_v34 = vpack.i.bf16 %v1868_v41, %v1867_v63  ;;  %1135 = vst [vmem:[#allocation2 + $0x368] sm:$0xf0] %v1093_v12  ;;  %v4329_v12 = vunpack.i.l.bf16 %v4328_v43 }
 0x166   : > { %1715 = vst [vmem:[#allocation1 + $0x21] ss:$2 sm:$0xff] %v1673_v16  ;;  %v4308_v38 = vpop.permute.xlu0 %4307  ;;  %v4323_v28 = vpop.permute.xlu1 %4322 }
 0x167   : > { %4487 = vrot.lane.b32.xlu1 %v4486_v34, %s4930_s27  ;;  %1858 = vst [vmem:[#allocation1] ss:$2 sm:$0xff] %v5741_v22  ;;  %v4309_v16 = vunpack.i.l.bf16 %v4308_v38  ;;  %v4310_v24 = vunpack.i.h.bf16 %v4308_v38  ;;  %v1269_v41 = vsel %vm1248_vm5, %v4329_v12, %v4330_v37  ;;  %v1835_v34 = vld [vmem:[%s4973_s17 + $0x2c] sm:$0xf] }
 0x168   : > { %1138 = vst [vmem:[#allocation2 + $0xd8] sm:$0xf0] %v1096_v30 }
 0x169   : > { %1139 = vst [vmem:[#allocation2 + $0x1b8] sm:$0xf0] %v1097_v60  ;;  %v1258_v30 = vsel %vm1248_vm5, %v4305_v53, %v4309_v16  ;;  %v1259_v60 = vsel %vm1248_vm5, %v4309_v16, %v4310_v24  ;;  %v1260_v11 = vsel %vm1248_vm5, %v4310_v24, %v4314_v21 }
 0x16a   : > { %1292 = vst [vmem:[#allocation2 + $0x258] sm:$0xf] %v1250_v4  ;;  %v4343_v42 = vpop.permute.xlu2 %4342  ;;  %v1846_v4 = vunpack.c.l.bf16 %v1835_v34 }
 0x16b   : > { %1291 = vst [vmem:[#allocation2 + $0x5c8] sm:$0xf] %v1249_v8  ;;  %v4325_v8 = vunpack.i.h.bf16 %v4323_v28  ;;  %v4344_v53 = vunpack.i.l.bf16 %v4343_v42 }
 0x16c   : > { %1298 = vst [vmem:[#allocation2 + $0x120] sm:$0xf] %v1256_v0 }
 0x16d   : > { %v1720_v49 = vld.sshfl [vmem:[#allocation1 + $0x20] sm:$0xff pattern:$0x75316420]  ;;  %v1721_v40 = vld.sshfl [vmem:[#allocation1 + $0x28] sm:$0xff pattern:$0x75316420] }
 0x16e   : > { %v4476_v7 = vpack.i.bf16 %v1721_v40, %v1720_v49  ;;  %v1865_v10 = vld.sshfl [vmem:[#allocation1] sm:$0xff pattern:$0x75316420]  ;;  %v1866_v26 = vld.sshfl [vmem:[#allocation1 + $0x8] sm:$0xff pattern:$0x75316420]  ;;  %v4324_v49 = vunpack.i.l.bf16 %v4323_v28  ;;  %v4345_v40 = vunpack.i.h.bf16 %v4343_v42 }
 0x16f   : > { %v4481_v15 = vpack.i.bf16 %v1866_v26, %v1865_v10  ;;  %1873 = vst [vmem:[#allocation1] ss:$2 sm:$0xff] %v5838_v1  ;;  %v1268_v26 = vsel %vm1248_vm5, %v4325_v8, %v4329_v12 }
 0x170   : > { %4477 = vrot.lane.b32.xlu2 %v4476_v7, %s4929_s26  ;;  %1299 = vst [vmem:[#allocation2 + $0x4b0] sm:$0xf] %v1257_v54  ;;  %v1267_v10 = vsel %vm1248_vm5, %v4324_v49, %v4325_v8 }
 0x171   : > { %4482 = vrot.lane.b32.xlu0 %v4481_v15, %s4930_s27  ;;  %1862 = vst [vmem:[#allocation1 + $0x20] ss:$2 sm:$0xff] %v5784_v46  ;;  %v4338_v15 = vpop.permute.xlu1 %4337 }
 0x172   : > { %1864 = vst [vmem:[#allocation1 + $0x30] ss:$2 sm:$0xff] %v5767_v51  ;;  %v5952_v38 = vpop.permute.xlu2 %4352 }
 0x173   : > { %1296 = vst [vmem:[#allocation2 + $0x1f8] sm:$0xf] %v1254_v36  ;;  %v4355_v37 = vunpack.i.h.bf16 %v5952_v38 }
 0x174   : > { %1294 = vst [vmem:[#allocation2 + $0x480] sm:$0xf] %v1252_v18  ;;  %v1427_v18 = vsel %vm1421_vm6, %v4345_v40, %v4229_v27 }
 0x175   : > { %1295 = vst [vmem:[#allocation2 + $0x90] sm:$0xf] %v1253_v25  ;;  %v4318_v25 = vpop.permute.xlu0 %4317 }
 0x176   : > { %v1877_v19 = vld.sshfl [vmem:[#allocation1] sm:$0xff pattern:$0x75316420]  ;;  %v1878_v32 = vld.sshfl [vmem:[#allocation1 + $0x8] sm:$0xff pattern:$0x75316420] }
 0x177   : > { %v4501_v52 = vpack.i.bf16 %v1878_v32, %v1877_v19  ;;  %1304 = vst [vmem:[#allocation2 + $0x10] sm:$0xf] %v1262_v57  ;;  %v1426_v57 = vsel %vm1421_vm6, %v4344_v53, %v4345_v40  ;;  %v4340_v19 = vunpack.i.h.bf16 %v4338_v15  ;;  %v4339_v32 = vunpack.i.l.bf16 %v4338_v15 }
 0x178   : > { %v1869_v44 = vld.sshfl [vmem:[#allocation1 + $0x20] sm:$0xff pattern:$0x75316420]  ;;  %v1870_v45 = vld.sshfl [vmem:[#allocation1 + $0x28] sm:$0xff pattern:$0x75316420] }
 0x179   : > { %4502 = vrot.lane.b32.xlu1 %v4501_v52, %s4930_s27  ;;  %v4491_v62 = vpack.i.bf16 %v1870_v45, %v1869_v44  ;;  %v1871_v14 = vld.sshfl [vmem:[#allocation1 + $0x30] sm:$0xff pattern:$0x75316420]  ;;  %v1872_v55 = vld.sshfl [vmem:[#allocation1 + $0x38] sm:$0xff pattern:$0x75316420]  ;;  %v4354_v52 = vunpack.i.l.bf16 %v5952_v38  ;;  %v4320_v44 = vunpack.i.h.bf16 %v4318_v25  ;;  %v1424_v12 = vsel %vm1421_vm6, %v4339_v32, %v4340_v19  ;;  %v4348_v24 = vpop.permute.xlu1 %4347 }
 0x17a   : > { %v4496_v63 = vpack.i.bf16 %v1872_v55, %v1871_v14  ;;  %1876 = vst [vmem:[#allocation1 + $0x30] ss:$2 sm:$0xff] %v5870_v39  ;;  %v1425_v16 = vsel %vm1421_vm6, %v4340_v19, %v4344_v53  ;;  %v4319_v55 = vunpack.i.l.bf16 %v4318_v25 }
 0x17b   : > { %4492 = vrot.lane.b32.xlu2 %v4491_v62, %s4930_s27  ;;  %1875 = vst [vmem:[#allocation1 + $0x20] ss:$2 sm:$0xff] %v5824_v9  ;;  %v1432_v62 = vsel %vm1421_vm6, %v4354_v52, %v4355_v37  ;;  %v1266_v14 = vsel %vm1248_vm5, %v4320_v44, %v4324_v49  ;;  %v4350_v49 = vunpack.i.h.bf16 %v4348_v24 }
 0x17c   : > { %4497 = vrot.lane.b32.xlu0 %v4496_v63, %s4930_s27  ;;  %1303 = vst [vmem:[#allocation2 + $0xe0] sm:$0xf] %v1261_v47  ;;  %v1264_v28 = vsel %vm1248_vm5, %v4210_v5, %v4319_v55  ;;  %v5974_v5 = vpop.permute.xlu2 %4362 }
 0x17d   : > { %1311 = vst [vmem:[#allocation2 + $0x40] sm:$0xf] %v1269_v41  ;;  %v4333_v47 = vpop.permute.xlu0 %4332 }
 0x17e   : > { %1874 = vst [vmem:[#allocation1 + $0x10] ss:$2 sm:$0xff] %v5841_v50  ;;  %v4335_v34 = vunpack.i.h.bf16 %v4333_v47  ;;  %v4334_v8 = vunpack.i.l.bf16 %v4333_v47 }
 0x17f   : > { %1300 = vst [vmem:[#allocation2 + $0x308] sm:$0xf] %v1258_v30 }
 0x180   : > { %1301 = vst [vmem:[#allocation2 + $0x1e0] sm:$0xf] %v1259_v60  ;;  %v1423_v23 = vsel %vm1421_vm6, %v4335_v34, %v4339_v32 }
 0x181   : > { %v1883_v0 = vld.sshfl [vmem:[#allocation1 + $0x30] sm:$0xff pattern:$0x75316420]  ;;  %v1884_v3 = vld.sshfl [vmem:[#allocation1 + $0x38] sm:$0xff pattern:$0x75316420] }
 0x182   : > { %v4516_v54 = vpack.i.bf16 %v1884_v3, %v1883_v0  ;;  %v1881_v13 = vld.sshfl [vmem:[#allocation1 + $0x20] sm:$0xff pattern:$0x75316420]  ;;  %v1882_v31 = vld.sshfl [vmem:[#allocation1 + $0x28] sm:$0xff pattern:$0x75316420] }
 0x183   : > { %v4511_v7 = vpack.i.bf16 %v1882_v31, %v1881_v13  ;;  %1887 = vst [vmem:[#allocation1 + $0x20] ss:$2 sm:$0xff] %v1846_v4  ;;  %v1265_v4 = vsel %vm1248_vm5, %v4319_v55, %v4320_v44  ;;  %v1422_v13 = vsel %vm1421_vm6, %v4334_v8, %v4335_v34  ;;  %v1431_v31 = vsel %vm1421_vm6, %v4350_v49, %v4354_v52 }
 0x184   : > { %4517 = vrot.lane.b32.xlu1 %v4516_v54, %s4930_s27  ;;  %1302 = vst [vmem:[#allocation2 + $0x250] sm:$0xf] %v1260_v11  ;;  %v4349_v54 = vunpack.i.l.bf16 %v4348_v24  ;;  %v5992_v52 = vpop.permute.xlu2 %4377 }
 0x185   : > { %v1879_v36 = vld.sshfl [vmem:[#allocation1 + $0x10] sm:$0xff pattern:$0x75316420]  ;;  %v1880_v2 = vld.sshfl [vmem:[#allocation1 + $0x18] sm:$0xff pattern:$0x75316420]  ;;  %4512 = vrot.lane.b32.xlu0 %v4511_v7, %s4930_s27  ;;  %v4364_v7 = vunpack.i.l.bf16 %v5974_v5  ;;  %v4358_v15 = vpop.permute.xlu0 %4357  ;;  %v4380_v38 = vunpack.i.h.bf16 %v5992_v52 }
 0x186   : > { %v4506_v43 = vpack.i.bf16 %v1880_v2, %v1879_v36  ;;  %1309 = vst [vmem:[#allocation2 + $0x338] sm:$0xf] %v1267_v10  ;;  %v1429_v53 = vsel %vm1421_vm6, %v4230_v17, %v4349_v54  ;;  %v1430_v10 = vsel %vm1421_vm6, %v4349_v54, %v4350_v49  ;;  %v4360_v2 = vunpack.i.h.bf16 %v4358_v15 }
 0x187   : > { %1310 = vst [vmem:[#allocation2 + $0x358] sm:$0xf] %v1268_v26  ;;  %v4365_v26 = vunpack.i.h.bf16 %v5974_v5  ;;  %v1437_v36 = vsel %vm1421_vm6, %v4250_v59, %v4364_v7  ;;  %v4359_v25 = vunpack.i.l.bf16 %v4358_v15 }
 0x188   : > { %4507 = vrot.lane.b32.xlu2 %v4506_v43, %s4930_s27  ;;  %1469 = vst [vmem:[#allocation2 + $0x1f8] sm:$0xf0] %v1427_v18  ;;  %v4373_v43 = vpop.permute.xlu1 %4372  ;;  %v1435_v59 = vsel %vm1421_vm6, %v4360_v2, %v4249_v56  ;;  %v4379_v56 = vunpack.i.l.bf16 %v5992_v52 }
 0x189   : > { %1468 = vst [vmem:[#allocation2 + $0x90] sm:$0xf0] %v1426_v57  ;;  %v1438_v17 = vsel %vm1421_vm6, %v4364_v7, %v4365_v26  ;;  %v4374_v44 = vunpack.i.l.bf16 %v4373_v43 }
 0x18a   : > { %v1892_v21 = vld.sshfl [vmem:[#allocation1 + $0x20] sm:$0xff pattern:$0x75316420]  ;;  %v1893_v27 = vld.sshfl [vmem:[#allocation1 + $0x28] sm:$0xff pattern:$0x75316420] }
 0x18b   : > { %v4531_v45 = vpack.i.bf16 %v1893_v27, %v1892_v21  ;;  %1886 = vst [vmem:[#allocation1 + $0x10] ss:$2 sm:$0xff] %v5860_v33  ;;  %v4375_v27 = vunpack.i.h.bf16 %v4373_v43 }
 0x18c   : > { %2035 = vst [vmem:[#allocation1 + $0x21] ss:$2 sm:$0xff] %v5784_v46 }
 0x18d   : > { %4532 = vrot.lane.b32.xlu1 %v4531_v45, %s4930_s27  ;;  %1885 = vst [vmem:[#allocation1] ss:$2 sm:$0xff] %v5875_v35  ;;  %v1433_v45 = vsel %vm1421_vm6, %v4355_v37, %v4359_v25  ;;  %v1442_v61 = vsel %vm1421_vm6, %v4374_v44, %v4375_v27 }
 0x18e   : > { %1466 = vst [vmem:[#allocation2 + $0x430] sm:$0xf0] %v1424_v12  ;;  %v1434_v12 = vsel %vm1421_vm6, %v4359_v25, %v4360_v2 }
 0x18f   : > { %1467 = vst [vmem:[#allocation2 + $0x480] sm:$0xf0] %v1425_v16  ;;  %v4368_v16 = vpop.permute.xlu0 %4367 }
 0x190   : > { %1474 = vst [vmem:[#allocation2 + $0x1e0] sm:$0xf0] %v1432_v62  ;;  %v4369_v37 = vunpack.i.l.bf16 %v4368_v16  ;;  %v4388_v8 = vpop.permute.xlu1 %4387 }
 0x191   : > { %1308 = vst [vmem:[#allocation2 + $0x5c0] sm:$0xf] %v1266_v14 }
 0x192   : > { %v1890_v63 = vld.sshfl [vmem:[#allocation1 + $0x10] sm:$0xff pattern:$0x75316420]  ;;  %v1891_v41 = vld.sshfl [vmem:[#allocation1 + $0x18] sm:$0xff pattern:$0x75316420] }
 0x193   : > { %v4526_v30 = vpack.i.bf16 %v1891_v41, %v1890_v63  ;;  %v2042_v42 = vld.sshfl [vmem:[#allocation1 + $0x20] sm:$0xff pattern:$0x75316420]  ;;  %v2043_v60 = vld.sshfl [vmem:[#allocation1 + $0x28] sm:$0xff pattern:$0x75316420]  ;;  %v1594_v63 = vsel %vm1593_vm7, %v4379_v56, %v4380_v38  ;;  %v4370_v41 = vunpack.i.h.bf16 %v4368_v16 }
 0x194   : > { %v4546_v0 = vpack.i.bf16 %v2043_v60, %v2042_v42  ;;  %v1888_v3 = vld.sshfl [vmem:[#allocation1] sm:$0xff pattern:$0x75316420]  ;;  %v1889_v11 = vld.sshfl [vmem:[#allocation1 + $0x8] sm:$0xff pattern:$0x75316420]  ;;  %v6010_v42 = vpop.permute.xlu2 %4407 }
 0x195   : > { %4527 = vrot.lane.b32.xlu0 %v4526_v30, %s4930_s27  ;;  %v4521_v40 = vpack.i.bf16 %v1889_v11, %v1888_v3  ;;  %1306 = vst [vmem:[#allocation2 + $0x60] sm:$0xf] %v1264_v28  ;;  %v1441_v3 = vsel %vm1421_vm6, %v4370_v41, %v4374_v44  ;;  %v4390_v11 = vunpack.i.h.bf16 %v4388_v8  ;;  %v4410_v49 = vunpack.i.h.bf16 %v6010_v42 }
 0x196   : > { %4547 = vrot.lane.b32.xlu1 %v4546_v0, %s4931_s28  ;;  %1307 = vst [vmem:[#allocation2 + $0x410] sm:$0xf] %v1265_v4  ;;  %v1439_v4 = vsel %vm1421_vm6, %v4365_v26, %v4369_v37  ;;  %v1440_v0 = vsel %vm1421_vm6, %v4369_v37, %v4370_v41 }
 0x197   : > { %4522 = vrot.lane.b32.xlu2 %v4521_v40, %s4930_s27  ;;  %2033 = vst [vmem:[#allocation1 + $0x11] ss:$2 sm:$0xff] %v5810_v48  ;;  %v4383_v7 = vpop.permute.xlu0 %4382 }
 0x198   : > { %2031 = vst [vmem:[#allocation1 + $0x1] ss:$2 sm:$0xff] %v5741_v22  ;;  %v4385_v43 = vunpack.i.h.bf16 %v4383_v7 }
 0x199   : > { %1465 = vst [vmem:[#allocation2 + $0x258] sm:$0xf0] %v1423_v23  ;;  %v4389_v23 = vunpack.i.l.bf16 %v4388_v8 }
 0x19a   : > { %1464 = vst [vmem:[#allocation2 + $0x5c8] sm:$0xf0] %v1422_v13  ;;  %v1599_v13 = vsel %vm1593_vm7, %v4390_v11, %v4269_v6 }
 0x19b   : > { %1473 = vst [vmem:[#allocation2 + $0x308] sm:$0xf0] %v1431_v31  ;;  %v4409_v31 = vunpack.i.l.bf16 %v6010_v42  ;;  %v1598_v15 = vsel %vm1593_vm7, %v4389_v23, %v4390_v11  ;;  %v1597_v44 = vsel %vm1593_vm7, %v4385_v43, %v4389_v23 }
 0x19c   : > { %1471 = vst [vmem:[#allocation2 + $0x120] sm:$0xf0] %v1429_v53  ;;  %v2007_v53 = vld [vmem:[%s4973_s17 + $0x2c] sm:$0xf] }
 0x19d   : > { %1472 = vst [vmem:[#allocation2 + $0x4b0] sm:$0xf0] %v1430_v10  ;;  %v2018_v25 = vunpack.c.l.bf16 %v2007_v53 }
 0x19e   : > { %v2040_v18 = vld.sshfl [vmem:[#allocation1 + $0x10] sm:$0xff pattern:$0x75316420]  ;;  %v2041_v29 = vld.sshfl [vmem:[#allocation1 + $0x18] sm:$0xff pattern:$0x75316420] }
 0x19f   : > { %v4541_v57 = vpack.i.bf16 %v2041_v29, %v2040_v18  ;;  %2047 = vst [vmem:[#allocation1 + $0x11] ss:$2 sm:$0xff] %v5841_v50  ;;  %v2038_v19 = vld.sshfl [vmem:[#allocation1] sm:$0xff pattern:$0x75316420]  ;;  %v4393_v16 = vpop.permute.xlu0 %4392 }
 0x1a0   : > { %v2039_v32 = vld.sshfl [vmem:[#allocation1 + $0x8] sm:$0xff pattern:$0x75316420]  ;;  %1479 = vst [vmem:[#allocation2 + $0x60] sm:$0xf0] %v1437_v36  ;;  %v6028_v36 = vpop.permute.xlu2 %4417  ;;  %v4395_v41 = vunpack.i.h.bf16 %v4393_v16 }
 0x1a1   : > { %4542 = vrot.lane.b32.xlu0 %v4541_v57, %s4931_s28  ;;  %v4536_v21 = vpack.i.bf16 %v2039_v32, %v2038_v19  ;;  %1480 = vst [vmem:[#allocation2 + $0x410] sm:$0xf0] %v1438_v17  ;;  %v4384_v17 = vunpack.i.l.bf16 %v4383_v7  ;;  %v4403_v57 = vpop.permute.xlu1 %4402  ;;  %v4420_v56 = vunpack.i.h.bf16 %v6028_v36 }
 0x1a2   : > { %2037 = vst [vmem:[#allocation1 + $0x31] ss:$2 sm:$0xff] %v5767_v51 }
 0x1a3   : > { %4537 = vrot.lane.b32.xlu2 %v4536_v21, %s4931_s28  ;;  %2046 = vst [vmem:[#allocation1 + $0x1] ss:$2 sm:$0xff] %v5838_v1  ;;  %v1595_v52 = vsel %vm1593_vm7, %v4380_v38, %v4384_v17  ;;  %v4405_v21 = vunpack.i.h.bf16 %v4403_v57  ;;  %v1596_v27 = vsel %vm1593_vm7, %v4384_v17, %v4385_v43 }
 0x1a4   : > { %1477 = vst [vmem:[#allocation2 + $0x10] sm:$0xf0] %v1435_v59 }
 0x1a5   : > { %1475 = vst [vmem:[#allocation2 + $0x250] sm:$0xf0] %v1433_v45  ;;  %v4404_v45 = vunpack.i.l.bf16 %v4403_v57 }
 0x1a6   : > { %v2052_v62 = vld.sshfl [vmem:[#allocation1 + $0x10] sm:$0xff pattern:$0x75316420]  ;;  %v2053_v14 = vld.sshfl [vmem:[#allocation1 + $0x18] sm:$0xff pattern:$0x75316420] }
 0x1a7   : > { %v4561_v55 = vpack.i.bf16 %v2053_v14, %v2052_v62  ;;  %1476 = vst [vmem:[#allocation2 + $0xe0] sm:$0xf0] %v1434_v12  ;;  %v1604_v12 = vsel %vm1593_vm7, %v4404_v45, %v4405_v21  ;;  %v1603_v11 = vsel %vm1593_vm7, %v4395_v41, %v4404_v45  ;;  %v4398_v23 = vpop.permute.xlu0 %4397 }
 0x1a8   : > { %1484 = vst [vmem:[#allocation2 + $0x40] sm:$0xf0] %v1442_v61 }
 0x1a9   : > { %4562 = vrot.lane.b32.xlu1 %v4561_v55, %s4931_s28  ;;  %v2044_v47 = vld.sshfl [vmem:[#allocation1 + $0x30] sm:$0xff pattern:$0x75316420]  ;;  %v2045_v24 = vld.sshfl [vmem:[#allocation1 + $0x38] sm:$0xff pattern:$0x75316420]  ;;  %v6043_v61 = vpop.permute.xlu2 %4432  ;;  %v4413_v8 = vpop.permute.xlu1 %4412 }
 0x1aa   : > { %v4551_v28 = vpack.i.bf16 %v2045_v24, %v2044_v47  ;;  %v2050_v34 = vld.sshfl [vmem:[#allocation1] sm:$0xff pattern:$0x75316420]  ;;  %v2051_v30 = vld.sshfl [vmem:[#allocation1 + $0x8] sm:$0xff pattern:$0x75316420]  ;;  %v4435_v38 = vunpack.i.h.bf16 %v6043_v61  ;;  %v4434_v37 = vunpack.i.l.bf16 %v6043_v61 }
 0x1ab   : > { %v4556_v60 = vpack.i.bf16 %v2051_v30, %v2050_v34  ;;  %2058 = vst [vmem:[#allocation1 + $0x1] ss:$2 sm:$0xff] %v5875_v35 }
 0x1ac   : > { %4552 = vrot.lane.b32.xlu2 %v4551_v28, %s4931_s28  ;;  %1636 = vst [vmem:[#allocation2 + $0x528] sm:$0xf] %v1594_v63  ;;  %v1605_v63 = vsel %vm1593_vm7, %v4405_v21, %v4409_v31 }
 0x1ad   : > { %4557 = vrot.lane.b32.xlu0 %v4556_v60, %s4931_s28  ;;  %2048 = vst [vmem:[#allocation1 + $0x21] ss:$2 sm:$0xff] %v5824_v9 }
 0x1ae   : > { %2049 = vst [vmem:[#allocation1 + $0x31] ss:$2 sm:$0xff] %v5870_v39 }
 0x1af   : > { %1481 = vst [vmem:[#allocation2 + $0x5c0] sm:$0xf0] %v1439_v4  ;;  %v4394_v4 = vunpack.i.l.bf16 %v4393_v16 }
 0x1b0   : > { %1482 = vst [vmem:[#allocation2 + $0x338] sm:$0xf0] %v1440_v0 }
 0x1b1   : > { %1483 = vst [vmem:[#allocation2 + $0x358] sm:$0xf0] %v1441_v3  ;;  %v1769_v3 = vsel %vm1766_vm8, %v4434_v37, %v4435_v38 }
 0x1b2   : > { %v2061_v40 = vld.sshfl [vmem:[#allocation1] sm:$0xff pattern:$0x75316420]  ;;  %v2062_v54 = vld.sshfl [vmem:[#allocation1 + $0x8] sm:$0xff pattern:$0x75316420] }
 0x1b3   : > { %v4576_v5 = vpack.i.bf16 %v2062_v54, %v2061_v40  ;;  %2203 = vst [vmem:[#allocation1] ss:$2 sm:$0xff] %v5741_v22  ;;  %v1606_v22 = vsel %vm1593_vm7, %v4409_v31, %v4410_v49  ;;  %v1601_v40 = vsel %vm1593_vm7, %v4270_v20, %v4394_v4  ;;  %v1602_v54 = vsel %vm1593_vm7, %v4394_v4, %v4395_v41  ;;  %v4428_v20 = vpop.permute.xlu1 %4427  ;;  %v2180_v41 = vld [vmem:[%s4973_s17 + $0x2c] sm:$0xf] }
 0x1b4   : > { %v2054_v10 = vld.sshfl [vmem:[#allocation1 + $0x20] sm:$0xff pattern:$0x75316420]  ;;  %v2055_v26 = vld.sshfl [vmem:[#allocation1 + $0x28] sm:$0xff pattern:$0x75316420]  ;;  %v4414_v31 = vunpack.i.l.bf16 %v4413_v8  ;;  %v4429_v43 = vunpack.i.l.bf16 %v4428_v20 }
 0x1b5   : > { %4577 = vrot.lane.b32.xlu1 %v4576_v5, %s4931_s28  ;;  %v4566_v2 = vpack.i.bf16 %v2055_v26, %v2054_v10  ;;  %v2056_v18 = vld.sshfl [vmem:[#allocation1 + $0x30] sm:$0xff pattern:$0x75316420]  ;;  %v2057_v29 = vld.sshfl [vmem:[#allocation1 + $0x38] sm:$0xff pattern:$0x75316420] }
 0x1b6   : > { %v4571_v6 = vpack.i.bf16 %v2057_v29, %v2056_v18  ;;  %1641 = vst [vmem:[#allocation2 + $0x1c8] sm:$0xf] %v1599_v13  ;;  %v4430_v18 = vunpack.i.h.bf16 %v4428_v20  ;;  %v6075_v29 = vpop.permute.xlu2 %4447 }
 0x1b7   : > { %4567 = vrot.lane.b32.xlu2 %v4566_v2, %s4931_s28  ;;  %1640 = vst [vmem:[#allocation2 + $0x2c0] sm:$0xf] %v1598_v15  ;;  %v4400_v15 = vunpack.i.h.bf16 %v4398_v23  ;;  %v4449_v42 = vunpack.i.l.bf16 %v6075_v29 }
 0x1b8   : > { %4572 = vrot.lane.b32.xlu0 %v4571_v6, %s4931_s28  ;;  %1648 = vst [vmem:[#allocation2 + $0x50] sm:$0xf] %v1606_v22 }
 0x1b9   : > { %2059 = vst [vmem:[#allocation1 + $0x11] ss:$2 sm:$0xff] %v5860_v33 }
 0x1ba   : > { %v2210_v19 = vld.sshfl [vmem:[#allocation1] sm:$0xff pattern:$0x75316420]  ;;  %v2211_v32 = vld.sshfl [vmem:[#allocation1 + $0x8] sm:$0xff pattern:$0x75316420] }
 0x1bb   : > { %v4591_v59 = vpack.i.bf16 %v2211_v32, %v2210_v19  ;;  %2060 = vst [vmem:[#allocation1 + $0x21] ss:$2 sm:$0xff] %v2018_v25  ;;  %v1609_v25 = vsel %vm1593_vm7, %v4400_v15, %v4414_v31  ;;  %v1768_v19 = vsel %vm1766_vm8, %v4430_v18, %v4434_v37 }
 0x1bc   : > { %2209 = vst [vmem:[#allocation1 + $0x30] ss:$2 sm:$0xff] %v5767_v51  ;;  %v4419_v51 = vunpack.i.l.bf16 %v6028_v36 }
 0x1bd   : > { %4592 = vrot.lane.b32.xlu1 %v4591_v59, %s4932_s29  ;;  %1637 = vst [vmem:[#allocation2 + $0x1e8] sm:$0xf] %v1595_v52 }
 0x1be   : > { %1638 = vst [vmem:[#allocation2 + $0x398] sm:$0xf] %v1596_v27  ;;  %v1612_v60 = vsel %vm1593_vm7, %v4419_v51, %v4420_v56 }
 0x1bf   : > { %1639 = vst [vmem:[#allocation2 + $0x458] sm:$0xf] %v1597_v44  ;;  %v4443_v44 = vpop.permute.xlu1 %4442 }
 0x1c0   : > { %v2063_v62 = vld.sshfl [vmem:[#allocation1 + $0x10] sm:$0xff pattern:$0x75316420]  ;;  %v2064_v14 = vld.sshfl [vmem:[#allocation1 + $0x18] sm:$0xff pattern:$0x75316420]  ;;  %v4444_v37 = vunpack.i.l.bf16 %v4443_v44 }
 0x1c1   : > { %v4581_v55 = vpack.i.bf16 %v2064_v14, %v2063_v62  ;;  %1646 = vst [vmem:[#allocation2 + $0x270] sm:$0xf] %v1604_v12  ;;  %v2347_v62 = vld [vmem:[%s4973_s17 + $0x4] sm:$0xff] }
 0x1c2   : > { %v2065_v47 = vld.sshfl [vmem:[#allocation1 + $0x20] sm:$0xff pattern:$0x75316420]  ;;  %v2066_v24 = vld.sshfl [vmem:[#allocation1 + $0x28] sm:$0xff pattern:$0x75316420] }
 0x1c3   : > { %4582 = vrot.lane.b32.xlu2 %v4581_v55, %s4931_s28  ;;  %v4586_v28 = vpack.i.bf16 %v2066_v24, %v2065_v47  ;;  %v2216_v34 = vld.sshfl [vmem:[#allocation1 + $0x30] sm:$0xff pattern:$0x75316420]  ;;  %v2217_v30 = vld.sshfl [vmem:[#allocation1 + $0x38] sm:$0xff pattern:$0x75316420]  ;;  %v4445_v55 = vunpack.i.h.bf16 %v4443_v44  ;;  %v6099_v24 = vunpack.c.h.bf16 %v2347_v62 }
 0x1c4   : > { %v4606_v0 = vpack.i.bf16 %v2217_v30, %v2216_v34  ;;  %2207 = vst [vmem:[#allocation1 + $0x20] ss:$2 sm:$0xff] %v5784_v46  ;;  %v4415_v46 = vunpack.i.h.bf16 %v4413_v8 }
 0x1c5   : > { %4587 = vrot.lane.b32.xlu0 %v4586_v28, %s4931_s28  ;;  %1647 = vst [vmem:[#allocation2 + $0x20] sm:$0xf] %v1605_v63  ;;  %v1773_v36 = vsel %vm1766_vm8, %v4444_v37, %v4445_v55 }
 0x1c6   : > { %4607 = vrot.lane.b32.xlu1 %v4606_v0, %s4932_s29  ;;  %1654 = vst [vmem:[#allocation2 + $0x530] sm:$0xf] %v1612_v60  ;;  %v1611_v7 = vsel %vm1593_vm7, %v4415_v46, %v4419_v51  ;;  %v1610_v58 = vsel %vm1593_vm7, %v4414_v31, %v4415_v46  ;;  %v1774_v60 = vsel %vm1766_vm8, %v4445_v55, %v4449_v42  ;;  %v2191_v0 = vunpack.c.l.bf16 %v2180_v41  ;;  %v2351_v41 = vld [vmem:[%s4973_s17 + $0x24] sm:$0xff] }
 0x1c7   : > { %2205 = vst [vmem:[#allocation1 + $0x10] ss:$2 sm:$0xff] %v5810_v48  ;;  %v4399_v48 = vunpack.i.l.bf16 %v4398_v23 }
 0x1c8   : > { %1811 = vst [vmem:[#allocation2 + $0x398] sm:$0xf0] %v1769_v3 }
 0x1c9   : > { %1645 = vst [vmem:[#allocation2 + $0x460] sm:$0xf] %v1603_v11  ;;  %v1608_v22 = vsel %vm1593_vm7, %v4399_v48, %v4400_v15  ;;  %v4458_v11 = vpop.permute.xlu1 %4457 }
 0x1ca   : > { %1643 = vst [vmem:[#allocation2 + $0xf0] sm:$0xf] %v1601_v40  ;;  %v4460_v31 = vunpack.i.h.bf16 %v4458_v11 }
 0x1cb   : > { %v2214_v5 = vld.sshfl [vmem:[#allocation1 + $0x20] sm:$0xff pattern:$0x75316420]  ;;  %v2215_v13 = vld.sshfl [vmem:[#allocation1 + $0x28] sm:$0xff pattern:$0x75316420] }
 0x1cc   : > { %v4601_v53 = vpack.i.bf16 %v2215_v13, %v2214_v5  ;;  %2220 = vst [vmem:[#allocation1 + $0x20] ss:$2 sm:$0xff] %v5824_v9  ;;  %v1607_v9 = vsel %vm1593_vm7, %v4410_v49, %v4399_v48  ;;  %v4423_v49 = vpop.permute.xlu0 %4422  ;;  %v6112_v13 = vunpack.c.l.bf16 %v2347_v62 }
 0x1cd   : > { %1644 = vst [vmem:[#allocation2 + $0x498] sm:$0xf] %v1602_v54  ;;  %v4424_v32 = vunpack.i.l.bf16 %v4423_v49  ;;  %v4425_v27 = vunpack.i.h.bf16 %v4423_v49 }
 0x1ce   : > { %v2212_v10 = vld.sshfl [vmem:[#allocation1 + $0x10] sm:$0xff pattern:$0x75316420]  ;;  %v2213_v26 = vld.sshfl [vmem:[#allocation1 + $0x18] sm:$0xff pattern:$0x75316420]  ;;  %4602 = vrot.lane.b32.xlu0 %v4601_v53, %s4932_s29  ;;  %v4459_v53 = vunpack.i.l.bf16 %v4458_v11  ;;  %v6181_v11 = vunpack.c.l.bf16 %v2351_v41 }
 0x1cf   : > { %v4596_v2 = vpack.i.bf16 %v2213_v26, %v2212_v10  ;;  %1653 = vst [vmem:[#allocation2 + $0x170] sm:$0xf] %v1611_v7  ;;  %v1613_v51 = vsel %vm1593_vm7, %v4420_v56, %v4424_v32  ;;  %v1614_v47 = vsel %vm1593_vm7, %v4424_v32, %v4425_v27 }
 0x1d0   : > { %1652 = vst [vmem:[#allocation2 + $0x158] sm:$0xf] %v1610_v58 }
 0x1d1   : > { %4597 = vrot.lane.b32.xlu2 %v4596_v2, %s4932_s29  ;;  %2219 = vst [vmem:[#allocation1 + $0x10] ss:$2 sm:$0xff] %v5841_v50  ;;  %v4450_v50 = vunpack.i.h.bf16 %v6075_v29  ;;  %v6125_v2 = vld [vmem:[%s4973_s17 + $0x14] sm:$0xff]  ;;  %v6139_v32 = vpop.permute.xlu1 %4472 }
 0x1d2   : > { %2218 = vst [vmem:[#allocation1] ss:$2 sm:$0xff] %v5838_v1  ;;  %v1767_v1 = vsel %vm1766_vm8, %v4429_v43, %v4430_v18  ;;  %v1779_v18 = vsel %vm1766_vm8, %v4459_v53, %v4460_v31 }
 0x1d3   : > { %v2226_v6 = vld.sshfl [vmem:[#allocation1 + $0x20] sm:$0xff pattern:$0x75316420]  ;;  %v2227_v17 = vld.sshfl [vmem:[#allocation1 + $0x28] sm:$0xff pattern:$0x75316420]  ;;  %v1775_v59 = vsel %vm1766_vm8, %v4449_v42, %v4450_v50 }
 0x1d4   : > { %v4621_v57 = vpack.i.bf16 %v2227_v17, %v2226_v6  ;;  %1649 = vst [vmem:[#allocation2 + $0x3f8] sm:$0xf] %v1607_v9  ;;  %v4438_v34 = vpop.permute.xlu0 %4437  ;;  %v2348_v6 = vld [vmem:[%s4973_s17 + $0xc] sm:$0xff]  ;;  %v6134_v17 = vunpack.c.l.bf16 %v6125_v2 }
 0x1d5   : > { %1650 = vst [vmem:[#allocation2 + $0x5d0] sm:$0xf] %v1608_v22  ;;  %v4439_v3 = vunpack.i.l.bf16 %v4438_v34  ;;  %v4440_v23 = vunpack.i.h.bf16 %v4438_v34  ;;  %v6137_v49 = vunpack.c.l.bf16 %v2348_v6 }
 0x1d6   : > { %4622 = vrot.lane.b32.xlu1 %v4621_v57, %s4932_s29  ;;  %1651 = vst [vmem:[#allocation2 + $0x5d8] sm:$0xf] %v1609_v25 }
 0x1d7   : > { %1810 = vst [vmem:[#allocation2 + $0x1e8] sm:$0xf0] %v1768_v19  ;;  %v1770_v7 = vsel %vm1766_vm8, %v4435_v38, %v4439_v3  ;;  %v1771_v20 = vsel %vm1766_vm8, %v4439_v3, %v4440_v23  ;;  %v1772_v15 = vsel %vm1766_vm8, %v4440_v23, %v4444_v37  ;;  %v6177_v3 = vunpack.c.h.bf16 %v6125_v2 }
 0x1d8   : > { %v2224_v52 = vld.sshfl [vmem:[#allocation1 + $0x10] sm:$0xff pattern:$0x75316420]  ;;  %v2225_v21 = vld.sshfl [vmem:[#allocation1 + $0x18] sm:$0xff pattern:$0x75316420] }
 0x1d9   : > { %v4616_v45 = vpack.i.bf16 %v2225_v21, %v2224_v52  ;;  %2231 = vst [vmem:[#allocation1 + $0x10] ss:$2 sm:$0xff] %v5860_v33  ;;  %v2222_v12 = vld.sshfl [vmem:[#allocation1] sm:$0xff pattern:$0x75316420]  ;;  %v6096_v33 = vpop.permute.xlu2 %4462 }
 0x1da   : > { %v2223_v16 = vld.sshfl [vmem:[#allocation1 + $0x8] sm:$0xff pattern:$0x75316420]  ;;  %1809 = vst [vmem:[#allocation2 + $0x528] sm:$0xf0] %v1767_v1  ;;  %v4465_v56 = vunpack.i.h.bf16 %v6096_v33  ;;  %v4464_v63 = vunpack.i.l.bf16 %v6096_v33 }
 0x1db   : > { %4617 = vrot.lane.b32.xlu0 %v4616_v45, %s4932_s29  ;;  %v4611_v14 = vpack.i.bf16 %v2223_v16, %v2222_v12  ;;  %1817 = vst [vmem:[#allocation2 + $0x498] sm:$0xf0] %v1775_v59  ;;  %v6141_v59 = vunpack.c.h.bf16 %v2348_v6  ;;  %v4475_v45 = vunpack.i.h.bf16 %v6139_v32  ;;  %v4474_v12 = vunpack.i.l.bf16 %v6139_v32 }
 0x1dc   : > { %2221 = vst [vmem:[#allocation1 + $0x30] ss:$2 sm:$0xff] %v5870_v39  ;;  %v1781_v8 = vsel %vm1766_vm8, %v4464_v63, %v4465_v56  ;;  %v4453_v9 = vpop.permute.xlu0 %4452  ;;  %v1780_v22 = vsel %vm1766_vm8, %v4460_v31, %v4464_v63 }
 0x1dd   : > { %4612 = vrot.lane.b32.xlu2 %v4611_v14, %s4932_s29  ;;  %2230 = vst [vmem:[#allocation1] ss:$2 sm:$0xff] %v5875_v35  ;;  %v4454_v57 = vunpack.i.l.bf16 %v4453_v9  ;;  %v4455_v1 = vunpack.i.h.bf16 %v4453_v9  ;;  %v2350_v14 = vld [vmem:[%s4973_s17 + $0x1c] sm:$0xff]  ;;  %v1785_v29 = vsel %vm1766_vm8, %v4474_v12, %v4475_v45 }
 0x1de   : > { %1655 = vst [vmem:[#allocation2 + $0x1d8] sm:$0xf] %v1613_v51  ;;  %v6161_v37 = vunpack.c.h.bf16 %v2350_v14  ;;  %v6164_v63 = vunpack.c.l.bf16 %v2350_v14 }
 0x1df   : > { %1656 = vst [vmem:[#allocation2 + $0xd0] sm:$0xf] %v1614_v47  ;;  %v1776_v44 = vsel %vm1766_vm8, %v4450_v50, %v4454_v57  ;;  %v1777_v16 = vsel %vm1766_vm8, %v4454_v57, %v4455_v1  ;;  %v1778_v62 = vsel %vm1766_vm8, %v4455_v1, %v4459_v53 }
 0x1e0   : > { %v2235_v39 = vld.sshfl [vmem:[#allocation1 + $0x10] sm:$0xff pattern:$0x75316420]  ;;  %v2236_v28 = vld.sshfl [vmem:[#allocation1 + $0x18] sm:$0xff pattern:$0x75316420] }
 0x1e1   : > { %v4636_v30 = vpack.i.bf16 %v2236_v28, %v2235_v39  ;;  %2378 = vst [vmem:[#allocation1 + $0x11] ss:$2 sm:$0xff] %v6099_v24  ;;  %v6120_v10 = vpop.permute.xlu2 %4477 }
 0x1e2   : > { %1815 = vst [vmem:[#allocation2 + $0x4e8] sm:$0xf0] %v1773_v36  ;;  %v4480_v61 = vunpack.i.h.bf16 %v6120_v10  ;;  %v4479_v38 = vunpack.i.l.bf16 %v6120_v10 }
 0x1e3   : > { %4637 = vrot.lane.b32.xlu1 %v4636_v30, %s4932_s29  ;;  %v2228_v35 = vld.sshfl [vmem:[#allocation1 + $0x30] sm:$0xff pattern:$0x75316420]  ;;  %v2229_v4 = vld.sshfl [vmem:[#allocation1 + $0x38] sm:$0xff pattern:$0x75316420] }
 0x1e4   : > { %v4626_v40 = vpack.i.bf16 %v2229_v4, %v2228_v35  ;;  %v2233_v46 = vld.sshfl [vmem:[#allocation1] sm:$0xff pattern:$0x75316420]  ;;  %v2234_v54 = vld.sshfl [vmem:[#allocation1 + $0x8] sm:$0xff pattern:$0x75316420]  ;;  %v1787_v42 = vsel %vm1766_vm8, %v4479_v38, %v4480_v61  ;;  %v1786_v4 = vsel %vm1766_vm8, %v4475_v45, %v4479_v38 }
 0x1e5   : > { %v4631_v5 = vpack.i.bf16 %v2234_v54, %v2233_v46  ;;  %1816 = vst [vmem:[#allocation2 + $0xf0] sm:$0xf0] %v1774_v60 }
 0x1e6   : > { %4627 = vrot.lane.b32.xlu2 %v4626_v40, %s4932_s29  ;;  %1823 = vst [vmem:[#allocation2 + $0x5d0] sm:$0xf0] %v1781_v8  ;;  %v2352_v40 = vld [vmem:[%s4973_s17 + $0x2c] sm:$0xf] }
 0x1e7   : > { %4632 = vrot.lane.b32.xlu0 %v4631_v5, %s4932_s29  ;;  %2232 = vst [vmem:[#allocation1 + $0x20] ss:$2 sm:$0xff] %v2191_v0  ;;  %v2363_v46 = vunpack.c.l.bf16 %v2352_v40 }
 0x1e8   : > { %v2385_v58 = vld.sshfl [vmem:[#allocation1 + $0x10] sm:$0xff pattern:$0x75316420]  ;;  %v2386_v48 = vld.sshfl [vmem:[#allocation1 + $0x18] sm:$0xff pattern:$0x75316420] }
 0x1e9   : > { %v4651_v26 = vpack.i.bf16 %v2386_v48, %v2385_v58  ;;  %2376 = vst [vmem:[#allocation1 + $0x1] ss:$2 sm:$0xff] %v6112_v13  ;;  %v6159_v50 = vpop.permute.xlu2 %4492 }
 0x1ea   : > { %1812 = vst [vmem:[#allocation2 + $0x458] sm:$0xf0] %v1770_v7  ;;  %v4495_v47 = vunpack.i.h.bf16 %v6159_v50  ;;  %v4494_v34 = vunpack.i.l.bf16 %v6159_v50  ;;  %v6187_v7 = vunpack.c.h.bf16 %v2351_v41 }
 0x1eb   : > { %4652 = vrot.lane.b32.xlu1 %v4651_v26, %s4933_s30  ;;  %1813 = vst [vmem:[#allocation2 + $0x2c0] sm:$0xf0] %v1771_v20 }
 0x1ec   : > { %1814 = vst [vmem:[#allocation2 + $0x1c8] sm:$0xf0] %v1772_v15  ;;  %v1943_v0 = vsel %vm1938_vm9, %v4494_v34, %v4495_v47 }
 0x1ed   : > { %1821 = vst [vmem:[#allocation2 + $0x50] sm:$0xf0] %v1779_v18 }
 0x1ee   : > { %v2237_v25 = vld.sshfl [vmem:[#allocation1 + $0x20] sm:$0xff pattern:$0x75316420]  ;;  %v2238_v43 = vld.sshfl [vmem:[#allocation1 + $0x28] sm:$0xff pattern:$0x75316420] }
 0x1ef   : > { %v4641_v19 = vpack.i.bf16 %v2238_v43, %v2237_v25  ;;  %1822 = vst [vmem:[#allocation2 + $0x3f8] sm:$0xf0] %v1780_v22 }
 0x1f0   : > { %v2383_v52 = vld.sshfl [vmem:[#allocation1] sm:$0xff pattern:$0x75316420]  ;;  %v2384_v21 = vld.sshfl [vmem:[#allocation1 + $0x8] sm:$0xff pattern:$0x75316420] }
 0x1f1   : > { %4642 = vrot.lane.b32.xlu2 %v4641_v19, %s4932_s29  ;;  %v4646_v27 = vpack.i.bf16 %v2384_v21, %v2383_v52  ;;  %2391 = vst [vmem:[#allocation1 + $0x1] ss:$2 sm:$0xff] %v6134_v17  ;;  %v6219_v19 = vpop.permute.xlu1 %4487 }
 0x1f2   : > { %1829 = vst [vmem:[#allocation2 + $0xd0] sm:$0xf0] %v1787_v42  ;;  %v6221_v42 = vpop.permute.xlu2 %4507  ;;  %v4490_v1 = vunpack.i.h.bf16 %v6219_v19  ;;  %v4489_v52 = vunpack.i.l.bf16 %v6219_v19 }
 0x1f3   : > { %4647 = vrot.lane.b32.xlu0 %v4646_v27, %s4933_s30  ;;  %2380 = vst [vmem:[#allocation1 + $0x21] ss:$2 sm:$0xff] %v6137_v49  ;;  %v4510_v21 = vunpack.i.h.bf16 %v6221_v42  ;;  %v4509_v27 = vunpack.i.l.bf16 %v6221_v42 }
 0x1f4   : > { %2382 = vst [vmem:[#allocation1 + $0x31] ss:$2 sm:$0xff] %v6141_v59  ;;  %v1941_v14 = vsel %vm1938_vm9, %v4489_v52, %v4490_v1 }
 0x1f5   : > { %1818 = vst [vmem:[#allocation2 + $0x460] sm:$0xf0] %v1776_v44  ;;  %v4468_v44 = vpop.permute.xlu0 %4467 }
 0x1f6   : > { %1819 = vst [vmem:[#allocation2 + $0x270] sm:$0xf0] %v1777_v16  ;;  %v4470_v45 = vunpack.i.h.bf16 %v4468_v44 }
 0x1f7   : > { %1820 = vst [vmem:[#allocation2 + $0x20] sm:$0xf0] %v1778_v62 }
 0x1f8   : > { %v2395_v51 = vld.sshfl [vmem:[#allocation1] sm:$0xff pattern:$0x75316420]  ;;  %v2396_v55 = vld.sshfl [vmem:[#allocation1 + $0x8] sm:$0xff pattern:$0x75316420] }
 0x1f9   : > { %v4666_v36 = vpack.i.bf16 %v2396_v55, %v2395_v51  ;;  %1827 = vst [vmem:[#allocation2 + $0x530] sm:$0xf0] %v1785_v29  ;;  %v1942_v29 = vsel %vm1938_vm9, %v4490_v1, %v4494_v34  ;;  %v1949_v51 = vsel %vm1938_vm9, %v4509_v27, %v4510_v21  ;;  %v4469_v55 = vunpack.i.l.bf16 %v4468_v44 }
 0x1fa   : > { %v2387_v39 = vld.sshfl [vmem:[#allocation1 + $0x20] sm:$0xff pattern:$0x75316420]  ;;  %v2388_v28 = vld.sshfl [vmem:[#allocation1 + $0x28] sm:$0xff pattern:$0x75316420] }
 0x1fb   : > { %4667 = vrot.lane.b32.xlu1 %v4666_v36, %s4933_s30  ;;  %v4656_v30 = vpack.i.bf16 %v2388_v28, %v2387_v39  ;;  %v2389_v60 = vld.sshfl [vmem:[#allocation1 + $0x30] sm:$0xff pattern:$0x75316420]  ;;  %v2390_v35 = vld.sshfl [vmem:[#allocation1 + $0x38] sm:$0xff pattern:$0x75316420]  ;;  %v1784_v36 = vsel %vm1766_vm8, %v4470_v45, %v4474_v12  ;;  %v1782_v41 = vsel %vm1766_vm8, %v4465_v56, %v4469_v55 }
 0x1fc   : > { %v4661_v8 = vpack.i.bf16 %v2390_v35, %v2389_v60  ;;  %2394 = vst [vmem:[#allocation1 + $0x31] ss:$2 sm:$0xff] %v6161_v37  ;;  %v2525_v39 = vld [vmem:[%s4973_s17 + $0x2c] sm:$0xf] }
 0x1fd   : > { %4657 = vrot.lane.b32.xlu2 %v4656_v30, %s4933_s30  ;;  %2393 = vst [vmem:[#allocation1 + $0x21] ss:$2 sm:$0xff] %v6164_v63  ;;  %v1783_v30 = vsel %vm1766_vm8, %v4469_v55, %v4470_v45  ;;  %v2536_v56 = vunpack.c.l.bf16 %v2525_v39 }
 0x1fe   : > { %4662 = vrot.lane.b32.xlu0 %v4661_v8, %s4933_s30  ;;  %1828 = vst [vmem:[#allocation2 + $0x1d8] sm:$0xf0] %v1786_v4 }
 0x1ff   : > { %1985 = vst [vmem:[#allocation2 + $0x518] sm:$0xf] %v1943_v0 }
 0x200   : > { %2392 = vst [vmem:[#allocation1 + $0x11] ss:$2 sm:$0xff] %v6177_v3 }
 0x201   : > { %2403 = vst [vmem:[#allocation1 + $0x1] ss:$2 sm:$0xff] %v6181_v11 }
 0x202   : > { %1983 = vst [vmem:[#allocation2 + $0x128] sm:$0xf] %v1941_v14 }
 0x203   : > { %v2401_v54 = vld.sshfl [vmem:[#allocation1 + $0x30] sm:$0xff pattern:$0x75316420]  ;;  %v2402_v23 = vld.sshfl [vmem:[#allocation1 + $0x38] sm:$0xff pattern:$0x75316420] }
 0x204   : > { %v4681_v5 = vpack.i.bf16 %v2402_v23, %v2401_v54  ;;  %v2399_v31 = vld.sshfl [vmem:[#allocation1 + $0x20] sm:$0xff pattern:$0x75316420]  ;;  %v2400_v53 = vld.sshfl [vmem:[#allocation1 + $0x28] sm:$0xff pattern:$0x75316420] }
 0x205   : > { %v4676_v58 = vpack.i.bf16 %v2400_v53, %v2399_v31  ;;  %2554 = vst [vmem:[#allocation1 + $0x30] ss:$2 sm:$0xff] %v6141_v59  ;;  %v4483_v31 = vpop.permute.xlu0 %4482  ;;  %v4503_v53 = vpop.permute.xlu1 %4502 }
 0x206   : > { %4682 = vrot.lane.b32.xlu1 %v4681_v5, %s4933_s30  ;;  %2405 = vst [vmem:[#allocation1 + $0x21] ss:$2 sm:$0xff] %v2363_v46  ;;  %v4505_v45 = vunpack.i.h.bf16 %v4503_v53 }
 0x207   : > { %v2397_v48 = vld.sshfl [vmem:[#allocation1 + $0x10] sm:$0xff pattern:$0x75316420]  ;;  %v2398_v20 = vld.sshfl [vmem:[#allocation1 + $0x18] sm:$0xff pattern:$0x75316420]  ;;  %4677 = vrot.lane.b32.xlu0 %v4676_v58, %s4933_s30 }
 0x208   : > { %v4671_v10 = vpack.i.bf16 %v2398_v20, %v2397_v48  ;;  %2404 = vst [vmem:[#allocation1 + $0x11] ss:$2 sm:$0xff] %v6187_v7  ;;  %v2406_v26 = vld.sshfl [vmem:[#allocation1] sm:$0xff pattern:$0x75316420]  ;;  %v4485_v20 = vunpack.i.h.bf16 %v4483_v31 }
 0x209   : > { %v2407_v15 = vld.sshfl [vmem:[#allocation1 + $0x8] sm:$0xff pattern:$0x75316420]  ;;  %1984 = vst [vmem:[#allocation2 + $0x240] sm:$0xf] %v1942_v29 }
 0x20a   : > { %4672 = vrot.lane.b32.xlu2 %v4671_v10, %s4933_s30  ;;  %2548 = vst [vmem:[#allocation1] ss:$2 sm:$0xff] %v6112_v13  ;;  %v4686_v40 = vpack.i.bf16 %v2407_v15, %v2406_v26  ;;  %v4484_v10 = vunpack.i.l.bf16 %v4483_v31  ;;  %v6283_v26 = vpop.permute.xlu2 %4522  ;;  %v1940_v44 = vsel %vm1938_vm9, %v4485_v20, %v4489_v52 }
 0x20b   : > { %1991 = vst [vmem:[#allocation2 + $0x5b0] sm:$0xf] %v1949_v51  ;;  %v4504_v51 = vunpack.i.l.bf16 %v4503_v53  ;;  %v4525_v55 = vunpack.i.h.bf16 %v6283_v26 }
 0x20c   : > { %1826 = vst [vmem:[#allocation2 + $0x170] sm:$0xf0] %v1784_v36  ;;  %v6254_v60 = vld.sshfl [vmem:[#allocation1 + $0x30] sm:$0xff pattern:$0x75316420]  ;;  %v1939_v29 = vsel %vm1938_vm9, %v4484_v10, %v4485_v20  ;;  %v1948_v36 = vsel %vm1938_vm9, %v4505_v45, %v4509_v27 }
 0x20d   : > { %v6195_v2 = vld.sshfl [vmem:[#allocation1 + $0x20] sm:$0xff pattern:$0x75316420]  ;;  %v6197_v18 = vld.sshfl [vmem:[#allocation1 + $0x28] sm:$0xff pattern:$0x75316420]  ;;  %v4498_v27 = vpop.permute.xlu0 %4497 }
 0x20e   : > { %2552 = vst [vmem:[#allocation1 + $0x20] ss:$2 sm:$0xff] %v6137_v49  ;;  %v6256_v35 = vld.sshfl [vmem:[#allocation1 + $0x38] sm:$0xff pattern:$0x75316420] }
 0x20f   : > { %v6200_v61 = vld.sshfl [vmem:[#allocation1 + $0x10] sm:$0xff pattern:$0x75316420]  ;;  %v6202_v38 = vld.sshfl [vmem:[#allocation1 + $0x18] sm:$0xff pattern:$0x75316420] }
 0x210   : > { %7044 = vst [vmem:[#allocation3_spill] sm:$0xff] %v6202_v38 }
 0x211   : > { %2550 = vst [vmem:[#allocation1 + $0x10] ss:$2 sm:$0xff] %v6099_v24  ;;  %v6205_v9 = vld.sshfl [vmem:[#allocation1] sm:$0xff pattern:$0x75316420] }
 0x212   : > { %v6207_v22 = vld.sshfl [vmem:[#allocation1 + $0x8] sm:$0xff pattern:$0x75316420]  ;;  %1824 = vst [vmem:[#allocation2 + $0x5d8] sm:$0xf0] %v1782_v41  ;;  %4687 = vrot.lane.b32.xlu2 %v4686_v40, %s4933_s30  ;;  %v4524_v41 = vunpack.i.l.bf16 %v6283_v26  ;;  %v4518_v40 = vpop.permute.xlu1 %4517 }
 0x213   : > { %2563 = vst [vmem:[#allocation1] ss:$2 sm:$0xff] %v6134_v17  ;;  %v4691_v39 = vpack.i.bf16 %v6207_v22, %v6205_v9  ;;  %v4500_v9 = vunpack.i.h.bf16 %v4498_v27  ;;  %v4499_v22 = vunpack.i.l.bf16 %v4498_v27 }
 0x214   : > { %1825 = vst [vmem:[#allocation2 + $0x158] sm:$0xf0] %v1783_v30  ;;  %v1947_v30 = vsel %vm1938_vm9, %v4504_v51, %v4505_v45 }
 0x215   : > { %v6210_v6 = vld.sshfl [vmem:[#allocation1 + $0x20] sm:$0xff pattern:$0x75316420]  ;;  %v6212_v25 = vld.sshfl [vmem:[#allocation1 + $0x28] sm:$0xff pattern:$0x75316420]  ;;  %v1944_v53 = vsel %vm1938_vm9, %v4495_v47, %v4499_v22  ;;  %v1945_v20 = vsel %vm1938_vm9, %v4499_v22, %v4500_v9 }
 0x216   : > { %2565 = vst [vmem:[#allocation1 + $0x20] ss:$2 sm:$0xff] %v6164_v63  ;;  %v4706_v52 = vpack.i.bf16 %v6212_v25, %v6210_v6  ;;  %v4520_v6 = vunpack.i.h.bf16 %v4518_v40  ;;  %v6308_v25 = vpop.permute.xlu2 %4537 }
 0x217   : > { %2566 = vst [vmem:[#allocation1 + $0x30] ss:$2 sm:$0xff] %v6161_v37  ;;  %v7040_v10 = vunpack.i.h.bf16 %v6308_v25 }
 0x218   : > { %v6215_v43 = vld.sshfl [vmem:[#allocation1 + $0x10] sm:$0xff pattern:$0x75316420]  ;;  %v6217_v57 = vld.sshfl [vmem:[#allocation1 + $0x18] sm:$0xff pattern:$0x75316420] }
 0x219   : > { %2564 = vst [vmem:[#allocation1 + $0x10] ss:$2 sm:$0xff] %v6177_v3 }
 0x21a   : > { %v6228_v16 = vld.sshfl [vmem:[#allocation1] sm:$0xff pattern:$0x75316420]  ;;  %v6230_v62 = vld.sshfl [vmem:[#allocation1 + $0x8] sm:$0xff pattern:$0x75316420]  ;;  %4692 = vrot.lane.b32.xlu2 %v4691_v39, %s4935_s5  ;;  %v4533_v39 = vpop.permute.xlu1 %4532 }
 0x21b   : > { %2575 = vst [vmem:[#allocation1] ss:$2 sm:$0xff] %v6181_v11  ;;  %v4535_v27 = vunpack.i.h.bf16 %v4533_v39 }
 0x21c   : > { %1982 = vst [vmem:[#allocation2 + $0x220] sm:$0xf] %v1940_v44 }
 0x21d   : > { %v6259_v32 = vld.sshfl [vmem:[#allocation1 + $0x20] sm:$0xff pattern:$0x75316420]  ;;  %v6261_v12 = vld.sshfl [vmem:[#allocation1 + $0x28] sm:$0xff pattern:$0x75316420] }
 0x21e   : > { %2577 = vst [vmem:[#allocation1 + $0x20] ss:$2 sm:$0xff] %v2536_v56  ;;  %v6276_v5 = vld.sshfl [vmem:[#allocation1 + $0x30] sm:$0xff pattern:$0x75316420]  ;;  %v1955_v56 = vsel %vm1938_vm9, %v4524_v41, %v4525_v55 }
 0x21f   : > { %v6278_v58 = vld.sshfl [vmem:[#allocation1 + $0x38] sm:$0xff pattern:$0x75316420]  ;;  %1981 = vst [vmem:[#allocation2 + $0x78] sm:$0xf] %v1939_v29  ;;  %v4513_v29 = vpop.permute.xlu0 %4512 }
 0x220   : > { %v6249_v28 = vld.sshfl [vmem:[#allocation1 + $0x10] sm:$0xff pattern:$0x75316420]  ;;  %v6251_v34 = vld.sshfl [vmem:[#allocation1 + $0x18] sm:$0xff pattern:$0x75316420] }
 0x221   : > { %2576 = vst [vmem:[#allocation1 + $0x10] ss:$2 sm:$0xff] %v6187_v7 }
 0x222   : > { %v6263_v33 = vld.sshfl [vmem:[#allocation1] sm:$0xff pattern:$0x75316420]  ;;  %v6265_v4 = vld.sshfl [vmem:[#allocation1 + $0x8] sm:$0xff pattern:$0x75316420] }
 0x223   : > { %2721 = vst [vmem:[#allocation1 + $0x1] ss:$2 sm:$0xff] %v6112_v13 }
 0x224   : > { %2727 = vst [vmem:[#allocation1 + $0x31] ss:$2 sm:$0xff] %v6141_v59 }
 0x225   : > { %v6280_v48 = vld.sshfl [vmem:[#allocation1 + $0x20] sm:$0xff pattern:$0x75316420]  ;;  %v6286_v15 = vld.sshfl [vmem:[#allocation1 + $0x28] sm:$0xff pattern:$0x75316420] }
 0x226   : > { %7047 = vst [vmem:[#allocation6_spill] sm:$0xff] %v6280_v48 }
 0x227   : > { %7048 = vst [vmem:[#allocation7_spill] sm:$0xff] %v6286_v15 }
 0x228   : > { %v6269_v8 = vld.sshfl [vmem:[#allocation1 + $0x10] sm:$0xff pattern:$0x75316420]  ;;  %v6271_v0 = vld.sshfl [vmem:[#allocation1 + $0x18] sm:$0xff pattern:$0x75316420] }
 0x229   : > { %7045 = vst [vmem:[#allocation4_spill] sm:$0xff] %v6269_v8 }
 0x22a   : > { %7046 = vst [vmem:[#allocation5_spill] sm:$0xff] %v6271_v0  ;;  %v2728_v46 = vld.sshfl [vmem:[#allocation1] sm:$0xff pattern:$0x75316420] }
 0x22b   : > { %2723 = vst [vmem:[#allocation1 + $0x11] ss:$2 sm:$0xff] %v6099_v24  ;;  %v2729_v54 = vld.sshfl [vmem:[#allocation1 + $0x8] sm:$0xff pattern:$0x75316420] }
 0x22c   : > { %v4701_v23 = vpack.i.bf16 %v2729_v54, %v2728_v46  ;;  %2736 = vst [vmem:[#allocation1 + $0x1] ss:$2 sm:$0xff] %v6134_v17  ;;  %v4519_v46 = vunpack.i.l.bf16 %v4518_v40  ;;  %v4696_v54 = vpack.i.bf16 %v6217_v57, %v6215_v43  ;;  %v1954_v57 = vsel %vm1938_vm9, %v4520_v6, %v4524_v41  ;;  %v6330_v47 = vld.sshfl [vmem:[#allocation1 + $0x30] sm:$0xff pattern:$0x75316420] }
 0x22d   : > { %2725 = vst [vmem:[#allocation1 + $0x21] ss:$2 sm:$0xff] %v6137_v49  ;;  %v6332_v44 = vld.sshfl [vmem:[#allocation1 + $0x38] sm:$0xff pattern:$0x75316420]  ;;  %v4514_v41 = vunpack.i.l.bf16 %v4513_v29 }
 0x22e   : > { %4702 = vrot.lane.b32.xlu0 %v4701_v23, %s4934_s4  ;;  %1990 = vst [vmem:[#allocation2 + $0x4a0] sm:$0xf] %v1948_v36  ;;  %v1953_v43 = vsel %vm1938_vm9, %v4519_v46, %v4520_v6  ;;  %4697 = vrot.lane.b32.xlu2 %v4696_v54, %s4935_s5  ;;  %v4515_v36 = vunpack.i.h.bf16 %v4513_v29  ;;  %v4534_v6 = vunpack.i.l.bf16 %v4533_v39 }
 0x22f   : > { %1989 = vst [vmem:[#allocation2 + $0x200] sm:$0xf] %v1947_v30 }
 0x230   : > { %1997 = vst [vmem:[#allocation2 + $0x4c0] sm:$0xf] %v1955_v56  ;;  %v1951_v22 = vsel %vm1938_vm9, %v4514_v41, %v4515_v36  ;;  %v1952_v54 = vsel %vm1938_vm9, %v4515_v36, %v4519_v46  ;;  %v4528_v36 = vpop.permute.xlu0 %4527 }
 0x231   : > { %1986 = vst [vmem:[#allocation2 + $0x420] sm:$0xf] %v1944_v53  ;;  %v6350_v53 = vpop.permute.xlu2 %4552  ;;  %v4529_v39 = vunpack.i.l.bf16 %v4528_v36 }
 0x232   : > { %v2730_v19 = vld.sshfl [vmem:[#allocation1 + $0x10] sm:$0xff pattern:$0x75316420]  ;;  %v2731_v1 = vld.sshfl [vmem:[#allocation1 + $0x18] sm:$0xff pattern:$0x75316420]  ;;  %v7039_v42 = vunpack.i.h.bf16 %v6350_v53  ;;  %v7055_v38 = vunpack.i.h.bf16 %v6350_v53 }
 0x233   : > { %v4711_v14 = vpack.i.bf16 %v2731_v1, %v2730_v19  ;;  %2737 = vst [vmem:[#allocation1 + $0x11] ss:$2 sm:$0xff] %v6177_v3  ;;  %v4539_v19 = vunpack.i.l.bf16 %v6308_v25  ;;  %v1946_v1 = vsel %vm1938_vm9, %v4500_v9, %v4504_v51  ;;  %v6334_v45 = vld.sshfl [vmem:[#allocation1] sm:$0xff pattern:$0x75316420]  ;;  %v1950_v9 = vsel %vm1938_vm9, %v4510_v21, %v4514_v41 }
 0x234   : > { %1987 = vst [vmem:[#allocation2 + $0x438] sm:$0xf] %v1945_v20  ;;  %v2732_v51 = vld.sshfl [vmem:[#allocation1 + $0x20] sm:$0xff pattern:$0x75316420]  ;;  %v1959_v20 = vsel %vm1938_vm9, %v4534_v6, %v4535_v27  ;;  %v4554_v21 = vunpack.i.l.bf16 %v6350_v53  ;;  %v4746_v41 = vpack.i.bf16 %v6256_v35, %v6254_v60 }
 0x235   : > { %4712 = vrot.lane.b32.xlu1 %v4711_v14, %s4934_s4  ;;  %1988 = vst [vmem:[#allocation2 + $0x408] sm:$0xf] %v1946_v1  ;;  %v2112_v50 = vsel %vm2111_vm10, %v4539_v19, %v7040_v10  ;;  %v6336_v14 = vld.sshfl [vmem:[#allocation1 + $0x8] sm:$0xff pattern:$0x75316420] }
 0x236   : > { %4707 = vrot.lane.b32.xlu0 %v4706_v52, %s4935_s5  ;;  %1995 = vst [vmem:[#allocation2 + $0x418] sm:$0xf] %v1953_v43  ;;  %v2733_v52 = vld.sshfl [vmem:[#allocation1 + $0x28] sm:$0xff pattern:$0x75316420]  ;;  %v2118_v29 = vsel %vm2111_vm10, %v4554_v21, %v7039_v42 }
 0x237   : > { %1996 = vst [vmem:[#allocation2 + $0x588] sm:$0xf] %v1954_v57  ;;  %v4716_v40 = vpack.i.bf16 %v2733_v52, %v2732_v51  ;;  %v6374_v52 = vpop.permute.xlu1 %4547 }
 0x238   : > { %2154 = vst [vmem:[#allocation2 + $0x78] sm:$0xf0] %v2112_v50 }
 0x239   : > { %2739 = vst [vmem:[#allocation1 + $0x31] ss:$2 sm:$0xff] %v6161_v37  ;;  %4717 = vrot.lane.b32.xlu2 %v4716_v40, %s4934_s4 }
 0x23a   : > { %v6312_v23 = vld.sshfl [vmem:[#allocation1 + $0x10] sm:$0xff pattern:$0x75316420]  ;;  %v6314_v31 = vld.sshfl [vmem:[#allocation1 + $0x18] sm:$0xff pattern:$0x75316420] }
 0x23b   : > { %2749 = vst [vmem:[#allocation1 + $0x11] ss:$2 sm:$0xff] %v6187_v7 }
 0x23c   : > { %2748 = vst [vmem:[#allocation1 + $0x1] ss:$2 sm:$0xff] %v6181_v11 }
 0x23d   : > { %1992 = vst [vmem:[#allocation2 + $0x210] sm:$0xf] %v1950_v9  ;;  %v4530_v9 = vunpack.i.h.bf16 %v4528_v36 }
 0x23e   : > { %1993 = vst [vmem:[#allocation2 + $0x360] sm:$0xf] %v1951_v22 }
 0x23f   : > { %1994 = vst [vmem:[#allocation2 + $0x290] sm:$0xf] %v1952_v54  ;;  %v1957_v36 = vsel %vm1938_vm9, %v4529_v39, %v4530_v9  ;;  %v1958_v42 = vsel %vm1938_vm9, %v4530_v9, %v4534_v6 }
 0x240   : > { %2001 = vst [vmem:[#allocation2 + $0x278] sm:$0xf] %v1959_v20  ;;  %v6357_v46 = vld.sshfl [vmem:[#allocation1 + $0x30] sm:$0xff pattern:$0x75316420]  ;;  %v4550_v20 = vunpack.i.h.bf16 %v6374_v52 }
 0x241   : > { %v6359_v57 = vld.sshfl [vmem:[#allocation1 + $0x38] sm:$0xff pattern:$0x75316420]  ;;  %2160 = vst [vmem:[#allocation2 + $0x438] sm:$0xf0] %v2118_v29  ;;  %v6387_v29 = vpop.permute.xlu2 %4567 }
 0x242   : > { %v6338_v30 = vld.sshfl [vmem:[#allocation1 + $0x10] sm:$0xff pattern:$0x75316420]  ;;  %v6340_v56 = vld.sshfl [vmem:[#allocation1 + $0x18] sm:$0xff pattern:$0x75316420]  ;;  %v4569_v26 = vunpack.i.l.bf16 %v6387_v29 }
 0x243   : > { %7049 = vst [vmem:[#allocation8_spill] sm:$0xff] %v6338_v30  ;;  %v6361_v50 = vld.sshfl [vmem:[#allocation1] sm:$0xff pattern:$0x75316420] }
 0x244   : > { %7050 = vst [vmem:[#allocation9_spill] sm:$0xff] %v6340_v56  ;;  %v6368_v51 = vld.sshfl [vmem:[#allocation1 + $0x8] sm:$0xff pattern:$0x75316420] }
 0x245   : > { %2895 = vst [vmem:[#allocation1 + $0x10] ss:$2 sm:$0xff] %v6099_v24 }
 0x246   : > { %2899 = vst [vmem:[#allocation1 + $0x30] ss:$2 sm:$0xff] %v6141_v59 }
 0x247   : > { %2893 = vst [vmem:[#allocation1] ss:$2 sm:$0xff] %v6112_v13 }
 0x248   : > { %2738 = vst [vmem:[#allocation1 + $0x21] ss:$2 sm:$0xff] %v6164_v63 }
 0x249   : > { %1999 = vst [vmem:[#allocation2 + $0x3a0] sm:$0xf] %v1957_v36 }
 0x24a   : > { %2000 = vst [vmem:[#allocation2 + $0x5a0] sm:$0xf] %v1958_v42  ;;  %v4756_v42 = vpack.i.bf16 %v6332_v44, %v6330_v47  ;;  %v4543_v47 = vpop.permute.xlu0 %4542  ;;  %v4563_v44 = vpop.permute.xlu1 %4562 }
 0x24c   : > { %v2902_v19 = vld.sshfl [vmem:[#allocation1 + $0x10] sm:$0xff pattern:$0x75316420]  ;;  %v2903_v1 = vld.sshfl [vmem:[#allocation1 + $0x18] sm:$0xff pattern:$0x75316420] }
 0x24d   : > { %v4731_v43 = vpack.i.bf16 %v2903_v1, %v2902_v19  ;;  %2909 = vst [vmem:[#allocation1 + $0x10] ss:$2 sm:$0xff] %v6177_v3  ;;  %v2906_v22 = vld.sshfl [vmem:[#allocation1 + $0x30] sm:$0xff pattern:$0x75316420]  ;;  %v7041_v19 = vunpack.i.l.bf16 %v6374_v52 }
 0x24e   : > { %v2907_v54 = vld.sshfl [vmem:[#allocation1 + $0x38] sm:$0xff pattern:$0x75316420]  ;;  %v2900_v35 = vld.sshfl [vmem:[#allocation1] sm:$0xff pattern:$0x75316420] }
 0x24f   : > { %4732 = vrot.lane.b32.xlu1 %v4731_v43, %s4936_s6  ;;  %v4721_v60 = vpack.i.bf16 %v2907_v54, %v2906_v22  ;;  %v2901_v1 = vld.sshfl [vmem:[#allocation1 + $0x8] sm:$0xff pattern:$0x75316420]  ;;  %v1956_v43 = vsel %vm1938_vm9, %v4525_v55, %v4529_v39  ;;  %v7042_v22 = vunpack.i.h.bf16 %v6387_v29  ;;  %v2117_v55 = vsel %vm2111_vm10, %v4550_v20, %v4554_v21  ;;  %v6400_v10 = vld.sshfl [vmem:[#allocation1 + $0x20] sm:$0xff pattern:$0x75316420] }
 0x250   : > { %2908 = vst [vmem:[#allocation1] ss:$2 sm:$0xff] %v6134_v17  ;;  %v2697_v54 = vld [vmem:[%s4973_s17 + $0x2c] sm:$0xf]  ;;  %v4726_v39 = vpack.i.bf16 %v2901_v1, %v2900_v35 }
 0x251   : > { %4722 = vrot.lane.b32.xlu0 %v4721_v60, %s4936_s6  ;;  %1998 = vst [vmem:[#allocation2 + $0x118] sm:$0xf] %v1956_v43  ;;  %v6402_v60 = vld.sshfl [vmem:[#allocation1 + $0x28] sm:$0xff pattern:$0x75316420]  ;;  %v2124_v6 = vsel %vm2111_vm10, %v4569_v26, %v7042_v22  ;;  %v2708_v9 = vunpack.c.l.bf16 %v2697_v54  ;;  %v6433_v54 = vpop.permute.xlu2 %4582 }
 0x252   : > { %2159 = vst [vmem:[#allocation2 + $0x420] sm:$0xf0] %v2117_v55  ;;  %v4544_v55 = vunpack.i.l.bf16 %v4543_v47 }
 0x253   : > { %2166 = vst [vmem:[#allocation2 + $0x360] sm:$0xf0] %v2124_v6  ;;  %v4564_v6 = vunpack.i.l.bf16 %v4563_v44 }
 0x254   : > { %v6376_v27 = vld.sshfl [vmem:[#allocation1 + $0x10] sm:$0xff pattern:$0x75316420]  ;;  %v6378_v40 = vld.sshfl [vmem:[#allocation1 + $0x18] sm:$0xff pattern:$0x75316420] }
 0x255   : > { %2921 = vst [vmem:[#allocation1 + $0x10] ss:$2 sm:$0xff] %v6187_v7 }
 0x256   : > { %2750 = vst [vmem:[#allocation1 + $0x21] ss:$2 sm:$0xff] %v2708_v9 }
 0x257   : > { %4747 = vrot.lane.b32.xlu1 %v4746_v41, %s4935_s5  ;;  %v2116_v41 = vsel %vm2111_vm10, %v7041_v19, %v4550_v20  ;;  %v2912_v43 = vld.sshfl [vmem:[#allocation1] sm:$0xff pattern:$0x75316420]  ;;  %v2913_v19 = vld.sshfl [vmem:[#allocation1 + $0x8] sm:$0xff pattern:$0x75316420] }
 0x258   : > { %2158 = vst [vmem:[#allocation2 + $0x518] sm:$0xf0] %v2116_v41  ;;  %v4761_v15 = vpack.i.bf16 %v2913_v19, %v2912_v43 }
 0x259   : > { %2920 = vst [vmem:[#allocation1] ss:$2 sm:$0xff] %v6181_v11  ;;  %4727 = vrot.lane.b32.xlu0 %v4726_v39, %s4936_s6  ;;  %v4565_v39 = vunpack.i.h.bf16 %v4563_v44 }
 0x25a   : > { %2911 = vst [vmem:[#allocation1 + $0x30] ss:$2 sm:$0xff] %v6161_v37 }
 0x25c   : > { %v6428_v36 = vld.sshfl [vmem:[#allocation1 + $0x10] sm:$0xff pattern:$0x75316420]  ;;  %v6431_v41 = vld.sshfl [vmem:[#allocation1 + $0x18] sm:$0xff pattern:$0x75316420] }
 0x25d   : > { %v6418_v19 = vld.sshfl [vmem:[#allocation1 + $0x20] sm:$0xff pattern:$0x75316420]  ;;  %v6420_v35 = vld.sshfl [vmem:[#allocation1 + $0x28] sm:$0xff pattern:$0x75316420] }
 0x25e   : > { %7051 = vst [vmem:[#allocation10_spill] sm:$0xff] %v6418_v19  ;;  %v7043_v19 = vunpack.i.h.bf16 %v6433_v54 }
 0x25f   : > { %4762 = vrot.lane.b32.xlu1 %v4761_v15, %s4936_s6  ;;  %7052 = vst [vmem:[#allocation11_spill] sm:$0xff] %v6420_v35 }
 0x260   : > { %v6413_v21 = vld.sshfl [vmem:[#allocation1] sm:$0xff pattern:$0x75316420]  ;;  %v6415_v20 = vld.sshfl [vmem:[#allocation1 + $0x8] sm:$0xff pattern:$0x75316420] }
 0x261   : > { %3066 = vst [vmem:[#allocation1 + $0x1] ss:$2 sm:$0xff] %v6112_v13  ;;  %4757 = vrot.lane.b32.xlu0 %v4756_v42, %s4934_s4  ;;  %v6424_v15 = vld.sshfl [vmem:[#allocation1 + $0x30] sm:$0xff pattern:$0x75316420]  ;;  %v4545_v13 = vunpack.i.h.bf16 %v4543_v47  ;;  %v7053_v42 = vunpack.i.h.bf16 %v6308_v25  ;;  %v4584_v47 = vunpack.i.l.bf16 %v6433_v54 }
 0x262   : > { %2897 = vst [vmem:[#allocation1 + $0x20] ss:$2 sm:$0xff] %v6137_v49  ;;  %v6426_v1 = vld.sshfl [vmem:[#allocation1 + $0x38] sm:$0xff pattern:$0x75316420] }
 0x263   : > { %3072 = vst [vmem:[#allocation1 + $0x31] ss:$2 sm:$0xff] %v6141_v59  ;;  %v2113_v22 = vsel %vm2111_vm10, %v7053_v42, %v4544_v55  ;;  %v2114_v59 = vsel %vm2111_vm10, %v4544_v55, %v4545_v13  ;;  %v2122_v55 = vsel %vm2111_vm10, %v4564_v6, %v4565_v39  ;;  %v4558_v42 = vpop.permute.xlu0 %4557 }
 0x264   : > { %3068 = vst [vmem:[#allocation1 + $0x11] ss:$2 sm:$0xff] %v6099_v24  ;;  %v7054_v24 = vunpack.i.l.bf16 %v6374_v52  ;;  %v2130_v52 = vsel %vm2111_vm10, %v4584_v47, %v7043_v19  ;;  %v4559_v30 = vunpack.i.l.bf16 %v4558_v42 }
 0x265   : > { %2155 = vst [vmem:[#allocation2 + $0x220] sm:$0xf0] %v2113_v22  ;;  %v2123_v22 = vsel %vm2111_vm10, %v4565_v39, %v4569_v26 }
 0x266   : > { %v2115_v44 = vsel %vm2111_vm10, %v4545_v13, %v7054_v24  ;;  %2156 = vst [vmem:[#allocation2 + $0x128] sm:$0xf0] %v2114_v59  ;;  %v4560_v24 = vunpack.i.h.bf16 %v4558_v42 }
 0x267   : > { %2157 = vst [vmem:[#allocation2 + $0x240] sm:$0xf0] %v2115_v44 }
 0x268   : > { %v3073_v9 = vld.sshfl [vmem:[#allocation1] sm:$0xff pattern:$0x75316420]  ;;  %v3074_v43 = vld.sshfl [vmem:[#allocation1 + $0x8] sm:$0xff pattern:$0x75316420]  ;;  %v2121_v19 = vsel %vm2111_vm10, %v4560_v24, %v4564_v6 }
 0x269   : > { %v4766_v35 = vpack.i.bf16 %v3074_v43, %v3073_v9  ;;  %v2904_v48 = vld.sshfl [vmem:[#allocation1 + $0x20] sm:$0xff pattern:$0x75316420]  ;;  %v2905_v56 = vld.sshfl [vmem:[#allocation1 + $0x28] sm:$0xff pattern:$0x75316420] }
 0x26a   : > { %v4736_v25 = vpack.i.bf16 %v2905_v56, %v2904_v48  ;;  %2910 = vst [vmem:[#allocation1 + $0x20] ss:$2 sm:$0xff] %v6164_v63  ;;  %v2870_v9 = vld [vmem:[%s4973_s17 + $0x2c] sm:$0xf]  ;;  %v6454_v56 = vpop.permute.xlu2 %4597 }
 0x26b   : > { %4767 = vrot.lane.b32.xlu1 %v4766_v35, %s4937_s7  ;;  %v3079_v43 = vld.sshfl [vmem:[#allocation1 + $0x30] sm:$0xff pattern:$0x75316420]  ;;  %v3080_v13 = vld.sshfl [vmem:[#allocation1 + $0x38] sm:$0xff pattern:$0x75316420]  ;;  %v4578_v35 = vpop.permute.xlu1 %4577  ;;  %v2881_v59 = vunpack.c.l.bf16 %v2870_v9  ;;  %v4600_v39 = vunpack.i.h.bf16 %v6454_v56  ;;  %v4599_v44 = vunpack.i.l.bf16 %v6454_v56 }
 0x26c   : > { %4737 = vrot.lane.b32.xlu2 %v4736_v25, %s4936_s6  ;;  %2164 = vst [vmem:[#allocation2 + $0x5b0] sm:$0xf0] %v2122_v55  ;;  %v3075_v48 = vld.sshfl [vmem:[#allocation1 + $0x10] sm:$0xff pattern:$0x75316420]  ;;  %v4580_v0 = vunpack.i.h.bf16 %v4578_v35  ;;  %v4741_v8 = vpack.i.bf16 %v3080_v13, %v3079_v43  ;;  %v4579_v42 = vunpack.i.l.bf16 %v4578_v35  ;;  %v4573_v43 = vpop.permute.xlu0 %4572 }
 0x26d   : > { %2165 = vst [vmem:[#allocation2 + $0x210] sm:$0xf0] %v2123_v22  ;;  %v3076_v26 = vld.sshfl [vmem:[#allocation1 + $0x18] sm:$0xff pattern:$0x75316420]  ;;  %v2286_v55 = vsel %vm2283_vm11, %v4599_v44, %v4600_v39 }
 0x26e   : > { %2172 = vst [vmem:[#allocation2 + $0x3a0] sm:$0xf0] %v2130_v52  ;;  %v4771_v25 = vpack.i.bf16 %v3076_v26, %v3075_v48  ;;  %v2119_v52 = vsel %vm2111_vm10, %v7055_v38, %v4559_v30  ;;  %v2120_v48 = vsel %vm2111_vm10, %v4559_v30, %v4560_v24  ;;  %v2129_v6 = vsel %vm2111_vm10, %v4580_v0, %v4584_v47 }
 0x26f   : > { %2163 = vst [vmem:[#allocation2 + $0x4a0] sm:$0xf0] %v2121_v19  ;;  %v2128_v19 = vsel %vm2111_vm10, %v4579_v42, %v4580_v0  ;;  %v4575_v26 = vunpack.i.h.bf16 %v4573_v43  ;;  %v4751_v30 = vpack.i.bf16 %v6230_v62, %v6228_v16 }
 0x270   : > { %4772 = vrot.lane.b32.xlu0 %v4771_v25, %s4937_s7  ;;  %2328 = vst [vmem:[#allocation2 + $0x2c8] sm:$0xf] %v2286_v55  ;;  %v4574_v25 = vunpack.i.l.bf16 %v4573_v43 }
 0x271   : > { %v2916_v9 = vld.sshfl [vmem:[#allocation1 + $0x20] sm:$0xff pattern:$0x75316420]  ;;  %v2917_v22 = vld.sshfl [vmem:[#allocation1 + $0x28] sm:$0xff pattern:$0x75316420] }
 0x272   : > { %2922 = vst [vmem:[#allocation1 + $0x20] ss:$2 sm:$0xff] %v2881_v59  ;;  %v4791_v35 = vpack.i.bf16 %v2917_v22, %v2916_v9  ;;  %v6470_v53 = vpop.permute.xlu2 %4612  ;;  %v2126_v59 = vsel %vm2111_vm10, %v4574_v25, %v4575_v26  ;;  %v2127_v9 = vsel %vm2111_vm10, %v4575_v26, %v4579_v42 }
 0x273   : > { %2161 = vst [vmem:[#allocation2 + $0x408] sm:$0xf0] %v2119_v52  ;;  %v4593_v13 = vpop.permute.xlu1 %4592  ;;  %v4615_v16 = vunpack.i.h.bf16 %v6470_v53  ;;  %v4614_v52 = vunpack.i.l.bf16 %v6470_v53 }
 0x274   : > { %4742 = vrot.lane.b32.xlu2 %v4741_v8, %s4937_s7  ;;  %2162 = vst [vmem:[#allocation2 + $0x200] sm:$0xf0] %v2120_v48  ;;  %v4595_v38 = vunpack.i.h.bf16 %v4593_v13  ;;  %v7056_v8 = vunpack.i.h.bf16 %v6387_v29  ;;  %v4594_v55 = vunpack.i.l.bf16 %v4593_v13  ;;  %v4588_v62 = vpop.permute.xlu0 %4587 }
 0x275   : > { %2171 = vst [vmem:[#allocation2 + $0x118] sm:$0xf0] %v2129_v6  ;;  %v4589_v48 = vunpack.i.l.bf16 %v4588_v62 }
 0x276   : > { %2170 = vst [vmem:[#allocation2 + $0x4c0] sm:$0xf0] %v2128_v19  ;;  %v2125_v0 = vsel %vm2111_vm10, %v7056_v8, %v4574_v25  ;;  %v2284_v22 = vsel %vm2283_vm11, %v4594_v55, %v4595_v38  ;;  %v4786_v19 = vpack.i.bf16 %v6378_v40, %v6376_v27 }
 0x277   : > { %3082 = vst [vmem:[#allocation1 + $0x11] ss:$2 sm:$0xff] %v6177_v3  ;;  %v2285_v3 = vsel %vm2283_vm11, %v4595_v38, %v4599_v44  ;;  %v2292_v44 = vsel %vm2283_vm11, %v4614_v52, %v4615_v16 }
 0x278   : > { %4792 = vrot.lane.b32.xlu0 %v4791_v35, %s4936_s6  ;;  %2167 = vst [vmem:[#allocation2 + $0x290] sm:$0xf0] %v2125_v0  ;;  %v7057_v35 = vunpack.i.h.bf16 %v6433_v54 }
 0x279   : > { %v6478_v47 = vld.sshfl [vmem:[#allocation1 + $0x20] sm:$0xff pattern:$0x75316420]  ;;  %v6480_v24 = vld.sshfl [vmem:[#allocation1 + $0x28] sm:$0xff pattern:$0x75316420] }
 0x27a   : > { %3070 = vst [vmem:[#allocation1 + $0x21] ss:$2 sm:$0xff] %v6137_v49  ;;  %v6491_v6 = vpop.permute.xlu2 %4627  ;;  %v4590_v49 = vunpack.i.h.bf16 %v4588_v62  ;;  %v2131_v26 = vsel %vm2111_vm10, %v7057_v35, %v4589_v48  ;;  %v4836_v35 = vpack.i.bf16 %v6415_v20, %v6413_v21 }
 0x27b   : > { %2168 = vst [vmem:[#allocation2 + $0x418] sm:$0xf0] %v2126_v59  ;;  %v4608_v29 = vpop.permute.xlu1 %4607  ;;  %v4630_v38 = vunpack.i.h.bf16 %v6491_v6  ;;  %v4629_v59 = vunpack.i.l.bf16 %v6491_v6 }
 0x27c   : > { %4752 = vrot.lane.b32.xlu2 %v4751_v30, %s4935_s5  ;;  %2169 = vst [vmem:[#allocation2 + $0x588] sm:$0xf0] %v2127_v9  ;;  %v4610_v42 = vunpack.i.h.bf16 %v4608_v29  ;;  %v4609_v25 = vunpack.i.l.bf16 %v4608_v29  ;;  %v2132_v8 = vsel %vm2111_vm10, %v4589_v48, %v4590_v49  ;;  %v4603_v40 = vpop.permute.xlu0 %4602  ;;  %v4781_v29 = vpack.i.bf16 %v6336_v14, %v6334_v45 }
 0x27d   : > { %2327 = vst [vmem:[#allocation2 + $0x148] sm:$0xf] %v2285_v3  ;;  %v2298_v55 = vsel %vm2283_vm11, %v4629_v59, %v4630_v38  ;;  %v4605_v9 = vunpack.i.h.bf16 %v4603_v40 }
 0x27e   : > { %2326 = vst [vmem:[#allocation2 + $0x168] sm:$0xf] %v2284_v22  ;;  %v2290_v0 = vsel %vm2283_vm11, %v4609_v25, %v4610_v42  ;;  %v2291_v27 = vsel %vm2283_vm11, %v4610_v42, %v4614_v52  ;;  %v3087_v45 = vld.sshfl [vmem:[#allocation1 + $0x10] sm:$0xff pattern:$0x75316420] }
 0x27f   : > { %2334 = vst [vmem:[#allocation2 + $0x380] sm:$0xf] %v2292_v44  ;;  %v2289_v42 = vsel %vm2283_vm11, %v4605_v9, %v4609_v25 }
 0x280   : > { %3081 = vst [vmem:[#allocation1 + $0x1] ss:$2 sm:$0xff] %v6134_v17  ;;  %v4604_v17 = vunpack.i.l.bf16 %v4603_v40 }
 0x281   : > { %v3077_v43 = vld.sshfl [vmem:[#allocation1 + $0x20] sm:$0xff pattern:$0x75316420]  ;;  %v3078_v13 = vld.sshfl [vmem:[#allocation1 + $0x28] sm:$0xff pattern:$0x75316420] }
 0x282   : > { %v4776_v30 = vpack.i.bf16 %v3078_v13, %v3077_v43  ;;  %2173 = vst [vmem:[#allocation2 + $0x5a0] sm:$0xf0] %v2131_v26  ;;  %v4643_v3 = vpop.permute.xlu2 %4642  ;;  %v2287_v22 = vsel %vm2283_vm11, %v4600_v39, %v4604_v17  ;;  %v2288_v52 = vsel %vm2283_vm11, %v4604_v17, %v4605_v9  ;;  %v3088_v26 = vld.sshfl [vmem:[#allocation1 + $0x18] sm:$0xff pattern:$0x75316420] }
 0x283   : > { %v4623_v54 = vpop.permute.xlu1 %4622  ;;  %2174 = vst [vmem:[#allocation2 + $0x278] sm:$0xf0] %v2132_v8  ;;  %v4644_v56 = vunpack.i.l.bf16 %v4643_v3 }
 0x284   : > { %4777 = vrot.lane.b32.xlu1 %v4776_v30, %s4937_s7  ;;  %4787 = vrot.lane.b32.xlu2 %v4786_v19, %s4936_s6  ;;  %2332 = vst [vmem:[#allocation2 + $0x3b8] sm:$0xf] %v2290_v0  ;;  %v4625_v62 = vunpack.i.h.bf16 %v4623_v54  ;;  %v4624_v48 = vunpack.i.l.bf16 %v4623_v54  ;;  %v4645_v19 = vunpack.i.h.bf16 %v4643_v3 }
 0x285   : > { %2333 = vst [vmem:[#allocation2 + $0x180] sm:$0xf] %v2291_v27 }
 0x286   : > { %2340 = vst [vmem:[#allocation2 + $0x280] sm:$0xf] %v2298_v55  ;;  %v2296_v13 = vsel %vm2283_vm11, %v4624_v48, %v4625_v62  ;;  %v2297_v14 = vsel %vm2283_vm11, %v4625_v62, %v4629_v59  ;;  %v2304_v0 = vsel %vm2283_vm11, %v4644_v56, %v4645_v19  ;;  %v4806_v59 = vpack.i.bf16 %v3088_v26, %v3087_v45 }
 0x287   : > { %3083 = vst [vmem:[#allocation1 + $0x21] ss:$2 sm:$0xff] %v6164_v63  ;;  %v3085_v49 = vld.sshfl [vmem:[#allocation1] sm:$0xff pattern:$0x75316420]  ;;  %v4618_v63 = vpop.permute.xlu0 %4617  ;;  %v4801_v55 = vpack.i.bf16 %v6251_v34, %v6249_v28 }
 0x288   : > { %v3086_v44 = vld.sshfl [vmem:[#allocation1 + $0x8] sm:$0xff pattern:$0x75316420]  ;;  %2329 = vst [vmem:[#allocation2 + $0x140] sm:$0xf] %v2287_v22  ;;  %v4620_v25 = vunpack.i.h.bf16 %v4618_v63  ;;  %v4619_v30 = vunpack.i.l.bf16 %v4618_v63 }
 0x289   : > { %v4796_v43 = vpack.i.bf16 %v3086_v44, %v3085_v49  ;;  %2330 = vst [vmem:[#allocation2 + $0x160] sm:$0xf] %v2288_v52  ;;  %v4876_v49 = vpack.i.bf16 %v6480_v24, %v6478_v47  ;;  %v7059_v47 = vld [vmem:[#allocation4_spill] sm:$0xff]  ;;  %v7060_v24 = vld [vmem:[#allocation5_spill] sm:$0xff] }
 0x28a   : > { %2331 = vst [vmem:[#allocation2 + $0x400] sm:$0xf] %v2289_v42  ;;  %v6526_v8 = vpop.permute.xlu2 %4657  ;;  %v2293_v9 = vsel %vm2283_vm11, %v4615_v16, %v4619_v30  ;;  %v2294_v62 = vsel %vm2283_vm11, %v4619_v30, %v4620_v25  ;;  %v2295_v52 = vsel %vm2283_vm11, %v4620_v25, %v4624_v48 }
 0x28b   : > { %v4638_v39 = vpop.permute.xlu1 %4637  ;;  %4797 = vrot.lane.b32.xlu0 %v4796_v43, %s4937_s7  ;;  %2338 = vst [vmem:[#allocation2 + $0x4b8] sm:$0xf] %v2296_v13  ;;  %v4659_v22 = vunpack.i.l.bf16 %v6526_v8  ;;  %v4821_v13 = vpack.i.bf16 %v6314_v31, %v6312_v23 }
 0x28c   : > { %4782 = vrot.lane.b32.xlu1 %v4781_v29, %s4934_s4  ;;  %2339 = vst [vmem:[#allocation2 + $0x1c0] sm:$0xf] %v2297_v14  ;;  %v4640_v27 = vunpack.i.h.bf16 %v4638_v39  ;;  %v4639_v17 = vunpack.i.l.bf16 %v4638_v39  ;;  %v4660_v29 = vunpack.i.h.bf16 %v6526_v8  ;;  %v4811_v14 = vpack.i.bf16 %v6261_v12, %v6259_v32 }
 0x28d   : > { %2346 = vst [vmem:[#allocation2 + $0x428] sm:$0xf] %v2304_v0  ;;  %v4826_v39 = vpack.i.bf16 %v6402_v60, %v6400_v10 }
 0x28e   : > { %v3089_v40 = vld.sshfl [vmem:[#allocation1 + $0x20] sm:$0xff pattern:$0x75316420]  ;;  %v3090_v54 = vld.sshfl [vmem:[#allocation1 + $0x28] sm:$0xff pattern:$0x75316420]  ;;  %v2302_v28 = vsel %vm2283_vm11, %v4639_v17, %v4640_v27  ;;  %v2303_v34 = vsel %vm2283_vm11, %v4640_v27, %v4644_v56 }
 0x28f   : > { %v4816_v3 = vpack.i.bf16 %v3090_v54, %v3089_v40  ;;  %3093 = vst [vmem:[#allocation1 + $0x1] ss:$2 sm:$0xff] %v6181_v11  ;;  %v4633_v16 = vpop.permute.xlu0 %4632  ;;  %v2461_v11 = vsel %vm2456_vm12, %v4659_v22, %v4660_v29  ;;  %v4831_v40 = vpack.i.bf16 %v6426_v1, %v6424_v15 }
 0x290   : > { %2335 = vst [vmem:[#allocation2 + $0x508] sm:$0xf] %v2293_v9  ;;  %v4635_v45 = vunpack.i.h.bf16 %v4633_v16  ;;  %v4634_v63 = vunpack.i.l.bf16 %v4633_v16 }
 0x291   : > { %4817 = vrot.lane.b32.xlu2 %v4816_v3, %s4937_s7  ;;  %2336 = vst [vmem:[#allocation2 + $0x348] sm:$0xf] %v2294_v62 }
 0x292   : > { %2337 = vst [vmem:[#allocation2 + $0x4f8] sm:$0xf] %v2295_v52  ;;  %v6549_v42 = vpop.permute.xlu2 %4672  ;;  %v2301_v32 = vsel %vm2283_vm11, %v4635_v45, %v4639_v17  ;;  %v2299_v12 = vsel %vm2283_vm11, %v4630_v38, %v4634_v63 }
 0x293   : > { %v4653_v53 = vpop.permute.xlu1 %4652  ;;  %4802 = vrot.lane.b32.xlu0 %v4801_v55, %s4935_s5  ;;  %2344 = vst [vmem:[#allocation2 + $0x30] sm:$0xf] %v2302_v28  ;;  %v4675_v19 = vunpack.i.h.bf16 %v6549_v42  ;;  %v4674_v43 = vunpack.i.l.bf16 %v6549_v42 }
 0x294   : > { %4807 = vrot.lane.b32.xlu1 %v4806_v59, %s4937_s7  ;;  %v4655_v48 = vunpack.i.h.bf16 %v4653_v53  ;;  %v4654_v44 = vunpack.i.l.bf16 %v4653_v53  ;;  %2345 = vst [vmem:[#allocation2 + $0x298] sm:$0xf] %v2303_v34 }
 0x295   : > { %2503 = vst [vmem:[#allocation2 + $0x160] sm:$0xf0] %v2461_v11  ;;  %v2467_v23 = vsel %vm2456_vm12, %v4674_v43, %v4675_v19 }
 0x296   : > { %v2459_v56 = vsel %vm2456_vm12, %v4654_v44, %v4655_v48  ;;  %v2460_v26 = vsel %vm2456_vm12, %v4655_v48, %v4659_v22  ;;  %3084 = vst [vmem:[#allocation1 + $0x31] ss:$2 sm:$0xff] %v6161_v37  ;;  %v2300_v37 = vsel %vm2283_vm11, %v4634_v63, %v4635_v45  ;;  %v3096_v1 = vld.sshfl [vmem:[#allocation1] sm:$0xff pattern:$0x75316420]  ;;  %v4851_v48 = vpack.i.bf16 %v6278_v58, %v6276_v5 }
 0x297   : > { %2501 = vst [vmem:[#allocation2 + $0x2c8] sm:$0xf0] %v2459_v56  ;;  %v4648_v31 = vpop.permute.xlu0 %4647  ;;  %v3097_v28 = vld.sshfl [vmem:[#allocation1 + $0x8] sm:$0xff pattern:$0x75316420]  ;;  %v4856_v63 = vpack.i.bf16 %v6265_v4, %v6263_v33 }
 0x298   : > { %2502 = vst [vmem:[#allocation2 + $0x140] sm:$0xf0] %v2460_v26  ;;  %v4650_v60 = vunpack.i.h.bf16 %v4648_v31  ;;  %v4649_v25 = vunpack.i.l.bf16 %v4648_v31  ;;  %v4846_v45 = vpack.i.bf16 %v3097_v28, %v3096_v1  ;;  %v3042_v56 = vld [vmem:[%s4973_s17 + $0x2c] sm:$0xf]  ;;  %v4866_v31 = vpack.i.bf16 %v6368_v51, %v6361_v50 }
 0x299   : > { %4822 = vrot.lane.b32.xlu2 %v4821_v13, %s4934_s4  ;;  %2509 = vst [vmem:[#allocation2 + $0x348] sm:$0xf0] %v2467_v23  ;;  %v3053_v8 = vunpack.c.l.bf16 %v3042_v56 }
 0x29a   : > { %v6573_v0 = vpop.permute.xlu2 %4687  ;;  %2343 = vst [vmem:[#allocation2 + $0x268] sm:$0xf] %v2301_v32  ;;  %v2458_v59 = vsel %vm2456_vm12, %v4650_v60, %v4654_v44  ;;  %v2457_v54 = vsel %vm2456_vm12, %v4649_v25, %v4650_v60  ;;  %v4861_v25 = vpack.i.bf16 %v6359_v57, %v6357_v46 }
 0x29b   : > { %v4668_v10 = vpop.permute.xlu1 %4667  ;;  %4827 = vrot.lane.b32.xlu0 %v4826_v39, %s4934_s4  ;;  %2341 = vst [vmem:[#allocation2 + $0x350] sm:$0xf] %v2299_v12  ;;  %v4690_v6 = vunpack.i.h.bf16 %v6573_v0  ;;  %v4689_v38 = vunpack.i.l.bf16 %v6573_v0 }
 0x29c   : > { %4812 = vrot.lane.b32.xlu1 %v4811_v14, %s4935_s5  ;;  %v4670_v30 = vunpack.i.h.bf16 %v4668_v10  ;;  %v4669_v27 = vunpack.i.l.bf16 %v4668_v10  ;;  %2342 = vst [vmem:[#allocation2 + $0x390] sm:$0xf] %v2300_v37 }
 0x29d   : > { %v3091_v55 = vld.sshfl [vmem:[#allocation1 + $0x30] sm:$0xff pattern:$0x75316420]  ;;  %v3092_v9 = vld.sshfl [vmem:[#allocation1 + $0x38] sm:$0xff pattern:$0x75316420]  ;;  %v2473_v15 = vsel %vm2456_vm12, %v4689_v38, %v4690_v6 }
 0x29e   : > { %v2466_v17 = vsel %vm2456_vm12, %v4670_v30, %v4674_v43  ;;  %v4841_v3 = vpack.i.bf16 %v3092_v9, %v3091_v55  ;;  %2500 = vst [vmem:[#allocation2 + $0x148] sm:$0xf0] %v2458_v59  ;;  %v2465_v62 = vsel %vm2456_vm12, %v4669_v27, %v4670_v30 }
 0x29f   : > { %2499 = vst [vmem:[#allocation2 + $0x168] sm:$0xf0] %v2457_v54  ;;  %v4663_v22 = vpop.permute.xlu0 %4662 }
 0x2a0   : > { %2508 = vst [vmem:[#allocation2 + $0x508] sm:$0xf0] %v2466_v17  ;;  %v4665_v34 = vunpack.i.h.bf16 %v4663_v22  ;;  %v4664_v53 = vunpack.i.l.bf16 %v4663_v22 }
 0x2a1   : > { %4837 = vrot.lane.b32.xlu2 %v4836_v35, %s4936_s6  ;;  %2507 = vst [vmem:[#allocation2 + $0x380] sm:$0xf0] %v2465_v62 }
 0x2a2   : > { %v4693_v35 = vpop.permute.xlu2 %4692  ;;  %2515 = vst [vmem:[#allocation2 + $0x390] sm:$0xf0] %v2473_v15  ;;  %v2462_v44 = vsel %vm2456_vm12, %v4660_v29, %v4664_v53  ;;  %v2463_v43 = vsel %vm2456_vm12, %v4664_v53, %v4665_v34  ;;  %v2464_v13 = vsel %vm2456_vm12, %v4665_v34, %v4669_v27  ;;  %v4871_v27 = vpack.i.bf16 %v6431_v41, %v6428_v36 }
 0x2a3   : > { %v4683_v52 = vpop.permute.xlu1 %4682  ;;  %4842 = vrot.lane.b32.xlu0 %v4841_v3, %s4937_s7  ;;  %v4695_v16 = vunpack.i.h.bf16 %v4693_v35  ;;  %v4694_v11 = vunpack.i.l.bf16 %v4693_v35  ;;  %3094 = vst [vmem:[#allocation1 + $0x11] ss:$2 sm:$0xff] %v6187_v7 }
 0x2a4   : > { %4832 = vrot.lane.b32.xlu1 %v4831_v40, %s4936_s6  ;;  %v4685_v21 = vunpack.i.h.bf16 %v4683_v52  ;;  %v4684_v20 = vunpack.i.l.bf16 %v4683_v52  ;;  %2504 = vst [vmem:[#allocation2 + $0x400] sm:$0xf0] %v2462_v44 }
 0x2a5   : > { %2505 = vst [vmem:[#allocation2 + $0x3b8] sm:$0xf0] %v2463_v43  ;;  %v2629_v58 = vsel %vm2628_vm13, %v4694_v11, %v4695_v16  ;;  %v7058_v11 = vld [vmem:[#allocation3_spill] sm:$0xff] }
 0x2a6   : > { %v2471_v14 = vsel %vm2456_vm12, %v4684_v20, %v4685_v21  ;;  %v2472_v5 = vsel %vm2456_vm12, %v4685_v21, %v4689_v38  ;;  %2506 = vst [vmem:[#allocation2 + $0x180] sm:$0xf0] %v2464_v13 }
 0x2a7   : > { %2513 = vst [vmem:[#allocation2 + $0x280] sm:$0xf0] %v2471_v14  ;;  %v4678_v7 = vpop.permute.xlu0 %4677 }
 0x2a8   : > { %2514 = vst [vmem:[#allocation2 + $0x350] sm:$0xf0] %v2472_v5  ;;  %v4680_v33 = vunpack.i.h.bf16 %v4678_v7  ;;  %v4679_v4 = vunpack.i.l.bf16 %v4678_v7  ;;  %v7062_v5 = vld [vmem:[#allocation9_spill] sm:$0xff] }
 0x2a9   : > { %4852 = vrot.lane.b32.xlu2 %v4851_v48, %s4935_s5  ;;  %2671 = vst [vmem:[#allocation2 + $0x1a8] sm:$0xf] %v2629_v58  ;;  %v4891_v48 = vpack.i.bf16 %v7058_v11, %v6200_v61 }
 0x2aa   : > { %v4698_v23 = vpop.permute.xlu2 %4697  ;;  %3095 = vst [vmem:[#allocation1 + $0x21] ss:$2 sm:$0xff] %v3053_v8  ;;  %v2468_v10 = vsel %vm2456_vm12, %v4675_v19, %v4679_v4  ;;  %v2469_v37 = vsel %vm2456_vm12, %v4679_v4, %v4680_v33  ;;  %v2470_v60 = vsel %vm2456_vm12, %v4680_v33, %v4684_v20  ;;  %v3098_v42 = vld.sshfl [vmem:[#allocation1 + $0x10] sm:$0xff pattern:$0x75316420]  ;;  %v4896_v20 = vpack.i.bf16 %v6197_v18, %v6195_v2 }
 0x2ab   : > { %v4713_v29 = vpop.permute.xlu1 %4712  ;;  %4857 = vrot.lane.b32.xlu0 %v4856_v63, %s4935_s5  ;;  %v4700_v32 = vunpack.i.h.bf16 %v4698_v23  ;;  %v4699_v12 = vunpack.i.l.bf16 %v4698_v23  ;;  %2510 = vst [vmem:[#allocation2 + $0x4f8] sm:$0xf0] %v2468_v10  ;;  %v3099_v19 = vld.sshfl [vmem:[#allocation1 + $0x18] sm:$0xff pattern:$0x75316420] }
 0x2ac   : > { %4847 = vrot.lane.b32.xlu1 %v4846_v45, %s4937_s7  ;;  %v4715_v39 = vunpack.i.h.bf16 %v4713_v29  ;;  %v4714_v26 = vunpack.i.l.bf16 %v4713_v29  ;;  %2511 = vst [vmem:[#allocation2 + $0x4b8] sm:$0xf0] %v2469_v37  ;;  %v4881_v55 = vpack.i.bf16 %v3099_v19, %v3098_v42  ;;  %v7061_v63 = vld [vmem:[#allocation8_spill] sm:$0xff] }
 0x2ad   : > { %v2630_v50 = vsel %vm2628_vm13, %v4695_v16, %v4699_v12  ;;  %2512 = vst [vmem:[#allocation2 + $0x1c0] sm:$0xf0] %v2470_v60  ;;  %v2631_v51 = vsel %vm2628_vm13, %v4699_v12, %v4700_v32  ;;  %v4906_v58 = vpack.i.bf16 %v7062_v5, %v7061_v63  ;;  %v7064_v12 = vld [vmem:[#allocation10_spill] sm:$0xff]  ;;  %v3316_v5 = vld [vmem:[#allocation2 + $0x78] sm:$0xff] }
 0x2ae   : > { %v2804_v30 = vsel %vm2801_vm14, %v4714_v26, %v4715_v39  ;;  %2672 = vst [vmem:[#allocation2 + $0x228] sm:$0xf] %v2630_v50 }
 0x2af   : > { %2846 = vst [vmem:[#allocation2 + $0x68] sm:$0xf0] %v2804_v30  ;;  %v4703_v46 = vpop.permute.xlu0 %4702  ;;  %v3352_v0 = vld [vmem:[#allocation2 + $0x350] sm:$0xff] }
 0x2b0   : > { %2673 = vst [vmem:[#allocation2 + $0x68] sm:$0xf] %v2631_v51  ;;  %v4705_v36 = vunpack.i.h.bf16 %v4703_v46  ;;  %v4704_v41 = vunpack.i.l.bf16 %v4703_v46 }
 0x2b1   : > { %4867 = vrot.lane.b32.xlu2 %v4866_v31, %s4934_s4  ;;  %v3100_v59 = vld.sshfl [vmem:[#allocation1 + $0x20] sm:$0xff pattern:$0x75316420]  ;;  %v3101_v38 = vld.sshfl [vmem:[#allocation1 + $0x28] sm:$0xff pattern:$0x75316420] }
 0x2b2   : > { %v6626_v57 = vpop.permute.xlu2 %4717  ;;  %v2803_v9 = vsel %vm2801_vm14, %v4705_v36, %v4714_v26  ;;  %v2802_v62 = vsel %vm2801_vm14, %v4704_v41, %v4705_v36  ;;  %v4886_v15 = vpack.i.bf16 %v3101_v38, %v3100_v59  ;;  %v7063_v26 = vld [vmem:[#allocation6_spill] sm:$0xff]  ;;  %v7065_v36 = vld [vmem:[#allocation11_spill] sm:$0xff] }
 0x2b3   : > { %4872 = vrot.lane.b32.xlu0 %v4871_v27, %s4936_s6  ;;  %v4720_v40 = vunpack.i.h.bf16 %v6626_v57  ;;  %v4719_v54 = vunpack.i.l.bf16 %v6626_v57  ;;  %2845 = vst [vmem:[#allocation2 + $0x228] sm:$0xf0] %v2803_v9  ;;  %v7066_v41 = vld [vmem:[#allocation7_spill] sm:$0xff] }
 0x2b4   : > { %4862 = vrot.lane.b32.xlu1 %v4861_v25, %s4934_s4  ;;  %2844 = vst [vmem:[#allocation2 + $0x1a8] sm:$0xf0] %v2802_v62 }
 0x2b5   : > { %v2805_v17 = vsel %vm2801_vm14, %v4715_v39, %v4719_v54  ;;  %v2806_v3 = vsel %vm2801_vm14, %v4719_v54, %v4720_v40 }
 0x2b6   : > { %2847 = vst [vmem:[#allocation2 + $0x560] sm:$0xf0] %v2805_v17 }
 0x2b7   : > { %2848 = vst [vmem:[#allocation2 + $0x468] sm:$0xf0] %v2806_v3  ;;  %v4708_v34 = vpop.permute.xlu0 %4707 }
 0x2b8   : > { %v4710_v53 = vunpack.i.h.bf16 %v4708_v34  ;;  %v4709_v21 = vunpack.i.l.bf16 %v4708_v34 }
 0x2b9   : > { %4882 = vrot.lane.b32.xlu2 %v4881_v55, %s4937_s7 }
 0x2ba   : > { %v2632_v35 = vsel %vm2628_vm13, %v4700_v32, %v4709_v21  ;;  %v2633_v16 = vsel %vm2628_vm13, %v4709_v21, %v4710_v53 }
 0x2bb   : > { %4887 = vrot.lane.b32.xlu0 %v4886_v15, %s4937_s7  ;;  %2674 = vst [vmem:[#allocation2 + $0x560] sm:$0xf] %v2632_v35 }
 0x2bc   : > { %4877 = vrot.lane.b32.xlu1 %v4876_v49, %s4936_s6  ;;  %v4901_v49 = vpack.i.bf16 %v7060_v24, %v7059_v47  ;;  %2675 = vst [vmem:[#allocation2 + $0x468] sm:$0xf] %v2633_v16 }
 0x2c1   : > { %v6636_v1 = vpop.permute.xlu1 %4732  ;;  %4897 = vrot.lane.b32.xlu2 %v4896_v20, %s4933_s30 }
 0x2c2   : > { %v4735_v22 = vunpack.i.h.bf16 %v6636_v1  ;;  %v4734_v52 = vunpack.i.l.bf16 %v6636_v1 }
 0x2c3   : > { %v4723_v45 = vpop.permute.xlu0 %4722  ;;  %4902 = vrot.lane.b32.xlu0 %v4901_v49, %s4935_s5 }
 0x2c4   : > { %v2976_v28 = vsel %vm2973_vm15, %v4734_v52, %v4735_v22  ;;  %4892 = vrot.lane.b32.xlu1 %v4891_v48, %s4933_s30  ;;  %v4725_v61 = vunpack.i.h.bf16 %v4723_v45  ;;  %v4724_v14 = vunpack.i.l.bf16 %v4723_v45 }
 0x2c5   : > { %3018 = vst [vmem:[#allocation2 + $0x3e0] sm:$0xf] %v2976_v28 }
 0x2c6   : > { %v4738_v56 = vpop.permute.xlu2 %4737  ;;  %v2980_v29 = vsel %vm2973_vm15, %v4724_v14, %v4725_v61 }
 0x2c7   : > { %v4740_v8 = vunpack.i.h.bf16 %v4738_v56  ;;  %v4739_v7 = vunpack.i.l.bf16 %v4738_v56  ;;  %3022 = vst [vmem:[#allocation2 + $0x80] sm:$0xf] %v2980_v29 }
 0x2c9   : > { %v4748_v44 = vpop.permute.xlu1 %4747  ;;  %v2977_v33 = vsel %vm2973_vm15, %v4735_v22, %v4739_v7  ;;  %v2978_v4 = vsel %vm2973_vm15, %v4739_v7, %v4740_v8  ;;  %v2979_v39 = vsel %vm2973_vm15, %v4740_v8, %v4724_v14  ;;  %4907 = vrot.lane.b32.xlu2 %v4906_v58, %s4934_s4 }
 0x2ca   : > { %v4750_v43 = vunpack.i.h.bf16 %v4748_v44  ;;  %v4749_v13 = vunpack.i.l.bf16 %v4748_v44  ;;  %3019 = vst [vmem:[#allocation2 + $0x538] sm:$0xf] %v2977_v33 }
 0x2cb   : > { %3020 = vst [vmem:[#allocation2 + $0x238] sm:$0xf] %v2978_v4  ;;  %v4728_v32 = vpop.permute.xlu0 %4727  ;;  %2797 = vrot.lane.b32.xlu0 %v7064_v12, %s4934_s4  ;;  %v3359_v12 = vld [vmem:[#allocation2 + $0x228] sm:$0xff] }
 0x2cc   : > { %v2635_v2 = vsel %vm2628_vm13, %v4749_v13, %v4750_v43  ;;  %v2634_v18 = vsel %vm2628_vm13, %v4710_v53, %v4749_v13  ;;  %2624 = vrot.lane.b32.xlu1 %v7063_v26, %s4935_s5  ;;  %3021 = vst [vmem:[#allocation2 + $0xc0] sm:$0xf] %v2979_v39  ;;  %v4730_v37 = vunpack.i.h.bf16 %v4728_v32  ;;  %v4729_v60 = vunpack.i.l.bf16 %v4728_v32  ;;  %v3295_v39 = vld [vmem:[#allocation2 + $0x528] sm:$0xff] }
 0x2cd   : > { %2677 = vst [vmem:[#allocation2 + $0x208] sm:$0xf] %v2635_v2  ;;  %v3337_v2 = vld [vmem:[#allocation2 + $0x168] sm:$0xff] }
 0x2ce   : > { %2676 = vst [vmem:[#allocation2 + $0x3e8] sm:$0xf] %v2634_v18  ;;  %v6671_v25 = vpop.permute.xlu2 %4742  ;;  %v2975_v42 = vsel %vm2973_vm15, %v4730_v37, %v4734_v52  ;;  %v2974_v46 = vsel %vm2973_vm15, %v4729_v60, %v4730_v37  ;;  %v3360_v37 = vld [vmem:[#allocation2 + $0x68] sm:$0xff] }
 0x2cf   : > { %v4745_v30 = vunpack.i.h.bf16 %v6671_v25  ;;  %v4744_v27 = vunpack.i.l.bf16 %v6671_v25  ;;  %3017 = vst [vmem:[#allocation2 + $0xb8] sm:$0xf] %v2975_v42  ;;  %v3338_v60 = vld [vmem:[#allocation2 + $0x148] sm:$0xff] }
 0x2d0   : > { %3016 = vst [vmem:[#allocation2 + $0x340] sm:$0xf] %v2974_v46  ;;  %v3339_v42 = vld [vmem:[#allocation2 + $0x2c8] sm:$0xff] }
 0x2d1   : > { %v4763_v23 = vpop.permute.xlu1 %4762  ;;  %v3153_v19 = vsel %vm3146_vm0, %v4744_v27, %v4745_v30  ;;  %2799 = vrot.lane.b32.xlu2 %v7065_v36, %s4934_s4  ;;  %v3232_v36 = vld [vmem:[#allocation2 + $0x100] sm:$0xff] }
 0x2d2   : > { %v4765_v31 = vunpack.i.h.bf16 %v4763_v23  ;;  %v4764_v10 = vunpack.i.l.bf16 %v4763_v23  ;;  %3195 = vst [vmem:[#allocation2 + $0x80] sm:$0xf0] %v3153_v19  ;;  %v3442_v23 = vpack.c.bf16 %v3316_v5, %v3295_v39 }
 0x2d3   : > { %v6688_v59 = vpop.permute.xlu0 %4757 }
 0x2d4   : > { %v2981_v50 = vsel %vm2973_vm15, %v4725_v61, %v4764_v10  ;;  %v2982_v51 = vsel %vm2973_vm15, %v4764_v10, %v4765_v31  ;;  %2626 = vrot.lane.b32.xlu1 %v7066_v41, %s4935_s5  ;;  %v4760_v38 = vunpack.i.h.bf16 %v6688_v59  ;;  %v4759_v54 = vunpack.i.l.bf16 %v6688_v59 }
 0x2d5   : > { %3023 = vst [vmem:[#allocation2 + $0xf8] sm:$0xf] %v2981_v50  ;;  %v3253_v50 = vld [vmem:[#allocation2 + $0x5b8] sm:$0xff]  ;;  %v3465_v41 = vpack.c.bf16 %v3360_v37, %v3339_v42 }
 0x2d6   : > { %3024 = vst [vmem:[#allocation2 + $0x2d8] sm:$0xf] %v2982_v51  ;;  %v6692_v55 = vpop.permute.xlu2 %4752  ;;  %v2807_v3 = vsel %vm2801_vm14, %v4720_v40, %v4759_v54  ;;  %v2808_v62 = vsel %vm2801_vm14, %v4759_v54, %v4760_v38  ;;  %v3464_v51 = vpack.c.bf16 %v3359_v12, %v3338_v60  ;;  %v3317_v54 = vld [vmem:[#allocation2 + $0x220] sm:$0xff] }
 0x2d7   : > { %v4755_v9 = vunpack.i.h.bf16 %v6692_v55  ;;  %v4754_v17 = vunpack.i.l.bf16 %v6692_v55  ;;  %2849 = vst [vmem:[#allocation2 + $0x3e8] sm:$0xf0] %v2807_v3  ;;  %v3505_v55 = vld [vmem:[%s7037_s2] sm:$0xff] }
 0x2d8   : > { %2850 = vst [vmem:[#allocation2 + $0x208] sm:$0xf0] %v2808_v62 }
 0x2d9   : > { %v2636_v15 = vsel %vm2628_vm13, %v4750_v43, %v4754_v17  ;;  %v2637_v1 = vsel %vm2628_vm13, %v4754_v17, %v4755_v9  ;;  %v3358_v43 = vld [vmem:[#allocation2 + $0x1a8] sm:$0xff] }
 0x2da   : > { %2678 = vst [vmem:[#allocation2 + $0x568] sm:$0xf] %v2636_v15  ;;  %v3463_v14 = vpack.c.bf16 %v3358_v43, %v3337_v2  ;;  %v3318_v15 = vld [vmem:[#allocation2 + $0x128] sm:$0xff] }
 0x2db   : > { %2679 = vst [vmem:[#allocation2 + $0x2a8] sm:$0xf] %v2637_v1 }
 0x2dd   : > { %v4768_v22 = vpop.permute.xlu1 %4767 }
 0x2de   : > { %v4770_v52 = vunpack.i.h.bf16 %v4768_v22  ;;  %v4769_v28 = vunpack.i.l.bf16 %v4768_v22  ;;  %v4788_v57 = vpop.permute.xlu2 %4787  ;;  %v3363_v25 = vld [vmem:[#allocation2 + $0x3e8] sm:$0xff] }
 0x2df   : > { %v4790_v34 = vunpack.i.h.bf16 %v4788_v57  ;;  %v4789_v53 = vunpack.i.l.bf16 %v4788_v57 }
 0x2e0   : > { %v3147_v40 = vsel %vm3146_vm0, %v4769_v28, %v4770_v52  ;;  %v3296_v28 = vld [vmem:[#allocation2 + $0x1e8] sm:$0xff] }
 0x2e1   : > { %3189 = vst [vmem:[#allocation2 + $0x340] sm:$0xf0] %v3147_v40  ;;  %v2983_v21 = vsel %vm2973_vm15, %v4765_v31, %v4789_v53  ;;  %v2984_v20 = vsel %vm2973_vm15, %v4789_v53, %v4790_v34  ;;  %v3274_v31 = vld [vmem:[#allocation2 + $0x5c8] sm:$0xff]  ;;  %v3297_v53 = vld [vmem:[#allocation2 + $0x398] sm:$0xff] }
 0x2e2   : > { %3025 = vst [vmem:[#allocation2 + $0x370] sm:$0xf] %v2983_v21  ;;  %v6709_v35 = vpop.permute.xlu0 %4772  ;;  %v3421_v46 = vpack.c.bf16 %v3274_v31, %v3253_v50  ;;  %v3213_v31 = vld [vmem:[#allocation2 + $0x4d8] sm:$0xff] }
 0x2e3   : > { %3026 = vst [vmem:[#allocation2 + $0x2f8] sm:$0xf] %v2984_v20  ;;  %v4775_v16 = vunpack.i.h.bf16 %v6709_v35  ;;  %v4774_v11 = vunpack.i.l.bf16 %v6709_v35 }
 0x2e5   : > { %v3148_v48 = vsel %vm3146_vm0, %v4770_v52, %v4774_v11  ;;  %v3149_v47 = vsel %vm3146_vm0, %v4774_v11, %v4775_v16  ;;  %v3211_v52 = vld [vmem:[#allocation2 + $0x2b0] sm:$0xff] }
 0x2e6   : > { %3190 = vst [vmem:[#allocation2 + $0xb8] sm:$0xf0] %v3148_v48  ;;  %v3400_v40 = vpack.c.bf16 %v3232_v36, %v3211_v52  ;;  %v3444_v48 = vpack.c.bf16 %v3318_v15, %v3297_v53  ;;  %v3361_v15 = vld [vmem:[#allocation2 + $0x560] sm:$0xff] }
 0x2e7   : > { %3191 = vst [vmem:[#allocation2 + $0x3e0] sm:$0xf0] %v3149_v47  ;;  %v3275_v47 = vld [vmem:[#allocation2 + $0x258] sm:$0xff] }
 0x2e8   : > { %v3379_v24 = vld [vmem:[#allocation2 + $0x340] sm:$0xff] }
 0x2e9   : > { %v3484_v49 = vpack.c.bf16 %v3379_v24, %v3379_v24  ;;  %v3276_v24 = vld [vmem:[#allocation2 + $0x430] sm:$0xff] }
 0x2ea   : > { %v6718_v13 = vpop.permute.xlu0 %4792 }
 0x2eb   : > { %v3517_v44 = vsel %vm3515_vm1, %v3484_v49, 0  ;;  %v4795_v18 = vunpack.i.h.bf16 %v6718_v13  ;;  %v4794_v45 = vunpack.i.l.bf16 %v6718_v13  ;;  %v6722_v61 = vpop.permute.xlu2 %4817  ;;  %v6754_v49 = vld [vmem:[%s7036_s1] sm:$0xf] }
 0x2ec   : > { %3582 = vmatpush.bf16.msra.mxu0 %v3517_v44  ;;  %v4820_v56 = vunpack.i.h.bf16 %v6722_v61  ;;  %v4819_v63 = vunpack.i.l.bf16 %v6722_v61  ;;  %v3255_v44 = vld [vmem:[#allocation2 + $0x478] sm:$0xff] }
 0x2ed   : > { %v2985_v58 = vsel %vm2973_vm15, %v4790_v34, %v4794_v45  ;;  %v2986_v8 = vsel %vm2973_vm15, %v4794_v45, %v4795_v18  ;;  %v3380_v7 = vld [vmem:[#allocation2 + $0xb8] sm:$0xff]  ;;  %v3443_v34 = vpack.c.bf16 %v3317_v54, %v3296_v28  ;;  %v3423_v2 = vpack.c.bf16 %v3276_v24, %v3255_v44  ;;  %v3233_v45 = vld [vmem:[#allocation2 + $0x8] sm:$0xff] }
 0x2ee   : > { %3027 = vst [vmem:[#allocation2 + $0x288] sm:$0xf] %v2985_v58  ;;  %v3485_v29 = vpack.c.bf16 %v3380_v7, %v3380_v7  ;;  %v3381_v33 = vld [vmem:[#allocation2 + $0x3e0] sm:$0xff]  ;;  %v3159_v4 = vsel %vm3146_vm0, %v4819_v63, %v4820_v56  ;;  %v3343_v28 = vld [vmem:[#allocation2 + $0x3b8] sm:$0xff] }
 0x2ef   : > { %3028 = vst [vmem:[#allocation2 + $0x70] sm:$0xf] %v2986_v8  ;;  %v3486_v26 = vpack.c.bf16 %v3381_v33, %v3381_v33  ;;  %v3234_v8 = vld [vmem:[#allocation2 + $0x188] sm:$0xff]  ;;  %v3303_v61 = vld [vmem:[#allocation2 + $0x498] sm:$0xff] }
 0x2f0   : > { %3583 = vmatpush.bf16.msra.mxu0 %v3463_v14  ;;  %3201 = vst [vmem:[#allocation2 + $0x70] sm:$0xf0] %v3159_v4  ;;  %v3520_v32 = vsel %vm3515_vm1, %v3485_v29, 0  ;;  %v3212_v4 = vld [vmem:[#allocation2 + $0x3b0] sm:$0xff]  ;;  %v3402_v50 = vpack.c.bf16 %v3234_v8, %v3213_v31 }
 0x2f1   : > { %3595 = vmatpush.bf16.msra.mxu1 %v3520_v32  ;;  %v3523_v10 = vsel %vm3515_vm1, %v3486_v26, 0  ;;  %v3401_v12 = vpack.c.bf16 %v3233_v45, %v3212_v4 }
 0x2f2   : > { %3608 = vmatpush.bf16.msra.mxu2 %v3523_v10 }
 0x2f3   : > { %v6737_v19 = vpop.permute.xlu2 %4822 }
 0x2f4   : > { %3584 = vmatpush.bf16.msra.mxu0 %v3442_v23  ;;  %v4825_v3 = vunpack.i.h.bf16 %v6737_v19  ;;  %v4824_v62 = vunpack.i.l.bf16 %v6737_v19 }
 0x2f5   : > { %3596 = vmatpush.bf16.msra.mxu1 %v3464_v51 }
 0x2f6   : > { %v4778_v17 = vpop.permute.xlu1 %4777  ;;  %3609 = vmatpush.bf16.msra.mxu2 %v3465_v41  ;;  %v2812_v57 = vsel %vm2801_vm14, %v4824_v62, %v4825_v3 }
 0x2f7   : > { %v4780_v1 = vunpack.i.h.bf16 %v4778_v17  ;;  %v4779_v22 = vunpack.i.l.bf16 %v4778_v17  ;;  %2854 = vst [vmem:[#allocation2 + $0x150] sm:$0xf0] %v2812_v57  ;;  %v3364_v17 = vld [vmem:[#allocation2 + $0x208] sm:$0xff] }
 0x2f8   : > { %3585 = vmatpush.bf16.msra.mxu0 %v3421_v46 }
 0x2f9   : > { %v3152_v21 = vsel %vm3146_vm0, %v4780_v1, %v4744_v27  ;;  %v3151_v20 = vsel %vm3146_vm0, %v4779_v22, %v4780_v1  ;;  %v3150_v11 = vsel %vm3146_vm0, %v4775_v16, %v4779_v22  ;;  %3597 = vmatpush.bf16.msra.mxu1 %v3443_v34  ;;  %v3254_v27 = vld [vmem:[#allocation2 + $0xa0] sm:$0xff]  ;;  %v3362_v22 = vld [vmem:[#allocation2 + $0x468] sm:$0xff] }
 0x2fa   : > { %3194 = vst [vmem:[#allocation2 + $0xc0] sm:$0xf0] %v3152_v21  ;;  %3610 = vmatpush.bf16.msra.mxu2 %v3444_v48  ;;  %v3422_v35 = vpack.c.bf16 %v3275_v47, %v3254_v27  ;;  %v3385_v16 = vld [vmem:[#allocation2 + $0x80] sm:$0xff] }
 0x2fb   : > { %3193 = vst [vmem:[#allocation2 + $0x238] sm:$0xf0] %v3151_v20  ;;  %v6756_v43 = vpop.permute.xlu2 %4837  ;;  %v3490_v39 = vpack.c.bf16 %v3385_v16, %v3385_v16  ;;  %v3340_v34 = vld [vmem:[#allocation2 + $0x140] sm:$0xff]  ;;  %v3322_v16 = vld [vmem:[#allocation2 + $0x438] sm:$0xff] }
 0x2fc   : > { %3586 = vmatpush.bf16.msra.mxu0 %v3400_v40  ;;  %3192 = vst [vmem:[#allocation2 + $0x538] sm:$0xf0] %v3150_v11  ;;  %v4840_v5 = vunpack.i.h.bf16 %v6756_v43  ;;  %v4839_v58 = vunpack.i.l.bf16 %v6756_v43  ;;  %v3342_v20 = vld [vmem:[#allocation2 + $0x400] sm:$0xff]  ;;  %v3469_v11 = vpack.c.bf16 %v3364_v17, %v3343_v28  ;;  %v3466_v24 = vpack.c.bf16 %v3361_v15, %v3340_v34  ;;  %v3259_v17 = vld [vmem:[#allocation2 + $0x4a8] sm:$0xff]  ;;  %v3256_v15 = vld [vmem:[#allocation2 + $0x110] sm:$0xff] }
 0x2fd   : > { %3598 = vmatpush.bf16.msra.mxu1 %v3422_v35  ;;  %v6762_v33 = vpop.permute.xlu0 %4797  ;;  %v3535_v54 = vsel %vm3515_vm1, %v3490_v39, 0  ;;  %v3341_v27 = vld [vmem:[#allocation2 + $0x160] sm:$0xff]  ;;  %v3468_v44 = vpack.c.bf16 %v3363_v25, %v3342_v20  ;;  %v3320_v39 = vld [vmem:[#allocation2 + $0x518] sm:$0xff] }
 0x2fe   : > { %v4783_v14 = vpop.permute.xlu1 %4782  ;;  %3611 = vmatpush.bf16.msra.mxu2 %v3423_v2  ;;  %v2990_v26 = vsel %vm2973_vm15, %v4839_v58, %v4840_v5  ;;  %v4800_v23 = vunpack.i.h.bf16 %v6762_v33  ;;  %v4799_v32 = vunpack.i.l.bf16 %v6762_v33  ;;  %v3467_v2 = vpack.c.bf16 %v3362_v22, %v3341_v27  ;;  %v3258_v22 = vld [vmem:[#allocation2 + $0x3d0] sm:$0xff]  ;;  %v3306_v43 = vld [vmem:[#allocation2 + $0x20] sm:$0xff] }
 0x2ff   : > { %3935 = vmatmul.msk.bf16.vlgmr.msra.gmra.mxu0 %vm3511_vm2, %v6754_v49  ;;  %v4785_v7 = vunpack.i.h.bf16 %v4783_v14  ;;  %v4784_v29 = vunpack.i.l.bf16 %v4783_v14  ;;  %3032 = vst [vmem:[#allocation2 + $0x230] sm:$0xf] %v2990_v26  ;;  %v3301_v26 = vld [vmem:[#allocation2 + $0x4e8] sm:$0xff] }
 0x300   : > { %v3154_v46 = vsel %vm3146_vm0, %v4745_v30, %v4799_v32  ;;  %v3448_v31 = vpack.c.bf16 %v3322_v16, %v3301_v26 }
 0x301   : > { %v2809_v10 = vsel %vm2801_vm14, %v4760_v38, %v4784_v29  ;;  %v2810_v37 = vsel %vm2801_vm14, %v4784_v29, %v4785_v7  ;;  %v2811_v60 = vsel %vm2801_vm14, %v4785_v7, %v4824_v62  ;;  %v3384_v51 = vld [vmem:[#allocation2 + $0xc0] sm:$0xff]  ;;  %3599 = vmatpush.bf16.msra.mxu1 %v3401_v12  ;;  %v3155_v38 = vsel %vm3146_vm0, %v4799_v32, %v4800_v23 }
 0x302   : > { %2851 = vst [vmem:[#allocation2 + $0x568] sm:$0xf0] %v2809_v10  ;;  %v3383_v42 = vld [vmem:[#allocation2 + $0x238] sm:$0xff]  ;;  %v3489_v36 = vpack.c.bf16 %v3384_v51, %v3384_v51  ;;  %3612 = vmatpush.bf16.msra.mxu2 %v3402_v50  ;;  %v3321_v7 = vld [vmem:[#allocation2 + $0x420] sm:$0xff]  ;;  %v3300_v10 = vld [vmem:[#allocation2 + $0x1c8] sm:$0xff]  ;;  %v4938_v51 = vmov 0  }
 0x303   : > { %2852 = vst [vmem:[#allocation2 + $0x2a8] sm:$0xf0] %v2810_v37  ;;  %v3382_v41 = vld [vmem:[#allocation2 + $0x538] sm:$0xff]  ;;  %v3488_v59 = vpack.c.bf16 %v3383_v42, %v3383_v42  ;;  %v6783_v52 = vpop.permute.xlu2 %4852  ;;  %v3319_v32 = vld [vmem:[#allocation2 + $0x240] sm:$0xff]  ;;  %v3447_v50 = vpack.c.bf16 %v3321_v7, %v3300_v10  ;;  %4911 = vset.pattern.permute.xlu0 %v4938_v51 }
 0x304   : > { %2853 = vst [vmem:[#allocation2 + $0x1b0] sm:$0xf0] %v2811_v60  ;;  %v3487_v62 = vpack.c.bf16 %v3382_v41, %v3382_v41  ;;  %v3532_v1 = vsel %vm3515_vm1, %v3489_v36, 0  ;;  %v4855_v53 = vunpack.i.h.bf16 %v6783_v52  ;;  %v4854_v21 = vunpack.i.l.bf16 %v6783_v52  ;;  %3936 = vmatmul.msk.bf16.vlgmr.msra.gmra.mxu1 %vm3511_vm2, %v6754_v49  ;;  %v3280_v37 = vld [vmem:[#allocation2 + $0x578] sm:$0xff]  ;;  %v3278_v60 = vld [vmem:[#allocation2 + $0x90] sm:$0xff]  ;;  %3508 = vperm.xlu0 %4911, %v3505_v55   ;;  %v3219_v52 = vld [vmem:[#allocation2 + $0x108] sm:$0xff] }
 0x305   : > { %v3529_v30 = vsel %vm3515_vm1, %v3488_v59, 0  ;;  %3196 = vst [vmem:[#allocation2 + $0xf8] sm:$0xf0] %v3154_v46  ;;  %3647 = vmatpush.bf16.msrb.mxu1 %v3532_v1  ;;  %3937 = vmatmul.msk.bf16.vlgmr.msra.gmra.mxu2 %vm3511_vm2, %v6754_v49  ;;  %v6790_v35 = vpop.permute.xlu0 %4802  ;;  %v3277_v46 = vld [vmem:[#allocation2 + $0x480] sm:$0xff]  ;;  %v3279_v36 = vld [vmem:[#allocation2 + $0x1f8] sm:$0xff]  ;;  %v3427_v28 = vpack.c.bf16 %v3280_v37, %v3259_v17 }
 0x306   : > { %3660 = vmatpush.bf16.msrb.mxu2 %v3535_v54  ;;  %v4808_v57 = vpop.permute.xlu1 %4807  ;;  %v3526_v40 = vsel %vm3515_vm1, %v3487_v62, 0  ;;  %3634 = vmatpush.bf16.msrb.mxu0 %v3529_v30  ;;  %3197 = vst [vmem:[#allocation2 + $0x2d8] sm:$0xf0] %v3155_v38  ;;  %v2643_v45 = vsel %vm2628_vm13, %v4854_v21, %v4855_v53  ;;  %v4805_v14 = vunpack.i.h.bf16 %v6790_v35  ;;  %v4804_v8 = vunpack.i.l.bf16 %v6790_v35  ;;  %v3257_v59 = vld [vmem:[#allocation2 + $0x3d8] sm:$0xff] }
 0x307   : > { %v4810_v48 = vunpack.i.h.bf16 %v4808_v57  ;;  %v4809_v47 = vunpack.i.l.bf16 %v4808_v57  ;;  %3621 = vmatpush.bf16.msra.mxu3 %v3526_v40  ;;  %2685 = vst [vmem:[#allocation2 + $0x310] sm:$0xf] %v2643_v45  ;;  %v3425_v1 = vpack.c.bf16 %v3278_v60, %v3257_v59  ;;  %v3424_v34 = vpack.c.bf16 %v3277_v46, %v3256_v15 }
 0x308   : > { %v2638_v12 = vsel %vm2628_vm13, %v4755_v9, %v4804_v8  ;;  %v3298_v9 = vld [vmem:[#allocation2 + $0x458] sm:$0xff] }
 0x309   : > { %v3158_v29 = vsel %vm3146_vm0, %v4810_v48, %v4819_v63  ;;  %v3157_v33 = vsel %vm3146_vm0, %v4809_v47, %v4810_v48  ;;  %v3156_v4 = vsel %vm3146_vm0, %v4800_v23, %v4809_v47  ;;  %3648 = vmatpush.bf16.msrb.mxu1 %v3468_v44  ;;  %v3299_v63 = vld [vmem:[#allocation2 + $0x2c0] sm:$0xff]  ;;  %v2639_v23 = vsel %vm2628_vm13, %v4804_v8, %v4805_v14 }
 0x30a   : > { %3661 = vmatpush.bf16.msrb.mxu2 %v3469_v11  ;;  %3200 = vst [vmem:[#allocation2 + $0x288] sm:$0xf0] %v3158_v29  ;;  %3635 = vmatpush.bf16.msrb.mxu0 %v3467_v2  ;;  %v3446_v42 = vpack.c.bf16 %v3320_v39, %v3299_v63  ;;  %v3445_v41 = vpack.c.bf16 %v3319_v32, %v3298_v9  ;;  %v3238_v47 = vld [vmem:[#allocation2 + $0x520] sm:$0xff]  ;;  %v3237_v2 = vld [vmem:[#allocation2 + $0x388] sm:$0xff]  ;;  %v3214_v63 = vld [vmem:[#allocation2 + $0x18] sm:$0xff] }
 0x30b   : > { %3199 = vst [vmem:[#allocation2 + $0x2f8] sm:$0xf0] %v3157_v33  ;;  %3622 = vmatpush.bf16.msra.mxu3 %v3466_v24  ;;  %v6815_v38 = vpop.permute.xlu2 %4867  ;;  %v3426_v48 = vpack.c.bf16 %v3279_v36, %v3258_v22  ;;  %v3236_v29 = vld [vmem:[#allocation2 + $0xc8] sm:$0xff]  ;;  %v3217_v33 = vld [vmem:[#allocation2 + $0x440] sm:$0xff] }
 0x30c   : > { %3198 = vst [vmem:[#allocation2 + $0x370] sm:$0xf0] %v3156_v4  ;;  %v3386_v54 = vld [vmem:[#allocation2 + $0xf8] sm:$0xff]  ;;  %v4870_v25 = vunpack.i.h.bf16 %v6815_v38  ;;  %v4869_v30 = vunpack.i.l.bf16 %v6815_v38  ;;  %v3235_v4 = vld [vmem:[#allocation2 + $0x248] sm:$0xff]  ;;  %v3406_v32 = vpack.c.bf16 %v3238_v47, %v3217_v33  ;;  %v3345_v36 = vld [vmem:[#allocation2 + $0x380] sm:$0xff] }
 0x30d   : > { %2680 = vst [vmem:[#allocation2 + $0x1b0] sm:$0xf] %v2638_v12  ;;  %3649 = vmatpush.bf16.msrb.mxu1 %v3447_v50  ;;  %v6819_v20 = vpop.permute.xlu0 %4827  ;;  %v3387_v11 = vld [vmem:[#allocation2 + $0x2d8] sm:$0xff]  ;;  %v3491_v16 = vpack.c.bf16 %v3386_v54, %v3386_v54  ;;  %v3216_v12 = vld [vmem:[#allocation2 + $0x328] sm:$0xff]  ;;  %v3403_v60 = vpack.c.bf16 %v3235_v4, %v3214_v63  ;;  %v3325_v33 = vld [vmem:[#allocation2 + $0x4a0] sm:$0xff] }
 0x30e   : > { %3662 = vmatpush.bf16.msrb.mxu2 %v3448_v31  ;;  %v4813_v62 = vpop.permute.xlu1 %4812  ;;  %3636 = vmatpush.bf16.msrb.mxu0 %v3446_v42  ;;  %2681 = vst [vmem:[#allocation2 + $0x150] sm:$0xf] %v2639_v23  ;;  %v2818_v24 = vsel %vm2801_vm14, %v4869_v30, %v4870_v25  ;;  %v4830_v27 = vunpack.i.h.bf16 %v6819_v20  ;;  %v4829_v44 = vunpack.i.l.bf16 %v6819_v20  ;;  %v3492_v26 = vpack.c.bf16 %v3387_v11, %v3387_v11  ;;  %v3366_v19 = vld [vmem:[#allocation2 + $0x2a8] sm:$0xff]  ;;  %v3305_v4 = vld [vmem:[#allocation2 + $0x270] sm:$0xff] }
 0x30f   : > { %v4815_v57 = vunpack.i.h.bf16 %v4813_v62  ;;  %v4814_v40 = vunpack.i.l.bf16 %v4813_v62  ;;  %3623 = vmatpush.bf16.msra.mxu3 %v3445_v41  ;;  %2860 = vst [vmem:[#allocation2 + $0x3f0] sm:$0xf0] %v2818_v24  ;;  %v3538_v50 = vsel %vm3515_vm1, %v3491_v16, 0  ;;  %v3365_v62 = vld [vmem:[#allocation2 + $0x568] sm:$0xff]  ;;  %v3471_v15 = vpack.c.bf16 %v3366_v19, %v3345_v36  ;;  %v3344_v16 = vld [vmem:[#allocation2 + $0x180] sm:$0xff] }
 0x310   : > { %v2813_v39 = vsel %vm2801_vm14, %v4825_v3, %v4829_v44  ;;  %v2814_v35 = vsel %vm2801_vm14, %v4829_v44, %v4830_v27  ;;  %v3541_v46 = vsel %vm3515_vm1, %v3492_v26, 0 }
 0x311   : > { %v2641_v45 = vsel %vm2628_vm13, %v4814_v40, %v4815_v57  ;;  %v2642_v8 = vsel %vm2628_vm13, %v4815_v57, %v4854_v21  ;;  %v2640_v7 = vsel %vm2628_vm13, %v4805_v14, %v4814_v40  ;;  %3650 = vmatpush.bf16.msrb.mxu1 %v3426_v48  ;;  %v3215_v21 = vld [vmem:[#allocation2 + $0x450] sm:$0xff]  ;;  %v3405_v14 = vpack.c.bf16 %v3237_v2, %v3216_v12  ;;  %v3347_v57 = vld [vmem:[#allocation2 + $0x348] sm:$0xff]  ;;  %v3304_v12 = vld [vmem:[#allocation2 + $0x460] sm:$0xff] }
 0x312   : > { %3663 = vmatpush.bf16.msrb.mxu2 %v3427_v28  ;;  %2683 = vst [vmem:[#allocation2 + $0x448] sm:$0xf] %v2641_v45  ;;  %3637 = vmatpush.bf16.msrb.mxu0 %v3425_v1  ;;  %v3389_v31 = vld [vmem:[#allocation2 + $0x2f8] sm:$0xff]  ;;  %v3404_v23 = vpack.c.bf16 %v3236_v29, %v3215_v21  ;;  %v3346_v2 = vld [vmem:[#allocation2 + $0x508] sm:$0xff]  ;;  %v3326_v45 = vld [vmem:[#allocation2 + $0x5b0] sm:$0xff]  ;;  %v3451_v63 = vpack.c.bf16 %v3325_v33, %v3304_v12 }
 0x313   : > { %2684 = vst [vmem:[#allocation2 + $0x1d0] sm:$0xf] %v2642_v8  ;;  %3624 = vmatpush.bf16.msra.mxu3 %v3424_v34  ;;  %v3388_v10 = vld [vmem:[#allocation2 + $0x370] sm:$0xff]  ;;  %v3494_v37 = vpack.c.bf16 %v3389_v31, %v3389_v31  ;;  %v6842_v51 = vpop.permute.xlu2 %4882  ;;  %v3323_v29 = vld [vmem:[#allocation2 + $0x408] sm:$0xff]  ;;  %v3284_v31 = vld [vmem:[#allocation2 + $0x1e0] sm:$0xff] }
 0x314   : > { %2682 = vst [vmem:[#allocation2 + $0x550] sm:$0xf] %v2640_v7  ;;  %v3493_v3 = vpack.c.bf16 %v3388_v10, %v3388_v10  ;;  %v4885_v41 = vunpack.i.h.bf16 %v6842_v51  ;;  %v4884_v59 = vunpack.i.l.bf16 %v6842_v51  ;;  %v3367_v28 = vld [vmem:[#allocation2 + $0x1b0] sm:$0xff]  ;;  %v3223_v51 = vld [vmem:[#allocation2 + $0x548] sm:$0xff] }
 0x315   : > { %2855 = vst [vmem:[#allocation2 + $0x550] sm:$0xf0] %v2813_v39  ;;  %3651 = vmatpush.bf16.msrb.mxu1 %v3405_v14  ;;  %v3547_v55 = vsel %vm3515_vm1, %v3494_v37, 0  ;;  %v3368_v9 = vld [vmem:[#allocation2 + $0x150] sm:$0xff]  ;;  %v6848_v1 = vpop.permute.xlu0 %4842  ;;  %v3472_v8 = vpack.c.bf16 %v3367_v28, %v3346_v2 }
 0x316   : > { %3664 = vmatpush.bf16.msrb.mxu2 %v3406_v32  ;;  %v4833_v42 = vpop.permute.xlu1 %4832  ;;  %3638 = vmatpush.bf16.msrb.mxu0 %v3404_v23  ;;  %2856 = vst [vmem:[#allocation2 + $0x448] sm:$0xf0] %v2814_v35  ;;  %v3544_v22 = vsel %vm3515_vm1, %v3493_v3, 0  ;;  %v3165_v40 = vsel %vm3146_vm0, %v4884_v59, %v4885_v41  ;;  %v4845_v34 = vunpack.i.h.bf16 %v6848_v1  ;;  %v4844_v11 = vunpack.i.l.bf16 %v6848_v1  ;;  %v3302_v39 = vld [vmem:[#allocation2 + $0xf0] sm:$0xff]  ;;  %v3281_v3 = vld [vmem:[#allocation2 + $0x120] sm:$0xff] }
 0x317   : > { %v4835_v54 = vunpack.i.h.bf16 %v4833_v42  ;;  %v4834_v17 = vunpack.i.l.bf16 %v4833_v42  ;;  %3625 = vmatpush.bf16.msra.mxu3 %v3403_v60  ;;  %v3473_v48 = vpack.c.bf16 %v3368_v9, %v3347_v57  ;;  %3207 = vst [vmem:[#allocation2 + $0x38] sm:$0xf0] %v3165_v40  ;;  %v3449_v35 = vpack.c.bf16 %v3323_v29, %v3302_v39  ;;  %v3282_v14 = vld [vmem:[#allocation2 + $0x4b0] sm:$0xff]  ;;  %v3260_v57 = vld [vmem:[#allocation2 + $0x320] sm:$0xff] }
 0x318   : > { %v3160_v13 = vsel %vm3146_vm0, %v4820_v56, %v4844_v11  ;;  %v3161_v7 = vsel %vm3146_vm0, %v4844_v11, %v4845_v34  ;;  %3940 = vmatmul.msk.bf16.vlgmr.msrb.gmra.mxu1 %vm3511_vm2, %v6754_v49  ;;  %v3452_v56 = vpack.c.bf16 %v3326_v45, %v3305_v4  ;;  %v3261_v9 = vld [vmem:[#allocation2 + $0x130] sm:$0xff]  ;;  %v3262_v11 = vld [vmem:[#allocation2 + $0x4e0] sm:$0xff]  ;;  %v3241_v45 = vld [vmem:[#allocation2 + $0x488] sm:$0xff] }
 0x319   : > { %3699 = vmatpush.bf16.msra.mxu1 %v3544_v22  ;;  %v2989_v47 = vsel %vm2973_vm15, %v4835_v54, %v4839_v58  ;;  %v2987_v24 = vsel %vm2973_vm15, %v4795_v18, %v4834_v17  ;;  %v2988_v44 = vsel %vm2973_vm15, %v4834_v17, %v4835_v54  ;;  %3939 = vmatmul.msk.bf16.vlgmr.msrb.gmra.mxu0 %vm3511_vm2, %v6754_v49  ;;  %v3324_v18 = vld [vmem:[#allocation2 + $0x200] sm:$0xff]  ;;  %v3390_v54 = vld [vmem:[#allocation2 + $0x288] sm:$0xff]  ;;  %v3391_v17 = vld [vmem:[#allocation2 + $0x70] sm:$0xff] }
 0x31a   : > { %3712 = vmatpush.bf16.msra.mxu2 %v3547_v55  ;;  %3686 = vmatpush.bf16.msra.mxu0 %v3541_v46  ;;  %3031 = vst [vmem:[#allocation2 + $0x1a0] sm:$0xf] %v2989_v47  ;;  %v3470_v58 = vpack.c.bf16 %v3365_v62, %v3344_v16  ;;  %v3450_v26 = vpack.c.bf16 %v3324_v18, %v3303_v61  ;;  %v3263_v55 = vld [vmem:[#allocation2 + $0x88] sm:$0xff]  ;;  %v3240_v16 = vld [vmem:[#allocation2 + $0x5e0] sm:$0xff]  ;;  %v3220_v33 = vld [vmem:[#allocation2 + $0x510] sm:$0xff] }
 0x31b   : > { %3673 = vmatpush.bf16.msrb.mxu3 %v3538_v50  ;;  %3941 = vmatmul.msk.bf16.vlgmr.msrb.gmra.mxu2 %vm3511_vm2, %v6754_v49  ;;  %3029 = vst [vmem:[#allocation2 + $0x3c8] sm:$0xf] %v2987_v24  ;;  %v6879_v32 = vpop.permute.xlu2 %4897  ;;  %v3283_v50 = vld [vmem:[#allocation2 + $0x308] sm:$0xff]  ;;  %v3431_v62 = vpack.c.bf16 %v3284_v31, %v3263_v55  ;;  %v3429_v40 = vpack.c.bf16 %v3282_v14, %v3261_v9 }
 0x31c   : > { %3938 = vmatmul.msk.bf16.vlgmr.msra.gmra.mxu3 %vm3511_vm2, %v6754_v49  ;;  %3030 = vst [vmem:[#allocation2 + $0x138] sm:$0xf] %v2988_v44  ;;  %v4900_v10 = vunpack.i.h.bf16 %v6879_v32  ;;  %v4899_v37 = vunpack.i.l.bf16 %v6879_v32  ;;  %v3428_v47 = vpack.c.bf16 %v3281_v3, %v3260_v57  ;;  %v3239_v44 = vld [vmem:[#allocation2 + $0x3a8] sm:$0xff]  ;;  %v3430_v2 = vpack.c.bf16 %v3283_v50, %v3262_v11  ;;  %v3307_v57 = vld [vmem:[#allocation2 + $0x50] sm:$0xff] }
 0x31d   : > { %3700 = vmatpush.bf16.msra.mxu1 %v3472_v8  ;;  %3202 = vst [vmem:[#allocation2 + $0x3c8] sm:$0xf0] %v3160_v13  ;;  %v6883_v60 = vpop.permute.xlu0 %4857  ;;  %v3495_v1 = vpack.c.bf16 %v3390_v54, %v3390_v54  ;;  %v3218_v13 = vld [vmem:[#allocation2 + $0x378] sm:$0xff]  ;;  %v3409_v12 = vpack.c.bf16 %v3241_v45, %v3220_v33  ;;  %v3264_v45 = vld [vmem:[#allocation2 + $0x2f0] sm:$0xff] }
 0x31e   : > { %3713 = vmatpush.bf16.msra.mxu2 %v3473_v48  ;;  %3687 = vmatpush.bf16.msra.mxu0 %v3471_v15  ;;  %v4848_v21 = vpop.permute.xlu1 %4847  ;;  %3203 = vst [vmem:[#allocation2 + $0x138] sm:$0xf0] %v3161_v7  ;;  %v2477_v42 = vsel %vm2456_vm12, %v4899_v37, %v4900_v10  ;;  %v4860_v46 = vunpack.i.h.bf16 %v6883_v60  ;;  %v4859_v36 = vunpack.i.l.bf16 %v6883_v60  ;;  %v3242_v48 = vld [vmem:[#allocation2 + $0x4d0] sm:$0xff]  ;;  %v3407_v8 = vpack.c.bf16 %v3239_v44, %v3218_v13 }
 0x31f   : > { %3674 = vmatpush.bf16.msrb.mxu3 %v3470_v58  ;;  %v4850_v23 = vunpack.i.h.bf16 %v4848_v21  ;;  %v4849_v19 = vunpack.i.l.bf16 %v4848_v21  ;;  %2519 = vst [vmem:[#allocation2 + $0x428] sm:$0xf0] %v2477_v42  ;;  %v3221_v58 = vld [vmem:[#allocation2 + $0x490] sm:$0xff]  ;;  %v3408_v7 = vpack.c.bf16 %v3240_v16, %v3219_v52  ;;  %v3550_v14 = vsel %vm3515_vm1, %v3495_v1, 0 }
 0x320   : > { %v2644_v24 = vsel %vm2628_vm13, %v4855_v53, %v4859_v36  ;;  %v3410_v53 = vpack.c.bf16 %v3242_v48, %v3221_v58  ;;  %v3285_v16 = vld [vmem:[#allocation2 + $0x250] sm:$0xff]  ;;  %v3265_v58 = vld [vmem:[#allocation2 + $0x260] sm:$0xff] }
 0x321   : > { %3701 = vmatpush.bf16.msra.mxu1 %v3451_v63  ;;  %v3163_v15 = vsel %vm3146_vm0, %v4849_v19, %v4850_v23  ;;  %v3164_v22 = vsel %vm3146_vm0, %v4850_v23, %v4884_v59  ;;  %v3162_v28 = vsel %vm3146_vm0, %v4845_v34, %v4849_v19  ;;  %v2645_v59 = vsel %vm2628_vm13, %v4859_v36, %v4860_v46  ;;  %v3370_v63 = vld [vmem:[#allocation2 + $0x448] sm:$0xff]  ;;  %v3369_v19 = vld [vmem:[#allocation2 + $0x550] sm:$0xff] }
 0x322   : > { %3714 = vmatpush.bf16.msra.mxu2 %v3452_v56  ;;  %3688 = vmatpush.bf16.msra.mxu0 %v3450_v26  ;;  %3205 = vst [vmem:[#allocation2 + $0x230] sm:$0xf0] %v3163_v15  ;;  %v3496_v34 = vpack.c.bf16 %v3391_v17, %v3391_v17  ;;  %v3349_v17 = vld [vmem:[#allocation2 + $0x4b8] sm:$0xff] }
 0x323   : > { %3675 = vmatpush.bf16.msrb.mxu3 %v3449_v35  ;;  %3206 = vst [vmem:[#allocation2 + $0x218] sm:$0xf0] %v3164_v22  ;;  %v6903_v29 = vpop.permute.xlu2 %4907 }
 0x324   : > { %3204 = vst [vmem:[#allocation2 + $0x1a0] sm:$0xf0] %v3162_v28  ;;  %v3392_v18 = vld [vmem:[#allocation2 + $0x3c8] sm:$0xff]  ;;  %v4910_v39 = vunpack.i.h.bf16 %v6903_v29  ;;  %v4909_v26 = vunpack.i.l.bf16 %v6903_v29  ;;  %v3553_v10 = vsel %vm3515_vm1, %v3496_v34, 0  ;;  %v3327_v28 = vld [vmem:[#allocation2 + $0x210] sm:$0xff] }
 0x325   : > { %3702 = vmatpush.bf16.msra.mxu1 %v3430_v2  ;;  %2686 = vst [vmem:[#allocation2] sm:$0xf] %v2644_v24  ;;  %v3497_v4 = vpack.c.bf16 %v3392_v18, %v3392_v18  ;;  %v3393_v61 = vld [vmem:[#allocation2 + $0x138] sm:$0xff]  ;;  %v4873_v23 = vpop.permute.xlu0 %4872  ;;  %v3286_v24 = vld [vmem:[#allocation2 + $0xe0] sm:$0xff] }
 0x326   : > { %3715 = vmatpush.bf16.msra.mxu2 %v3431_v62  ;;  %3689 = vmatpush.bf16.msra.mxu0 %v3429_v40  ;;  %v4863_v56 = vpop.permute.xlu1 %4862  ;;  %2687 = vst [vmem:[#allocation2 + $0x3f0] sm:$0xf] %v2645_v59  ;;  %v3498_v31 = vpack.c.bf16 %v3393_v61, %v3393_v61  ;;  %v2819_v3 = vsel %vm2801_vm14, %v4870_v25, %v4909_v26  ;;  %v4875_v50 = vunpack.i.h.bf16 %v4873_v23  ;;  %v4874_v55 = vunpack.i.l.bf16 %v4873_v23  ;;  %v3348_v25 = vld [vmem:[#allocation2 + $0x4f8] sm:$0xff]  ;;  %v3244_v61 = vld [vmem:[#allocation2 + $0xb0] sm:$0xff] }
 0x327   : > { %3676 = vmatpush.bf16.msrb.mxu3 %v3428_v47  ;;  %v4865_v21 = vunpack.i.h.bf16 %v4863_v56  ;;  %v4864_v35 = vunpack.i.l.bf16 %v4863_v56  ;;  %v3556_v9 = vsel %vm3515_vm1, %v3497_v4, 0  ;;  %2861 = vst [vmem:[#allocation2 + $0x198] sm:$0xf0] %v2819_v3  ;;  %v3475_v62 = vpack.c.bf16 %v3370_v63, %v3349_v17  ;;  %v3222_v23 = vld [vmem:[#allocation2 + $0x318] sm:$0xff] }
 0x328   : > { %v2820_v15 = vsel %vm2801_vm14, %v4909_v26, %v4910_v39  ;;  %v3559_v38 = vsel %vm3515_vm1, %v3498_v31, 0  ;;  %v2991_v20 = vsel %vm2973_vm15, %v4840_v5, %v4874_v55  ;;  %v2992_v22 = vsel %vm2973_vm15, %v4874_v55, %v4875_v50  ;;  %v3351_v26 = vld [vmem:[#allocation2 + $0x280] sm:$0xff]  ;;  %v3243_v31 = vld [vmem:[#allocation2 + $0x98] sm:$0xff] }
 0x329   : > { %v2817_v42 = vsel %vm2801_vm14, %v4865_v21, %v4869_v30  ;;  %v2815_v36 = vsel %vm2801_vm14, %v4830_v27, %v4864_v35  ;;  %v2816_v54 = vsel %vm2801_vm14, %v4864_v35, %v4865_v21  ;;  %3703 = vmatpush.bf16.msra.mxu1 %v3409_v12  ;;  %v3474_v30 = vpack.c.bf16 %v3369_v19, %v3348_v25  ;;  %v3328_v27 = vld [vmem:[#allocation2 + $0x360] sm:$0xff]  ;;  %v3395_v13 = vld [vmem:[#allocation2 + $0x230] sm:$0xff]  ;;  %v3308_v3 = vld [vmem:[#allocation2 + $0x3f8] sm:$0xff] }
 0x32a   : > { %3716 = vmatpush.bf16.msra.mxu2 %v3410_v53  ;;  %3690 = vmatpush.bf16.msra.mxu0 %v3408_v7  ;;  %2859 = vst [vmem:[#allocation2] sm:$0xf0] %v2817_v42  ;;  %v3454_v5 = vpack.c.bf16 %v3328_v27, %v3307_v57  ;;  %v3453_v47 = vpack.c.bf16 %v3327_v28, %v3306_v43  ;;  %v3350_v7 = vld [vmem:[#allocation2 + $0x1c0] sm:$0xff]  ;;  %v3287_v57 = vld [vmem:[#allocation2 + $0x10] sm:$0xff] }
 0x32b   : > { %3677 = vmatpush.bf16.msrb.mxu3 %v3407_v8  ;;  %2857 = vst [vmem:[#allocation2 + $0x1d0] sm:$0xf0] %v2815_v36  ;;  %v3433_v52 = vpack.c.bf16 %v3286_v24, %v3265_v58  ;;  %v3394_v8 = vld [vmem:[#allocation2 + $0x1a0] sm:$0xff]  ;;  %v3432_v4 = vpack.c.bf16 %v3285_v16, %v3264_v45  ;;  %v3500_v21 = vpack.c.bf16 %v3395_v13, %v3395_v13  ;;  %v3246_v45 = vld [vmem:[#allocation2 + $0x570] sm:$0xff] }
 0x32c   : > { %2858 = vst [vmem:[#allocation2 + $0x310] sm:$0xf0] %v2816_v54  ;;  %3944 = vmatmul.msk.bf16.vlgmr.msra.gmra.mxu1 %vm3511_vm2, %v6754_v49  ;;  %v3412_v19 = vpack.c.bf16 %v3244_v61, %v3223_v51  ;;  %v3309_v54 = vld [vmem:[#allocation2 + $0x5d0] sm:$0xff] }
 0x32d   : > { %3943 = vmatmul.msk.bf16.vlgmr.msra.gmra.mxu0 %vm3511_vm2, %v6754_v49  ;;  %3751 = vmatpush.bf16.msrb.mxu1 %v3556_v9  ;;  %2862 = vst [vmem:[#allocation2 + $0x470] sm:$0xf0] %v2820_v15  ;;  %v4888_v44 = vpop.permute.xlu0 %4887  ;;  %v3411_v9 = vpack.c.bf16 %v3243_v31, %v3222_v23  ;;  %v3565_v17 = vsel %vm3515_vm1, %v3500_v21, 0  ;;  %v3374_v25 = vld [vmem:[#allocation2 + $0x3f0] sm:$0xff]  ;;  %v3289_v31 = vld [vmem:[#allocation2 + $0x60] sm:$0xff]  ;;  %v3248_v23 = vld [vmem:[#allocation2 + $0x5a8] sm:$0xff] }
 0x32e   : > { %3738 = vmatpush.bf16.msrb.mxu0 %v3553_v10  ;;  %3942 = vmatmul.msk.bf16.vlgmr.msrb.gmra.mxu3 %vm3511_vm2, %v6754_v49  ;;  %v4878_v40 = vpop.permute.xlu1 %4877  ;;  %3033 = vst [vmem:[#allocation2 + $0x218] sm:$0xf] %v2991_v20  ;;  %v4890_v2 = vunpack.i.h.bf16 %v4888_v44  ;;  %v4889_v59 = vunpack.i.l.bf16 %v4888_v44  ;;  %v3330_v10 = vld [vmem:[#allocation2 + $0x418] sm:$0xff]  ;;  %v3331_v44 = vld [vmem:[#allocation2 + $0x588] sm:$0xff] }
 0x32f   : > { %3725 = vmatpush.bf16.msra.mxu3 %v3550_v14  ;;  %3764 = vmatpush.bf16.msrb.mxu2 %v3559_v38  ;;  %v4880_v11 = vunpack.i.h.bf16 %v4878_v40  ;;  %v4879_v48 = vunpack.i.l.bf16 %v4878_v40  ;;  %3034 = vst [vmem:[#allocation2 + $0x38] sm:$0xf] %v2992_v22  ;;  %v3329_v14 = vld [vmem:[#allocation2 + $0x290] sm:$0xff]  ;;  %v3456_v38 = vpack.c.bf16 %v3330_v10, %v3309_v54 }
 0x330   : > { %3945 = vmatmul.msk.bf16.vlgmr.msra.gmra.mxu2 %vm3511_vm2, %v6754_v49  ;;  %v3166_v53 = vsel %vm3146_vm0, %v4885_v41, %v4889_v59  ;;  %v3167_v18 = vsel %vm3146_vm0, %v4889_v59, %v4890_v2  ;;  %v3499_v41 = vpack.c.bf16 %v3394_v8, %v3394_v8  ;;  %v3455_v36 = vpack.c.bf16 %v3329_v14, %v3308_v3  ;;  %v3353_v40 = vld [vmem:[#allocation2 + $0x390] sm:$0xff]  ;;  %v2800_v2 = vpop.permute.xlu2 %2799  ;;  %v3245_v59 = vld [vmem:[#allocation2 + $0x2a0] sm:$0xff] }
 0x331   : > { %v2994_v1 = vsel %vm2973_vm15, %v4879_v48, %v4880_v11  ;;  %v2993_v34 = vsel %vm2973_vm15, %v4875_v50, %v4879_v48  ;;  %3208 = vst [vmem:[#allocation2 + $0x28] sm:$0xf0] %v3166_v53  ;;  %v3373_v28 = vld [vmem:[#allocation2] sm:$0xff] }
 0x332   : > { %3739 = vmatpush.bf16.msrb.mxu0 %v3475_v62  ;;  %3036 = vst [vmem:[#allocation2 + $0x48] sm:$0xf] %v2994_v1  ;;  %v3371_v33 = vld [vmem:[#allocation2 + $0x1d0] sm:$0xff]  ;;  %v3562_v22 = vsel %vm3515_vm1, %v3499_v41, 0  ;;  %v3478_v60 = vpack.c.bf16 %v3373_v28, %v3352_v0  ;;  %v3332_v48 = vld [vmem:[#allocation2 + $0x4c0] sm:$0xff] }
 0x333   : > { %3726 = vmatpush.bf16.msra.mxu3 %v3474_v30  ;;  %3035 = vst [vmem:[#allocation2 + $0x28] sm:$0xf] %v2993_v34  ;;  %v3476_v56 = vpack.c.bf16 %v3371_v33, %v3350_v7  ;;  %v3372_v12 = vld [vmem:[#allocation2 + $0x310] sm:$0xff]  ;;  %v3311_v34 = vld [vmem:[#allocation2 + $0x158] sm:$0xff]  ;;  %v3224_v8 = vld [vmem:[#allocation2 + $0x500] sm:$0xff] }
 0x334   : > { %v3477_v35 = vpack.c.bf16 %v3372_v12, %v3351_v26  ;;  %3209 = vst [vmem:[#allocation2 + $0x48] sm:$0xf0] %v3167_v18  ;;  %v3458_v53 = vpack.c.bf16 %v3332_v48, %v3311_v34  ;;  %v3413_v26 = vpack.c.bf16 %v3245_v59, %v3224_v8  ;;  %v3225_v12 = vld [vmem:[#allocation2 + $0x58] sm:$0xff]  ;;  %v3268_v41 = vld [vmem:[#allocation2 + $0x2e0] sm:$0xff]  ;;  %v3312_v28 = vld [vmem:[#allocation2 + $0x170] sm:$0xff] }
 0x335   : > { %3752 = vmatpush.bf16.msrb.mxu1 %v3476_v56  ;;  %v4903_v42 = vpop.permute.xlu0 %4902  ;;  %v3396_v11 = vld [vmem:[#allocation2 + $0x218] sm:$0xff]  ;;  %v3414_v21 = vpack.c.bf16 %v3246_v45, %v3225_v12  ;;  %v3270_v48 = vld [vmem:[#allocation2 + $0xe8] sm:$0xff] }
 0x336   : > { %3740 = vmatpush.bf16.msrb.mxu0 %v3454_v5  ;;  %v4893_v63 = vpop.permute.xlu1 %4892  ;;  %3765 = vmatpush.bf16.msrb.mxu2 %v3477_v35  ;;  %v4905_v62 = vunpack.i.h.bf16 %v4903_v42  ;;  %v4904_v15 = vunpack.i.l.bf16 %v4903_v42  ;;  %v3266_v5 = vld [vmem:[#allocation2 + $0x558] sm:$0xff]  ;;  %v3501_v58 = vpack.c.bf16 %v3396_v11, %v3396_v11  ;;  %v3269_v35 = vld [vmem:[#allocation2 + $0x368] sm:$0xff] }
 0x337   : > { %3727 = vmatpush.bf16.msra.mxu3 %v3453_v47  ;;  %v4895_v50 = vunpack.i.h.bf16 %v4893_v63  ;;  %v4894_v55 = vunpack.i.l.bf16 %v4893_v63  ;;  %v3267_v47 = vld [vmem:[#allocation2 + $0x4f0] sm:$0xff]  ;;  %v3397_v24 = vld [vmem:[#allocation2 + $0x38] sm:$0xff]  ;;  %v3436_v63 = vpack.c.bf16 %v3289_v31, %v3268_v41  ;;  %v3251_v12 = vld [vmem:[#allocation2 + $0x2e8] sm:$0xff] }
 0x338   : > { %v2646_v32 = vsel %vm2628_vm13, %v4860_v46, %v4904_v15  ;;  %v2647_v43 = vsel %vm2628_vm13, %v4904_v15, %v4905_v62  ;;  %v3434_v46 = vpack.c.bf16 %v3287_v57, %v3266_v5  ;;  %v3502_v7 = vpack.c.bf16 %v3397_v24, %v3397_v24  ;;  %v3333_v15 = vld [vmem:[#allocation2 + $0x118] sm:$0xff]  ;;  %v3231_v41 = vld [vmem:[#allocation2 + $0x330] sm:$0xff] }
 0x339   : > { %v2476_v30 = vsel %vm2456_vm12, %v4895_v50, %v4899_v37  ;;  %v2474_v20 = vsel %vm2456_vm12, %v4690_v6, %v4894_v55  ;;  %v2475_v27 = vsel %vm2456_vm12, %v4894_v55, %v4895_v50  ;;  %3753 = vmatpush.bf16.msrb.mxu1 %v3455_v36  ;;  %v3288_v37 = vld [vmem:[#allocation2 + $0x190] sm:$0xff]  ;;  %v3479_v6 = vpack.c.bf16 %v3374_v25, %v3353_v40  ;;  %v3247_v50 = vld [vmem:[#allocation2 + $0x598] sm:$0xff] }
 0x33a   : > { %3741 = vmatpush.bf16.msrb.mxu0 %v3433_v52  ;;  %2518 = vst [vmem:[#allocation2 + $0x298] sm:$0xf0] %v2476_v30  ;;  %3766 = vmatpush.bf16.msrb.mxu2 %v3456_v38  ;;  %v3435_v16 = vpack.c.bf16 %v3288_v37, %v3267_v47  ;;  %v3310_v52 = vld [vmem:[#allocation2 + $0x5d8] sm:$0xff]  ;;  %v3568_v14 = vsel %vm3515_vm1, %v3501_v58, 0  ;;  %v3571_v29 = vsel %vm3515_vm1, %v3502_v7, 0  ;;  %v3313_v37 = vld [vmem:[#allocation2 + $0x530] sm:$0xff] }
 0x33b   : > { %3728 = vmatpush.bf16.msra.mxu3 %v3432_v4  ;;  %2516 = vst [vmem:[#allocation2 + $0x268] sm:$0xf0] %v2474_v20  ;;  %v3457_v33 = vpack.c.bf16 %v3331_v44, %v3310_v52  ;;  %v3290_v4 = vld [vmem:[#allocation2 + $0x410] sm:$0xff]  ;;  %v3399_v51 = vld [vmem:[#allocation2 + $0x48] sm:$0xff]  ;;  %v3226_v30 = vld [vmem:[#allocation2 + $0x2b8] sm:$0xff] }
 0x33c   : > { %2517 = vst [vmem:[#allocation2 + $0x30] sm:$0xf0] %v2475_v27  ;;  %v3437_v10 = vpack.c.bf16 %v3290_v4, %v3269_v35  ;;  %v3504_v55 = vpack.c.bf16 %v3399_v51, %v3399_v51  ;;  %v3334_v27 = vld [vmem:[#allocation2 + $0x3a0] sm:$0xff]  ;;  %v3292_v11 = vld [vmem:[#allocation2 + $0x338] sm:$0xff]  ;;  %v3228_v58 = vld [vmem:[#allocation2 + $0x590] sm:$0xff] }
 0x33d   : > { %2688 = vst [vmem:[#allocation2 + $0x198] sm:$0xf] %v2646_v32  ;;  %3754 = vmatpush.bf16.msrb.mxu1 %v3434_v46  ;;  %v2798_v18 = vpop.permute.xlu0 %2797  ;;  %v3459_v32 = vpack.c.bf16 %v3333_v15, %v3312_v28  ;;  %v3460_v0 = vpack.c.bf16 %v3334_v27, %v3313_v37  ;;  %v3271_v47 = vld [vmem:[#allocation2 + $0x300] sm:$0xff]  ;;  %v3314_v45 = vld [vmem:[#allocation2 + $0x1d8] sm:$0xff]  ;;  %v3252_v51 = vld [vmem:[#allocation2 + $0xa8] sm:$0xff] }
 0x33e   : > { %3742 = vmatpush.bf16.msrb.mxu0 %v3412_v19  ;;  %v2625_v1 = vpop.permute.xlu1 %2624  ;;  %2689 = vst [vmem:[#allocation2 + $0x470] sm:$0xf] %v2647_v43  ;;  %3767 = vmatpush.bf16.msrb.mxu2 %v3435_v16  ;;  %v2821_v61 = vsel %vm2801_vm14, %v4910_v39, %v2798_v18  ;;  %v2822_v56 = vsel %vm2801_vm14, %v2798_v18, %v2800_v2  ;;  %v3398_v39 = vld [vmem:[#allocation2 + $0x28] sm:$0xff]  ;;  %v3577_v40 = vsel %vm3515_vm1, %v3504_v55, 0  ;;  %v3291_v43 = vld [vmem:[#allocation2 + $0x5c0] sm:$0xff]  ;;  %v3336_v52 = vld [vmem:[#allocation2 + $0x278] sm:$0xff] }
 0x33f   : > { %3729 = vmatpush.bf16.msra.mxu3 %v3411_v9  ;;  %v2648_v13 = vsel %vm2628_vm13, %v4905_v62, %v2625_v1  ;;  %2863 = vst [vmem:[#allocation2 + $0x2d0] sm:$0xf0] %v2821_v61  ;;  %v3503_v25 = vpack.c.bf16 %v3398_v39, %v3398_v39  ;;  %v3438_v46 = vpack.c.bf16 %v3291_v43, %v3270_v48  ;;  %v3335_v44 = vld [vmem:[#allocation2 + $0x5a0] sm:$0xff]  ;;  %v3249_v16 = vld [vmem:[#allocation2 + $0x4c8] sm:$0xff]  ;;  %v3293_v7 = vld [vmem:[#allocation2 + $0x358] sm:$0xff] }
 0x340   : > { %2690 = vst [vmem:[#allocation2 + $0x2d0] sm:$0xf] %v2648_v13  ;;  %v3439_v24 = vpack.c.bf16 %v3292_v11, %v3271_v47  ;;  %v3357_v2 = vld [vmem:[#allocation2 + $0x428] sm:$0xff]  ;;  %v3461_v13 = vpack.c.bf16 %v3335_v44, %v3314_v45  ;;  %v3229_v18 = vld [vmem:[#allocation2 + $0x540] sm:$0xff]  ;;  %v3272_v61 = vld [vmem:[#allocation2 + $0xd8] sm:$0xff] }
 0x341   : > { %3947 = vmatmul.msk.bf16.vlgmr.msrb.gmra.mxu0 %vm3511_vm2, %v6754_v49  ;;  %2864 = vst [vmem:[#allocation2 + $0x178] sm:$0xf0] %v2822_v56  ;;  %3755 = vmatpush.bf16.msrb.mxu1 %v3413_v26  ;;  %v3440_v56 = vpack.c.bf16 %v3293_v7, %v3272_v61  ;;  %v3294_v26 = vld [vmem:[#allocation2 + $0x40] sm:$0xff]  ;;  %v3273_v31 = vld [vmem:[#allocation2 + $0x1b8] sm:$0xff] }
 0x342   : > { %3790 = vmatpush.bf16.msra.mxu0 %v3565_v17  ;;  %3946 = vmatmul.msk.bf16.vlgmr.msra.gmra.mxu3 %vm3511_vm2, %v6754_v49  ;;  %v3354_v19 = vld [vmem:[#allocation2 + $0x268] sm:$0xff]  ;;  %v3227_v17 = vld [vmem:[#allocation2 + $0x580] sm:$0xff] }
 0x343   : > { %3777 = vmatpush.bf16.msrb.mxu3 %v3562_v22  ;;  %3768 = vmatpush.bf16.msrb.mxu2 %v3414_v21  ;;  %v3355_v42 = vld [vmem:[#allocation2 + $0x30] sm:$0xff]  ;;  %v3416_v20 = vpack.c.bf16 %v3248_v23, %v3227_v17  ;;  %v3415_v22 = vpack.c.bf16 %v3247_v50, %v3226_v30  ;;  %v3441_v21 = vpack.c.bf16 %v3294_v26, %v3273_v31  ;;  %v3230_v35 = vld [vmem:[#allocation2 + $0x3c0] sm:$0xff] }
 0x344   : > { %v3375_v3 = vld [vmem:[#allocation2 + $0x198] sm:$0xff]  ;;  %3948 = vmatmul.msk.bf16.vlgmr.msrb.gmra.mxu1 %vm3511_vm2, %v6754_v49 }
 0x345   : > { %3803 = vmatpush.bf16.msra.mxu1 %v3568_v14  ;;  %v3480_v9 = vpack.c.bf16 %v3375_v3, %v3354_v19  ;;  %v3376_v36 = vld [vmem:[#allocation2 + $0x470] sm:$0xff]  ;;  %v3419_v14 = vpack.c.bf16 %v3251_v12, %v3230_v35 }
 0x346   : > { %3791 = vmatpush.bf16.msra.mxu0 %v3479_v6  ;;  %v2627_v54 = vpop.permute.xlu1 %2626  ;;  %3949 = vmatmul.msk.bf16.vlgmr.msrb.gmra.mxu2 %vm3511_vm2, %v6754_v49  ;;  %v3481_v62 = vpack.c.bf16 %v3376_v36, %v3355_v42  ;;  %v3574_v49 = vsel %vm3515_vm1, %v3503_v25, 0  ;;  %v3356_v6 = vld [vmem:[#allocation2 + $0x298] sm:$0xff] }
 0x347   : > { %3778 = vmatpush.bf16.msrb.mxu3 %v3478_v60  ;;  %3816 = vmatpush.bf16.msra.mxu2 %v3571_v29  ;;  %v2649_v38 = vsel %vm2628_vm13, %v2625_v1, %v2627_v54  ;;  %v3377_v57 = vld [vmem:[#allocation2 + $0x2d0] sm:$0xff]  ;;  %v4912_v60 = vld [vmem:[%s7036_s1] sm:$0xf] }
 0x348   : > { %2691 = vst [vmem:[#allocation2 + $0x178] sm:$0xf] %v2649_v38  ;;  %v3482_v5 = vpack.c.bf16 %v3377_v57, %v3356_v6  ;;  %v3250_v1 = vld [vmem:[#allocation2 + $0x1f0] sm:$0xff] }
 0x349   : > { %3804 = vmatpush.bf16.msra.mxu1 %v3480_v9  ;;  %v3418_v8 = vpack.c.bf16 %v3250_v1, %v3229_v18 }
 0x34a   : > { %3792 = vmatpush.bf16.msra.mxu0 %v3458_v53  ;;  %v3417_v53 = vpack.c.bf16 %v3249_v16, %v3228_v58 }
 0x34b   : > { %3779 = vmatpush.bf16.msrb.mxu3 %v3457_v33  ;;  %3817 = vmatpush.bf16.msra.mxu2 %v3481_v62  ;;  %v3315_v33 = vld [vmem:[#allocation2 + $0xd0] sm:$0xff] }
 0x34c   : > { %v3462_v4 = vpack.c.bf16 %v3336_v52, %v3315_v33 }
 0x34d   : > { %3805 = vmatpush.bf16.msra.mxu1 %v3459_v32 }
 0x34e   : > { %3793 = vmatpush.bf16.msra.mxu0 %v3437_v10  ;;  %v3420_v10 = vpack.c.bf16 %v3252_v51, %v3231_v41 }
 0x34f   : > { %3780 = vmatpush.bf16.msrb.mxu3 %v3436_v63  ;;  %3818 = vmatpush.bf16.msra.mxu2 %v3460_v0  ;;  %v3378_v59 = vld [vmem:[#allocation2 + $0x178] sm:$0xff] }
 0x350   : > { %v3483_v34 = vpack.c.bf16 %v3378_v59, %v3357_v2 }
 0x351   : > { %3806 = vmatpush.bf16.msra.mxu1 %v3438_v46 }
 0x352   : > { %3794 = vmatpush.bf16.msra.mxu0 %v3416_v20 }
 0x353   : > { %3781 = vmatpush.bf16.msrb.mxu3 %v3415_v22  ;;  %3819 = vmatpush.bf16.msra.mxu2 %v3439_v24 }
 0x355   : > { %3951 = vmatmul.msk.bf16.vlgmr.msra.gmra.mxu0 %vm3511_vm2, %v4912_v60  ;;  %3807 = vmatpush.bf16.msra.mxu1 %v3417_v53 }
 0x356   : > { %3842 = vmatpush.bf16.msrb.mxu0 %v3577_v40  ;;  %3950 = vmatmul.msk.bf16.vlgmr.msrb.gmra.mxu3 %vm3511_vm2, %v4912_v60 }
 0x357   : > { %3829 = vmatpush.bf16.msra.mxu3 %v3574_v49  ;;  %3820 = vmatpush.bf16.msra.mxu2 %v3418_v8 }
 0x358   : > { %3952 = vmatmul.msk.bf16.vlgmr.msra.gmra.mxu1 %vm3511_vm2, %v4912_v60 }
 0x35a   : > { %3843 = vmatpush.bf16.msrb.mxu0 %v3483_v34  ;;  %3953 = vmatmul.msk.bf16.vlgmr.msra.gmra.mxu2 %vm3511_vm2, %v4912_v60 }
 0x35b   : > { %3830 = vmatpush.bf16.msra.mxu3 %v3482_v5 }
 0x35e   : > { %3844 = vmatpush.bf16.msrb.mxu0 %v3462_v4 }
 0x35f   : > { %3831 = vmatpush.bf16.msra.mxu3 %v3461_v13 }
 0x362   : > { %3845 = vmatpush.bf16.msrb.mxu0 %v3441_v21 }
 0x363   : > { %3832 = vmatpush.bf16.msra.mxu3 %v3440_v56 }
 0x366   : > { %3846 = vmatpush.bf16.msrb.mxu0 %v3420_v10 }
 0x367   : > { %3833 = vmatpush.bf16.msra.mxu3 %v3419_v14 }
 0x369   : > { %3955 = vmatmul.msk.bf16.vlgmr.msrb.gmra.mxu0 %vm3511_vm2, %v4912_v60 }
 0x36a   : > { %3954 = vmatmul.msk.bf16.vlgmr.msra.gmra.mxu3 %vm3511_vm2, %v4912_v60 }
 0x376   : > { %v6988_v39 = vpop.permute.xlu0 %3508 }
 0x37c   : > { %v3588_v29 = vpop.f32.mrf.mxu0 }
 0x37d   : > { %v3589_v63 = vadd.f32 %v3588_v29, %v6988_v39 }
 0x37f   : > { %3852 = vst [vmem:[%s6986_s19] sm:$0xff] %v3589_v63 }
 0x381   : > { %v3601_v19 = vpop.f32.mrf.mxu1 }
 0x382   : > { %v3602_v3 = vadd.f32 %v3601_v19, %v6988_v39 }
 0x384   : > { %v3590_v23 = vpop.f32.mrf.mxu0  ;;  %3853 = vst [vmem:[%s6986_s19 + $0x8] sm:$0xff] %v3602_v3 }
 0x388   : > { %v3614_v50 = vpop.f32.mrf.mxu2 }
 0x389   : > { %v3615_v55 = vadd.f32 %v3614_v50, %v6988_v39  ;;  %v3603_v9 = vpop.f32.mrf.mxu1 }
 0x38b   : > { %3854 = vst [vmem:[%s6986_s19 + $0x10] sm:$0xff] %v3615_v55 }
 0x390   : > { %v3616_v42 = vpop.f32.mrf.mxu2 }
 0x395   : > { %v3653_v17 = vpop.f32.mrf.mxu1 }
 0x396   : > { %v3640_v36 = vpop.f32.mrf.mxu0  ;;  %v3654_v25 = vadd.f32 %v3653_v17, %v6988_v39 }
 0x397   : > { %v3641_v54 = vadd.f32 %v3640_v36, %v6988_v39 }
 0x398   : > { %3857 = vst [vmem:[%s6986_s19 + $0x28] sm:$0xff] %v3654_v25 }
 0x399   : > { %3856 = vst [vmem:[%s6986_s19 + $0x20] sm:$0xff] %v3641_v54 }
 0x39d   : > { %v3655_v27 = vpop.f32.mrf.mxu1 }
 0x39e   : > { %v3666_v62 = vpop.f32.mrf.mxu2  ;;  %v3642_v20 = vpop.f32.mrf.mxu0 }
 0x39f   : > { %v3627_v15 = vpop.f32.mrf.mxu3  ;;  %v3667_v38 = vadd.f32 %v3666_v62, %v6988_v39 }
 0x3a0   : > { %v3628_v30 = vadd.f32 %v3627_v15, %v6988_v39 }
 0x3a1   : > { %3858 = vst [vmem:[%s6986_s19 + $0x30] sm:$0xff] %v3667_v38 }
 0x3a2   : > { %3855 = vst [vmem:[%s6986_s19 + $0x18] sm:$0xff] %v3628_v30 }
 0x3a6   : > { %v3668_v22 = vpop.f32.mrf.mxu2 }
 0x3a7   : > { %v3629_v28 = vpop.f32.mrf.mxu3 }
 0x3a9   : > { %v3705_v32 = vpop.f32.mrf.mxu1 }
 0x3aa   : > { %v3692_v57 = vpop.f32.mrf.mxu0  ;;  %v3706_v37 = vadd.f32 %v3705_v32, %v6988_v39 }
 0x3ab   : > { %v3693_v40 = vadd.f32 %v3692_v57, %v6988_v39 }
 0x3ac   : > { %3861 = vst [vmem:[%s6986_s19 + $0x48] sm:$0xff] %v3706_v37 }
 0x3ad   : > { %3860 = vst [vmem:[%s6986_s19 + $0x40] sm:$0xff] %v3693_v40 }
 0x3b1   : > { %v3679_v49 = vpop.f32.mrf.mxu3  ;;  %v3707_v11 = vpop.f32.mrf.mxu1 }
 0x3b2   : > { %v3680_v0 = vadd.f32 %v3679_v49, %v6988_v39  ;;  %v3694_v6 = vpop.f32.mrf.mxu0 }
 0x3b3   : > { %v3718_v43 = vpop.f32.mrf.mxu2 }
 0x3b4   : > { %v3719_v5 = vadd.f32 %v3718_v43, %v6988_v39  ;;  %3859 = vst [vmem:[%s6986_s19 + $0x38] sm:$0xff] %v3680_v0 }
 0x3b6   : > { %3862 = vst [vmem:[%s6986_s19 + $0x50] sm:$0xff] %v3719_v5 }
 0x3b9   : > { %v3681_v60 = vpop.f32.mrf.mxu3 }
 0x3bb   : > { %v3720_v48 = vpop.f32.mrf.mxu2 }
 0x3be   : > { %v3744_v46 = vpop.f32.mrf.mxu0 }
 0x3bf   : > { %v3745_v47 = vadd.f32 %v3744_v46, %v6988_v39 }
 0x3c1   : > { %3864 = vst [vmem:[%s6986_s19 + $0x60] sm:$0xff] %v3745_v47  ;;  %v3757_v2 = vpop.f32.mrf.mxu1 }
 0x3c2   : > { %v3758_v59 = vadd.f32 %v3757_v2, %v6988_v39 }
 0x3c4   : > { %3865 = vst [vmem:[%s6986_s19 + $0x68] sm:$0xff] %v3758_v59 }
 0x3c5   : > { %v3731_v24 = vpop.f32.mrf.mxu3 }
 0x3c6   : > { %v3732_v44 = vadd.f32 %v3731_v24, %v6988_v39  ;;  %v3746_v16 = vpop.f32.mrf.mxu0 }
 0x3c8   : > { %3863 = vst [vmem:[%s6986_s19 + $0x58] sm:$0xff] %v3732_v44 }
 0x3c9   : > { %v3770_v45 = vpop.f32.mrf.mxu2  ;;  %v3759_v52 = vpop.f32.mrf.mxu1 }
 0x3ca   : > { %v3771_v13 = vadd.f32 %v3770_v45, %v6988_v39 }
 0x3cc   : > { %3866 = vst [vmem:[%s6986_s19 + $0x70] sm:$0xff] %v3771_v13 }
 0x3cd   : > { %v3733_v1 = vpop.f32.mrf.mxu3 }
 0x3d1   : > { %v3772_v7 = vpop.f32.mrf.mxu2 }
 0x3d2   : > { %v3796_v34 = vpop.f32.mrf.mxu0 }
 0x3d3   : > { %v3797_v58 = vadd.f32 %v3796_v34, %v6988_v39 }
 0x3d5   : > { %3868 = vst [vmem:[%s6986_s19 + $0x80] sm:$0xff] %v3797_v58  ;;  %v3809_v33 = vpop.f32.mrf.mxu1 }
 0x3d6   : > { %v3810_v4 = vadd.f32 %v3809_v33, %v6988_v39 }
 0x3d8   : > { %3869 = vst [vmem:[%s6986_s19 + $0x88] sm:$0xff] %v3810_v4 }
 0x3d9   : > { %v3783_v53 = vpop.f32.mrf.mxu3 }
 0x3da   : > { %v3784_v18 = vadd.f32 %v3783_v53, %v6988_v39  ;;  %v3798_v8 = vpop.f32.mrf.mxu0 }
 0x3dc   : > { %3867 = vst [vmem:[%s6986_s19 + $0x78] sm:$0xff] %v3784_v18 }
 0x3dd   : > { %v3822_v56 = vpop.f32.mrf.mxu2  ;;  %v3811_v12 = vpop.f32.mrf.mxu1 }
 0x3de   : > { %v3823_v26 = vadd.f32 %v3822_v56, %v6988_v39 }
 0x3e0   : > { %3870 = vst [vmem:[%s6986_s19 + $0x90] sm:$0xff] %v3823_v26 }
 0x3e1   : > { %v3785_v61 = vpop.f32.mrf.mxu3 }
 0x3e5   : > { %v3824_v51 = vpop.f32.mrf.mxu2 }
 0x3e6   : > { %v3848_v31 = vpop.f32.mrf.mxu0 }
 0x3e7   : > { %v3849_v21 = vadd.f32 %v3848_v31, %v6988_v39 }
 0x3e9   : > { %3872 = vst [vmem:[%s6986_s19 + $0xa0] sm:$0xff] %v3849_v21 }
 0x3ed   : > { %v3835_v35 = vpop.f32.mrf.mxu3 }
 0x3ee   : > { %v3836_v14 = vadd.f32 %v3835_v35, %v6988_v39  ;;  %v3850_v41 = vpop.f32.mrf.mxu0 }
 0x3f0   : > { %3871 = vst [vmem:[%s6986_s19 + $0x98] sm:$0xff] %v3836_v14 }
 0x3f5   : > { %v3837_v10 = vpop.f32.mrf.mxu3 }
 0x3f6 PF: > { %s13_s12 = sadd.s32 1, %s4919_s12  }
 0x3f7   : > { %p10_p4 = scmp.ge.s32.totalorder %s13_s12, 4  }
 0x3f9   :  { %12 = sbr.rel (!%p10_p4) target bundleno = 1 (0x1), region = 125 }

</bundles_post_ra>
